<compile_context>
chip_gen: v7x
topology: tpu7x:2x2x1
jax: 0.10.0
libtpu: 0.0.40
codegen_flags: <defaults>
</compile_context>

<pallas_src>
import jax
import jax.numpy as jnp
from jax.experimental import pallas as pl
from jax.experimental.pallas import tpu as pltpu

IMAGE_SCALE = 36
LAYER_SIZES = [3 * IMAGE_SCALE * IMAGE_SCALE, 1000, 750, 500, 250, 125, 5]

TK0 = 1024  # layer-0 K stream tile (4 grid steps for K0p=4096); coarse per review


def _round_up(n, m):
    return ((n + m - 1) // m) * m


# ----------------------------- Pallas kernel ------------------------------- #
def _make_fcnet_kernel(n_layers):
    def kernel(*args):
        # args = (x_ref, w0, b0, w1, b1, ..., w_{L-1}, b_{L-1}, o_ref, acc_ref)
        x_ref = args[0]
        o_ref = args[1 + 2 * n_layers]
        acc_ref = args[2 + 2 * n_layers]
        w_refs = [args[1 + 2 * i] for i in range(n_layers)]
        b_refs = [args[2 + 2 * i] for i in range(n_layers)]

        k = pl.program_id(0)

        @pl.when(k == 0)
        def _():
            acc_ref[...] = jnp.zeros_like(acc_ref)

        # Layer 0: streamed K-chunk partial matmul (bf16 x bf16 -> f32 acc).
        # The pipeline prefetches the next W0 chunk while this runs.
        acc_ref[...] += jnp.dot(
            x_ref[...], w_refs[0][...], preferred_element_type=jnp.float32
        )

        @pl.when(k == pl.num_programs(0) - 1)
        def _():
            h = jnp.maximum(acc_ref[...] + b_refs[0][...], 0.0)
            for i in range(1, n_layers):
                h = jnp.dot(
                    h.astype(jnp.bfloat16), w_refs[i][...],
                    preferred_element_type=jnp.float32,
                ) + b_refs[i][...]
                if i < n_layers - 1:                 # final output_fc: no ReLU
                    h = jnp.maximum(h, 0.0)
            o_ref[...] = h.astype(o_ref.dtype)

    return kernel


def fcnet_pallas(x_padded, padded_params, *, tk=TK0):
    """x_padded: (Bp, K0p) bf16 with K0p % tk == 0.
    padded_params: list of ((Kp, Np) bf16, (1, Np) f32)."""
    n_layers = len(padded_params)
    Bp, K0p = x_padded.shape
    assert K0p % tk == 0, (K0p, tk)
    n0 = padded_params[0][0].shape[1]
    n_out = padded_params[-1][0].shape[1]

    flat = []
    for w, b in padded_params:
        flat.extend([w, b])

    def full_spec(arr):
        # Fetched once (constant block index across the grid), VMEM-resident.
        return pl.BlockSpec(arr.shape, lambda k: (0, 0))

    in_specs = [
        pl.BlockSpec((Bp, tk), lambda k: (0, k)),     # x K-chunk
        pl.BlockSpec((tk, n0), lambda k: (k, 0)),     # W0 K-chunk (streamed)
        full_spec(padded_params[0][1]),               # b0
    ]
    for w, b in padded_params[1:]:
        in_specs.append(full_spec(w))
        in_specs.append(full_spec(b))

    return pl.pallas_call(
        _make_fcnet_kernel(n_layers),
        out_shape=jax.ShapeDtypeStruct((Bp, n_out), jnp.float32),
        grid_spec=pltpu.PrefetchScalarGridSpec(
            num_scalar_prefetch=0,
            grid=(K0p // tk,),
            in_specs=in_specs,
            out_specs=pl.BlockSpec((Bp, n_out), lambda k: (0, 0)),
            scratch_shapes=[pltpu.VMEM((Bp, n0), jnp.float32)],
        ),
        compiler_params=pltpu.CompilerParams(
            dimension_semantics=("arbitrary",),
            vmem_limit_bytes=20 * 1024 * 1024,
        ),
    )(x_padded, *flat)


# --------------------------- parameter handling ----------------------------- #
def init_params(key):
    """Synthetic init matching nn.Linear default U[-1/sqrt(fan_in), 1/sqrt(fan_in)].

    Weights stored as (in_features, out_features) so the kernel computes x @ W + b.
    """
    params = []
    for i in range(len(LAYER_SIZES) - 1):
        fan_in, fan_out = LAYER_SIZES[i], LAYER_SIZES[i + 1]
        key, kw, kb = jax.random.split(key, 3)
        bound = 1.0 / (fan_in ** 0.5)
        w = jax.random.uniform(kw, (fan_in, fan_out), jnp.float32, -bound, bound)
        b = jax.random.uniform(kb, (fan_out,), jnp.float32, -bound, bound)
        params.append((w, b))
    return params


def pad_params(params):
    """Zero-pad feature dims to multiples of 128 (layer-0 K to a multiple of
    TK0 so it can be streamed in coarse chunks); weights cast to bf16."""
    padded = []
    for i, (w, b) in enumerate(params):
        kin, nout = w.shape
        kp = _round_up(kin, TK0 if i == 0 else 128)
        np_ = _round_up(nout, 128)
        wp = jnp.zeros((kp, np_), jnp.float32).at[:kin, :nout].set(w)
        bp = jnp.zeros((1, np_), jnp.float32).at[0, :nout].set(b)
        padded.append((wp.astype(jnp.bfloat16), bp))
    return padded


# ------------------------------- forward ------------------------------------ #
@jax.jit
def fcnet_forward(x_nchw, padded_params):
    B = x_nchw.shape[0]
    # PyTorch: x.view(x.size(0), -1) on NCHW -> row-major flatten.
    x = x_nchw.reshape(B, -1)
    K0 = x.shape[1]

    Bp = _round_up(B, 8)
    K0p = padded_params[0][0].shape[0]            # matches W0's padded K (4096)
    xp = jnp.zeros((Bp, K0p), jnp.bfloat16).at[:B, :K0].set(
        x.astype(jnp.bfloat16))

    out = fcnet_pallas(xp, padded_params)
    return out[:B, :LAYER_SIZES[-1]]


def reference_forward(x_nchw, params):
    """Pure-JAX reference mirroring the kernel's quantization (bf16 operands,
    f32 accumulation) so results are directly comparable."""
    h = x_nchw.reshape(x_nchw.shape[0], -1).astype(jnp.float32)
    for i, (w, b) in enumerate(params):
        wq = w.astype(jnp.bfloat16).astype(jnp.float32)
        hq = h.astype(jnp.bfloat16).astype(jnp.float32)
        h = hq @ wq + b
        if i < len(params) - 1:
            h = jnp.maximum(h, 0.0)
    return h


# --------------------------------- main -------------------------------------- #
if __name__ == "__main__":
    key = jax.random.PRNGKey(0)
    key, pkey, xkey = jax.random.split(key, 3)

    params = init_params(pkey)
    padded_params = pad_params(params)

    batch = 2
    x = jax.random.normal(xkey, (batch, 3, IMAGE_SCALE, IMAGE_SCALE), jnp.float32)

    out = fcnet_forward(x, padded_params)
    out = jax.block_until_ready(out)

    ref = reference_forward(x, params)
    assert out.shape == (batch, LAYER_SIZES[-1]), out.shape
    assert jnp.allclose(out, ref, atol=1e-2, rtol=1e-2), (
        f"mismatch: max abs diff {jnp.max(jnp.abs(out - ref))}"
    )

    print("KERNEL_OK")
</pallas_src>

<mosaic_0001>
module attributes {stable_mosaic.version = 11 : i64} {
  func.func @kernel(%arg0: i32, %arg1: memref<8x1024xbf16, #tpu.memory_space<vmem>>, %arg2: memref<1024x1024xbf16, #tpu.memory_space<vmem>>, %arg3: memref<1x1024xf32, #tpu.memory_space<vmem>>, %arg4: memref<1024x768xbf16, #tpu.memory_space<vmem>>, %arg5: memref<1x768xf32, #tpu.memory_space<vmem>>, %arg6: memref<768x512xbf16, #tpu.memory_space<vmem>>, %arg7: memref<1x512xf32, #tpu.memory_space<vmem>>, %arg8: memref<512x256xbf16, #tpu.memory_space<vmem>>, %arg9: memref<1x256xf32, #tpu.memory_space<vmem>>, %arg10: memref<256x128xbf16, #tpu.memory_space<vmem>>, %arg11: memref<1x128xf32, #tpu.memory_space<vmem>>, %arg12: memref<128x128xbf16, #tpu.memory_space<vmem>>, %arg13: memref<1x128xf32, #tpu.memory_space<vmem>>, %arg14: memref<8x128xf32, #tpu.memory_space<vmem>>, %arg15: memref<8x1024xf32, #tpu.memory_space<vmem>>) attributes {dimension_semantics = [#tpu.dimension_semantics<arbitrary>], iteration_bounds = array<i64: 4>, scalar_prefetch = 0 : i64, scratch_operands = 1 : i64, tpu.core_type = #tpu.core_type<tc>, window_params = [{transform_indices = @transform_0, window_bounds = array<i64: 8, 1024>}, {transform_indices = @transform_1, window_bounds = array<i64: 1024, 1024>}, {pipeline_mode = #tpu.pipeline_mode<synchronous>, transform_indices = @transform_2, window_bounds = array<i64: 1, 1024>}, {pipeline_mode = #tpu.pipeline_mode<synchronous>, transform_indices = @transform_3, window_bounds = array<i64: 1024, 768>}, {pipeline_mode = #tpu.pipeline_mode<synchronous>, transform_indices = @transform_4, window_bounds = array<i64: 1, 768>}, {pipeline_mode = #tpu.pipeline_mode<synchronous>, transform_indices = @transform_5, window_bounds = array<i64: 768, 512>}, {pipeline_mode = #tpu.pipeline_mode<synchronous>, transform_indices = @transform_6, window_bounds = array<i64: 1, 512>}, {pipeline_mode = #tpu.pipeline_mode<synchronous>, transform_indices = @transform_7, window_bounds = array<i64: 512, 256>}, {pipeline_mode = #tpu.pipeline_mode<synchronous>, transform_indices = @transform_8, window_bounds = array<i64: 1, 256>}, {pipeline_mode = #tpu.pipeline_mode<synchronous>, transform_indices = @transform_9, window_bounds = array<i64: 256, 128>}, {pipeline_mode = #tpu.pipeline_mode<synchronous>, transform_indices = @transform_10, window_bounds = array<i64: 1, 128>}, {pipeline_mode = #tpu.pipeline_mode<synchronous>, transform_indices = @transform_11, window_bounds = array<i64: 128, 128>}, {pipeline_mode = #tpu.pipeline_mode<synchronous>, transform_indices = @transform_12, window_bounds = array<i64: 1, 128>}, {pipeline_mode = #tpu.pipeline_mode<synchronous>, transform_indices = @transform_13, window_bounds = array<i64: 8, 128>}]} {
    %c0_i32 = arith.constant 0 : i32
    %0 = arith.cmpi eq, %arg0, %c0_i32 : i32
    %1 = arith.extui %0 : i1 to i32
    %c0_i32_0 = arith.constant 0 : i32
    %2 = arith.cmpi ne, %1, %c0_i32_0 : i32
    scf.if %2 {
      %cst_9 = arith.constant 0.000000e+00 : f32
      %12 = vector.broadcast %cst_9 : f32 to vector<8x1024xf32>
      %c0_10 = arith.constant 0 : index
      %c0_11 = arith.constant 0 : index
      %13 = vector.load %arg15[%c0_10, %c0_11] : memref<8x1024xf32, #tpu.memory_space<vmem>>, vector<8x1024xf32>
      tpu.vector_store %arg15[%c0_10, %c0_11], %12 {strides = array<i32>} : memref<8x1024xf32, #tpu.memory_space<vmem>>, vector<8x1024xf32>,
    } else {
    }
    %c0 = arith.constant 0 : index
    %c0_1 = arith.constant 0 : index
    %3 = vector.load %arg15[%c0, %c0_1] : memref<8x1024xf32, #tpu.memory_space<vmem>>, vector<8x1024xf32>
    %c0_2 = arith.constant 0 : index
    %c0_3 = arith.constant 0 : index
    %4 = vector.load %arg1[%c0_2, %c0_3] : memref<8x1024xbf16, #tpu.memory_space<vmem>>, vector<8x1024xbf16>
    %c0_4 = arith.constant 0 : index
    %c0_5 = arith.constant 0 : index
    %5 = vector.load %arg2[%c0_4, %c0_5] : memref<1024x1024xbf16, #tpu.memory_space<vmem>>, vector<1024x1024xbf16>
    %cst = arith.constant dense<0.000000e+00> : vector<8x1024xf32>
    %6 = tpu.matmul %4, %5, %cst {dimension_numbers = #tpu.dot_dimension_numbers<[1], [0], [0], [1], [0, 0, 1, 1], [], []>} : vector<8x1024xbf16>, vector<1024x1024xbf16>, vector<8x1024xf32> -> vector<8x1024xf32>
    %7 = arith.addf %3, %6 : vector<8x1024xf32>
    %c0_6 = arith.constant 0 : index
    %c0_7 = arith.constant 0 : index
    %8 = vector.load %arg15[%c0_6, %c0_7] : memref<8x1024xf32, #tpu.memory_space<vmem>>, vector<8x1024xf32>
    tpu.vector_store %arg15[%c0_6, %c0_7], %7 {strides = array<i32>} : memref<8x1024xf32, #tpu.memory_space<vmem>>, vector<8x1024xf32>,
    %c3_i32 = arith.constant 3 : i32
    %9 = arith.cmpi eq, %arg0, %c3_i32 : i32
    %10 = arith.extui %9 : i1 to i32
    %c0_i32_8 = arith.constant 0 : i32
    %11 = arith.cmpi ne, %10, %c0_i32_8 : i32
    scf.if %11 {
      %c0_9 = arith.constant 0 : index
      %c0_10 = arith.constant 0 : index
      %12 = vector.load %arg15[%c0_9, %c0_10] : memref<8x1024xf32, #tpu.memory_space<vmem>>, vector<8x1024xf32>
      %c0_11 = arith.constant 0 : index
      %c0_12 = arith.constant 0 : index
      %13 = vector.load %arg3[%c0_11, %c0_12] : memref<1x1024xf32, #tpu.memory_space<vmem>>, vector<1x1024xf32>
      %14 = vector.broadcast %13 : vector<1x1024xf32> to vector<8x1024xf32>
      %15 = arith.addf %12, %14 : vector<8x1024xf32>
      %cst_13 = arith.constant 0.000000e+00 : f32
      %16 = vector.broadcast %cst_13 : f32 to vector<8x1024xf32>
      %17 = arith.maximumf %15, %16 : vector<8x1024xf32>
      %18 = arith.truncf %17 : vector<8x1024xf32> to vector<8x1024xbf16>
      %c0_14 = arith.constant 0 : index
      %c0_15 = arith.constant 0 : index
      %19 = vector.load %arg4[%c0_14, %c0_15] : memref<1024x768xbf16, #tpu.memory_space<vmem>>, vector<1024x768xbf16>
      %cst_16 = arith.constant dense<0.000000e+00> : vector<8x768xf32>
      %20 = tpu.matmul %18, %19, %cst_16 {dimension_numbers = #tpu.dot_dimension_numbers<[1], [0], [0], [1], [0, 0, 1, 1], [], []>} : vector<8x1024xbf16>, vector<1024x768xbf16>, vector<8x768xf32> -> vector<8x768xf32>
      %c0_17 = arith.constant 0 : index
      %c0_18 = arith.constant 0 : index
      %21 = vector.load %arg5[%c0_17, %c0_18] : memref<1x768xf32, #tpu.memory_space<vmem>>, vector<1x768xf32>
      %22 = vector.broadcast %21 : vector<1x768xf32> to vector<8x768xf32>
      %23 = arith.addf %20, %22 : vector<8x768xf32>
      %cst_19 = arith.constant 0.000000e+00 : f32
      %24 = vector.broadcast %cst_19 : f32 to vector<8x768xf32>
      %25 = arith.maximumf %23, %24 : vector<8x768xf32>
      %26 = arith.truncf %25 : vector<8x768xf32> to vector<8x768xbf16>
      %c0_20 = arith.constant 0 : index
      %c0_21 = arith.constant 0 : index
      %27 = vector.load %arg6[%c0_20, %c0_21] : memref<768x512xbf16, #tpu.memory_space<vmem>>, vector<768x512xbf16>
      %cst_22 = arith.constant dense<0.000000e+00> : vector<8x512xf32>
      %28 = tpu.matmul %26, %27, %cst_22 {dimension_numbers = #tpu.dot_dimension_numbers<[1], [0], [0], [1], [0, 0, 1, 1], [], []>} : vector<8x768xbf16>, vector<768x512xbf16>, vector<8x512xf32> -> vector<8x512xf32>
      %c0_23 = arith.constant 0 : index
      %c0_24 = arith.constant 0 : index
      %29 = vector.load %arg7[%c0_23, %c0_24] : memref<1x512xf32, #tpu.memory_space<vmem>>, vector<1x512xf32>
      %30 = vector.broadcast %29 : vector<1x512xf32> to vector<8x512xf32>
      %31 = arith.addf %28, %30 : vector<8x512xf32>
      %cst_25 = arith.constant 0.000000e+00 : f32
      %32 = vector.broadcast %cst_25 : f32 to vector<8x512xf32>
      %33 = arith.maximumf %31, %32 : vector<8x512xf32>
      %34 = arith.truncf %33 : vector<8x512xf32> to vector<8x512xbf16>
      %c0_26 = arith.constant 0 : index
      %c0_27 = arith.constant 0 : index
      %35 = vector.load %arg8[%c0_26, %c0_27] : memref<512x256xbf16, #tpu.memory_space<vmem>>, vector<512x256xbf16>
      %cst_28 = arith.constant dense<0.000000e+00> : vector<8x256xf32>
      %36 = tpu.matmul %34, %35, %cst_28 {dimension_numbers = #tpu.dot_dimension_numbers<[1], [0], [0], [1], [0, 0, 1, 1], [], []>} : vector<8x512xbf16>, vector<512x256xbf16>, vector<8x256xf32> -> vector<8x256xf32>
      %c0_29 = arith.constant 0 : index
      %c0_30 = arith.constant 0 : index
      %37 = vector.load %arg9[%c0_29, %c0_30] : memref<1x256xf32, #tpu.memory_space<vmem>>, vector<1x256xf32>
      %38 = vector.broadcast %37 : vector<1x256xf32> to vector<8x256xf32>
      %39 = arith.addf %36, %38 : vector<8x256xf32>
      %cst_31 = arith.constant 0.000000e+00 : f32
      %40 = vector.broadcast %cst_31 : f32 to vector<8x256xf32>
      %41 = arith.maximumf %39, %40 : vector<8x256xf32>
      %42 = arith.truncf %41 : vector<8x256xf32> to vector<8x256xbf16>
      %c0_32 = arith.constant 0 : index
      %c0_33 = arith.constant 0 : index
      %43 = vector.load %arg10[%c0_32, %c0_33] : memref<256x128xbf16, #tpu.memory_space<vmem>>, vector<256x128xbf16>
      %cst_34 = arith.constant dense<0.000000e+00> : vector<8x128xf32>
      %44 = tpu.matmul %42, %43, %cst_34 {dimension_numbers = #tpu.dot_dimension_numbers<[1], [0], [0], [1], [0, 0, 1, 1], [], []>} : vector<8x256xbf16>, vector<256x128xbf16>, vector<8x128xf32> -> vector<8x128xf32>
      %c0_35 = arith.constant 0 : index
      %c0_36 = arith.constant 0 : index
      %45 = vector.load %arg11[%c0_35, %c0_36] : memref<1x128xf32, #tpu.memory_space<vmem>>, vector<1x128xf32>
      %46 = vector.broadcast %45 : vector<1x128xf32> to vector<8x128xf32>
      %47 = arith.addf %44, %46 : vector<8x128xf32>
      %cst_37 = arith.constant 0.000000e+00 : f32
      %48 = vector.broadcast %cst_37 : f32 to vector<8x128xf32>
      %49 = arith.maximumf %47, %48 : vector<8x128xf32>
      %50 = arith.truncf %49 : vector<8x128xf32> to vector<8x128xbf16>
      %c0_38 = arith.constant 0 : index
      %c0_39 = arith.constant 0 : index
      %51 = vector.load %arg12[%c0_38, %c0_39] : memref<128x128xbf16, #tpu.memory_space<vmem>>, vector<128x128xbf16>
      %cst_40 = arith.constant dense<0.000000e+00> : vector<8x128xf32>
      %52 = tpu.matmul %50, %51, %cst_40 {dimension_numbers = #tpu.dot_dimension_numbers<[1], [0], [0], [1], [0, 0, 1, 1], [], []>} : vector<8x128xbf16>, vector<128x128xbf16>, vector<8x128xf32> -> vector<8x128xf32>
      %c0_41 = arith.constant 0 : index
      %c0_42 = arith.constant 0 : index
      %53 = vector.load %arg13[%c0_41, %c0_42] : memref<1x128xf32, #tpu.memory_space<vmem>>, vector<1x128xf32>
      %54 = vector.broadcast %53 : vector<1x128xf32> to vector<8x128xf32>
      %55 = arith.addf %52, %54 : vector<8x128xf32>
      %c0_43 = arith.constant 0 : index
      %c0_44 = arith.constant 0 : index
      %56 = vector.load %arg14[%c0_43, %c0_44] : memref<8x128xf32, #tpu.memory_space<vmem>>, vector<8x128xf32>
      tpu.vector_store %arg14[%c0_43, %c0_44], %55 {strides = array<i32>} : memref<8x128xf32, #tpu.memory_space<vmem>>, vector<8x128xf32>,
    } else {
    }
    return
  }
  func.func @transform_0(%arg0: i32) -> (i32, i32) {
    %c0_i32 = arith.constant 0 : i32
    %c0_i32_0 = arith.constant 0 : i32
    return %c0_i32, %arg0 : i32, i32
  }
  func.func @transform_1(%arg0: i32) -> (i32, i32) {
    %c0_i32 = arith.constant 0 : i32
    %c0_i32_0 = arith.constant 0 : i32
    return %arg0, %c0_i32 : i32, i32
  }
  func.func @transform_2(%arg0: i32) -> (i32, i32) {
    %c0_i32 = arith.constant 0 : i32
    %c0_i32_0 = arith.constant 0 : i32
    %c0_i32_1 = arith.constant 0 : i32
    return %c0_i32, %c0_i32_0 : i32, i32
  }
  func.func @transform_3(%arg0: i32) -> (i32, i32) {
    %c0_i32 = arith.constant 0 : i32
    %c0_i32_0 = arith.constant 0 : i32
    %c0_i32_1 = arith.constant 0 : i32
    return %c0_i32, %c0_i32_0 : i32, i32
  }
  func.func @transform_4(%arg0: i32) -> (i32, i32) {
    %c0_i32 = arith.constant 0 : i32
    %c0_i32_0 = arith.constant 0 : i32
    %c0_i32_1 = arith.constant 0 : i32
    return %c0_i32, %c0_i32_0 : i32, i32
  }
  func.func @transform_5(%arg0: i32) -> (i32, i32) {
    %c0_i32 = arith.constant 0 : i32
    %c0_i32_0 = arith.constant 0 : i32
    %c0_i32_1 = arith.constant 0 : i32
    return %c0_i32, %c0_i32_0 : i32, i32
  }
  func.func @transform_6(%arg0: i32) -> (i32, i32) {
    %c0_i32 = arith.constant 0 : i32
    %c0_i32_0 = arith.constant 0 : i32
    %c0_i32_1 = arith.constant 0 : i32
    return %c0_i32, %c0_i32_0 : i32, i32
  }
  func.func @transform_7(%arg0: i32) -> (i32, i32) {
    %c0_i32 = arith.constant 0 : i32
    %c0_i32_0 = arith.constant 0 : i32
    %c0_i32_1 = arith.constant 0 : i32
    return %c0_i32, %c0_i32_0 : i32, i32
  }
  func.func @transform_8(%arg0: i32) -> (i32, i32) {
    %c0_i32 = arith.constant 0 : i32
    %c0_i32_0 = arith.constant 0 : i32
    %c0_i32_1 = arith.constant 0 : i32
    return %c0_i32, %c0_i32_0 : i32, i32
  }
  func.func @transform_9(%arg0: i32) -> (i32, i32) {
    %c0_i32 = arith.constant 0 : i32
    %c0_i32_0 = arith.constant 0 : i32
    %c0_i32_1 = arith.constant 0 : i32
    return %c0_i32, %c0_i32_0 : i32, i32
  }
  func.func @transform_10(%arg0: i32) -> (i32, i32) {
    %c0_i32 = arith.constant 0 : i32
    %c0_i32_0 = arith.constant 0 : i32
    %c0_i32_1 = arith.constant 0 : i32
    return %c0_i32, %c0_i32_0 : i32, i32
  }
  func.func @transform_11(%arg0: i32) -> (i32, i32) {
    %c0_i32 = arith.constant 0 : i32
    %c0_i32_0 = arith.constant 0 : i32
    %c0_i32_1 = arith.constant 0 : i32
    return %c0_i32, %c0_i32_0 : i32, i32
  }
  func.func @transform_12(%arg0: i32) -> (i32, i32) {
    %c0_i32 = arith.constant 0 : i32
    %c0_i32_0 = arith.constant 0 : i32
    %c0_i32_1 = arith.constant 0 : i32
    return %c0_i32, %c0_i32_0 : i32, i32
  }
  func.func @transform_13(%arg0: i32) -> (i32, i32) {
    %c0_i32 = arith.constant 0 : i32
    %c0_i32_0 = arith.constant 0 : i32
    %c0_i32_1 = arith.constant 0 : i32
    return %c0_i32, %c0_i32_0 : i32, i32
  }
}

</mosaic_0001>

<bundles_post_ra>
// kernel: fcnet_forward.1
= control target key start
LH: loop header
LB: loop body
LE: loop exit
PB: predicated region body
PF: predicated region fallthrough
CT: control target
= control target key end

     0   :  { %s13801_s0 = inlined_call_operand.vmem [shape: bf16[8,4096], index: 0, kind: input, shape index: {}]   ;;  %s13802_s1 = inlined_call_operand.hbm [shape: bf16[4096,1024], index: 1, kind: input, shape index: {}]   ;;  %s13803_s2 = inlined_call_operand.hbm [shape: f32[1,1024], index: 2, kind: input, shape index: {}]   ;;  %s13804_s3 = inlined_call_operand.hbm [shape: bf16[1024,768], index: 3, kind: input, shape index: {}]   ;;  %s13805_s4 = inlined_call_operand.hbm [shape: f32[1,768], index: 4, kind: input, shape index: {}]   ;;  %s13806_s5 = inlined_call_operand.hbm [shape: bf16[768,512], index: 5, kind: input, shape index: {}]   ;;  %s13807_s6 = inlined_call_operand.hbm [shape: f32[1,512], index: 6, kind: input, shape index: {}]   ;;  %s13808_s7 = inlined_call_operand.hbm [shape: bf16[512,256], index: 7, kind: input, shape index: {}]   ;;  %s13809_s8 = inlined_call_operand.hbm [shape: f32[1,256], index: 8, kind: input, shape index: {}]   ;;  %s13810_s9 = inlined_call_operand.hbm [shape: bf16[256,128], index: 9, kind: input, shape index: {}]   ;;  %s13811_s10 = inlined_call_operand.hbm [shape: f32[1,128], index: 10, kind: input, shape index: {}]   ;;  %s13812_s11 = inlined_call_operand.hbm [shape: bf16[128,128], index: 11, kind: input, shape index: {}]   ;;  %s13813_s12 = inlined_call_operand.hbm [shape: f32[1,128], index: 12, kind: input, shape index: {}]   ;;  %s13814_s13 = inlined_call_operand.vmem [shape: f32[8,128], index: 13, kind: output, shape index: {}]  }
   0x1   :  { %13819 = sst [smem:[#allocation30_spill]] %s13801_s0 }
   0x2   :  { %13820 = sst [smem:[#allocation31_spill]] %s13802_s1 }
   0x3   :  { %13821 = sst [smem:[#allocation32_spill]] %s13803_s2 }
   0x4   :  { %13822 = sst [smem:[#allocation33_spill]] %s13804_s3 }
   0x5   :  { %13823 = sst [smem:[#allocation34_spill]] %s13805_s4 }
   0x6   :  { %13824 = sst [smem:[#allocation35_spill]] %s13814_s13 }
   0x7   :  { %18 = vsyncpa [#allocation4], 0 }
   0x8   :  { %20 = vsyncpa [#allocation4 + $0x1], 0 }
   0x9   :  { %21 = vsyncpa [#allocation6], 0 }
   0xa   :  { %22 = vsyncpa [#allocation9], 0 }
   0xb   :  { %23 = vsyncpa [#allocation12], 0 }
   0xc   :  { %24 = vsyncpa [#allocation15], 0 }
   0xd   :  { %25 = vsyncpa [#allocation18], 0 }
   0xe   :  { %26 = vsyncpa [#allocation21], 0  ;;  %s12681_s25 = smov 0   ;;  %s12683_s26 = smov 0  }
   0xf   :  { %s12685_s27 = smov 0   ;;  %s12687_s28 = smov 0  }
  0x10 LB: > { %s12586_s29 = smov [#allocation5]   ;;  %s12702_s14 = sadd.s32 4294967295, %s12584_s28   ;;  %s12584_s28 = sphi %s12687_s28, %s13856_s28   ;;  %s12580_s27 = sphi %s12685_s27, %s13855_s27   ;;  %s12576_s26 = sphi %s12683_s26, %s13854_s26   ;;  %s12572_s25 = sphi %s12681_s25, %s13853_s25  }
  0x11   : > { %s354_s30 = sshll.u32 %s12586_s29, 4  ;;  %p9689_p0 = scmp.ge.s32.totalorder %s12584_s28, 1  ;;  %s12708_s30 = int_to_ptr.vmem [resolvable:$true] %s354_s30 }
  0x12   : > { %p13817_p1 = scmp.eq.s32.totalorder %s12702_s14, 0  ;;  %p341_p2 = scmp.lt.s32.totalorder %s12584_s28, 5 }
  0x13   : > { %s12587_s16 = smov [#allocation8]   ;;  %s12588_s18 = smov [#allocation11]  }
  0x14   : > { %p12710_p4 = pnand %p9689_p0, %p341_p2  ;;  %s378_s17 = sshll.u32 %s12587_s16, 4  ;;  %s12716_s17 = int_to_ptr.vmem [resolvable:$true] %s378_s17 }
  0x15   : > { %s402_s19 = sshll.u32 %s12588_s18, 4  ;;  %s12589_s21 = smov [#allocation14]   ;;  %s12724_s19 = int_to_ptr.vmem [resolvable:$true] %s402_s19 }
  0x16   : > { %s13825_s15 = scalar_select %p12710_p4, 1, 0 }
  0x17   : > { %p11078_p5 = pneg %p12710_p4  ;;  %s12726_s22 = sshll.u32 %s12589_s21, 4  ;;  %s427_s22 = int_to_ptr.vmem [resolvable:$true] %s12726_s22 }
  0x18   : > { %13826 = sst [smem:[#allocation29_spill]] %s13825_s15  ;;  %s13828_s2 = sld [smem:[#allocation32_spill]] }
  0x19   : > { %p12720_p6 = pnand %p11078_p5, %p13817_p1 }
  0x1b   : > { %p12736_p8 = pneg %p12720_p6 }
  0x1e   : > { %s12188_s29 = scalar_lea.hbm %s13828_s2, 128 }
  0x1f   : > { %p12189_p7 = scmp.ne.s32.totalorder %s13828_s2, %s12188_s29  ;;  %p12195_p11 = scmp.lt.u32.totalorder %s12188_s29, %s13828_s2 }
  0x21   : > { %p12191_p9 = pnand %p12736_p8, %p12189_p7 }
  0x23   : > { %p12192_p10 = pneg %p12191_p9 }
  0x25   : > { %p12197_p12 = pnand %p12195_p11, %p12192_p10 }
  0x27   : > { %12200 = shalt.err (!%p12197_p12)
}
  0x28   : > { %s12201_s13 = scalar_lea.vmem %s12708_s30, 128  ;;  %p12209_p5 = scmp.lt.s32.totalorder %s12708_s30, %s12708_s30 }
  0x29   : > { %p12202_p13 = scmp.ne.s32.totalorder %s12708_s30, %s12201_s13  ;;  %p12210_p3 = scmp.lt.s32.totalorder %s12201_s13, %s12201_s13 }
  0x2b   : > { %p12204_p0 = pnand %p12202_p13, %p12736_p8  ;;  %p12211_p7 = por %p12210_p3, %p12209_p5 }
  0x2d   : > { %p12205_p2 = pneg %p12204_p0 }
  0x2f   : > { %p12212_p9 = pnand %p12211_p7, %p12205_p2 }
  0x31   : > { %12215 = shalt.err (!%p12212_p9)
}
  0x32   : > { %11081 = dma.hbm_to_vmem [thread:$0]  (!%p12720_p6), %s13828_s2, 128, %s12708_s30, [#allocation6]  }
  0x33   : > { %s13830_s4 = sld [smem:[#allocation34_spill]] }
  0x39   : > { %s12216_s16 = scalar_lea.hbm %s13830_s4, 96 }
  0x3a   : > { %p12217_p10 = scmp.ne.s32.totalorder %s13830_s4, %s12216_s16  ;;  %p12223_p12 = scmp.lt.u32.totalorder %s12216_s16, %s13830_s4 }
  0x3c   : > { %p12219_p3 = pnand %p12217_p10, %p12736_p8 }
  0x3e   : > { %p12220_p11 = pneg %p12219_p3 }
  0x40   : > { %p12225_p13 = pnand %p12223_p12, %p12220_p11 }
  0x42   : > { %12228 = shalt.err (!%p12225_p13)
}
  0x43   : > { %s12229_s30 = scalar_lea.vmem %s12716_s17, 96  ;;  %p12237_p7 = scmp.lt.s32.totalorder %s12716_s17, %s12716_s17 }
  0x44   : > { %p12230_p0 = scmp.ne.s32.totalorder %s12716_s17, %s12229_s30  ;;  %p12238_p9 = scmp.lt.s32.totalorder %s12229_s30, %s12229_s30 }
  0x46   : > { %p12232_p2 = pnand %p12230_p0, %p12736_p8  ;;  %p12239_p10 = por %p12238_p9, %p12237_p7 }
  0x48   : > { %p12233_p5 = pneg %p12232_p2 }
  0x4a   : > { %p12240_p3 = pnand %p12239_p10, %p12233_p5 }
  0x4c   : > { %12243 = shalt.err (!%p12240_p3)
}
  0x4d   : > { %11087 = dma.hbm_to_vmem [thread:$0]  (!%p12720_p6), %s13830_s4, 96, %s12716_s17, [#allocation9]  }
  0x4e   : > { %s12244_s24 = scalar_lea.hbm %s13807_s6, 64 }
  0x4f   : > { %p12245_p11 = scmp.ne.s32.totalorder %s13807_s6, %s12244_s24  ;;  %p12251_p0 = scmp.lt.u32.totalorder %s12244_s24, %s13807_s6 }
  0x51   : > { %p12247_p12 = pnand %p12245_p11, %p12736_p8 }
  0x53   : > { %p12248_p13 = pneg %p12247_p12 }
  0x55   : > { %p12253_p2 = pnand %p12251_p0, %p12248_p13 }
  0x57   : > { %12256 = shalt.err (!%p12253_p2)
}
  0x58   : > { %s12257_s17 = scalar_lea.vmem %s12724_s19, 64  ;;  %p12265_p10 = scmp.lt.s32.totalorder %s12724_s19, %s12724_s19 }
  0x59   : > { %p12258_p5 = scmp.ne.s32.totalorder %s12724_s19, %s12257_s17  ;;  %p12266_p3 = scmp.lt.s32.totalorder %s12257_s17, %s12257_s17 }
  0x5b   : > { %p12260_p7 = pnand %p12258_p5, %p12736_p8  ;;  %p12267_p11 = por %p12266_p3, %p12265_p10 }
  0x5d   : > { %p12261_p9 = pneg %p12260_p7 }
  0x5f   : > { %p12268_p12 = pnand %p12267_p11, %p12261_p9 }
  0x61   : > { %12271 = shalt.err (!%p12268_p12)
}
  0x62   : > { %11093 = dma.hbm_to_vmem [thread:$0]  (!%p12720_p6), %s13807_s6, 64, %s12724_s19, [#allocation12]  }
  0x63   : > { %s12590_s15 = smov [#allocation17]   ;;  %s12272_s29 = scalar_lea.hbm %s13809_s8, 32 }
  0x64   : > { %s450_s0 = sshll.u32 %s12590_s15, 4  ;;  %p12273_p13 = scmp.ne.s32.totalorder %s13809_s8, %s12272_s29  ;;  %s451_s0 = int_to_ptr.vmem [resolvable:$true] %s450_s0 }
  0x65   : > { %p12279_p5 = scmp.lt.u32.totalorder %s12272_s29, %s13809_s8 }
  0x66   : > { %p12275_p0 = pnand %p12273_p13, %p12736_p8 }
  0x68   : > { %p12276_p2 = pneg %p12275_p0 }
  0x6a   : > { %p12281_p7 = pnand %p12279_p5, %p12276_p2 }
  0x6c   : > { %12284 = shalt.err (!%p12281_p7)
}
  0x6d   : > { %s12285_s19 = scalar_lea.vmem %s427_s22, 32  ;;  %p12293_p11 = scmp.lt.s32.totalorder %s427_s22, %s427_s22 }
  0x6e   : > { %p12286_p9 = scmp.ne.s32.totalorder %s427_s22, %s12285_s19  ;;  %p12294_p12 = scmp.lt.s32.totalorder %s12285_s19, %s12285_s19 }
  0x70   : > { %p12288_p10 = pnand %p12286_p9, %p12736_p8  ;;  %p12295_p1 = por %p12294_p12, %p12293_p11 }
  0x72   : > { %p12289_p3 = pneg %p12288_p10 }
  0x74   : > { %p12296_p4 = pnand %p12295_p1, %p12289_p3 }
  0x76   : > { %12299 = shalt.err (!%p12296_p4)
}
  0x77   : > { %11099 = dma.hbm_to_vmem [thread:$0]  (!%p12720_p6), %s13809_s8, 32, %s427_s22, [#allocation15]  }
  0x78   : > { %s12300_s24 = scalar_lea.hbm %s13811_s10, 16 }
  0x79   : > { %p12301_p13 = scmp.ne.s32.totalorder %s13811_s10, %s12300_s24  ;;  %p12307_p4 = scmp.lt.u32.totalorder %s12300_s24, %s13811_s10 }
  0x7b   : > { %p12303_p0 = pnand %p12301_p13, %p12736_p8 }
  0x7d   : > { %p12304_p1 = pneg %p12303_p0 }
  0x7f   : > { %p12309_p2 = pnand %p12307_p4, %p12304_p1 }
  0x81   : > { %12312 = shalt.err (!%p12309_p2)
}
  0x82   : > { %s12313_s17 = scalar_lea.vmem %s451_s0, 16  ;;  %s12320_s22 = scalar_lea.vmem %s451_s0, 32 }
  0x83   : > { %p12314_p5 = scmp.ne.s32.totalorder %s451_s0, %s12313_s17  ;;  %p12321_p10 = scmp.lt.s32.totalorder %s451_s0, %s451_s0 }
  0x84   : > { %p12322_p3 = scmp.lt.s32.totalorder %s12320_s22, %s12313_s17 }
  0x85   : > { %p12316_p7 = pnand %p12314_p5, %p12736_p8 }
  0x86   : > { %p12323_p11 = por %p12322_p3, %p12321_p10 }
  0x87   : > { %p12317_p9 = pneg %p12316_p7 }
  0x89   : > { %p12324_p12 = pnand %p12323_p11, %p12317_p9 }
  0x8b   : > { %12327 = shalt.err (!%p12324_p12)
}
  0x8c   : > { %11105 = dma.hbm_to_vmem [thread:$0]  (!%p12720_p6), %s13811_s10, 16, %s451_s0, [#allocation18]  }
  0x8d   : > { %s12591_s1 = smov [#allocation7]   ;;  %s13831_s3 = sld [smem:[#allocation33_spill]] }
  0x8e   : > { %s364_s15 = sshll.u32 %s12591_s1, 4  ;;  %s365_s15 = int_to_ptr.vmem [resolvable:$true] %s364_s15 }
  0x93   : > { %s12328_s29 = scalar_lea.hbm %s13831_s3, 49152 }
  0x94   : > { %p12329_p13 = scmp.ne.s32.totalorder %s13831_s3, %s12328_s29  ;;  %p12335_p4 = scmp.lt.u32.totalorder %s12328_s29, %s13831_s3 }
  0x96   : > { %p12331_p0 = pnand %p12329_p13, %p12736_p8 }
  0x98   : > { %p12332_p1 = pneg %p12331_p0 }
  0x9a   : > { %p12337_p2 = pnand %p12335_p4, %p12332_p1 }
  0x9c   : > { %12340 = shalt.err (!%p12337_p2)
}
  0x9d   : > { %s12341_s0 = scalar_lea.vmem %s365_s15, 49152  ;;  %p12349_p10 = scmp.lt.s32.totalorder %s365_s15, %s365_s15 }
  0x9e   : > { %p12342_p5 = scmp.ne.s32.totalorder %s365_s15, %s12341_s0  ;;  %p12350_p3 = scmp.lt.s32.totalorder %s12341_s0, %s12341_s0 }
  0xa0   : > { %p12344_p7 = pnand %p12342_p5, %p12736_p8  ;;  %p12351_p11 = por %p12350_p3, %p12349_p10 }
  0xa2   : > { %p12345_p9 = pneg %p12344_p7 }
  0xa4   : > { %p12352_p12 = pnand %p12351_p11, %p12345_p9 }
  0xa6   : > { %12355 = shalt.err (!%p12352_p12)
}
  0xa7   : > { %s12592_s22 = smov 384   ;;  %s12593_s19 = smov 24  }
  0xa8   : > { %11084 = dma.hbm_to_vmem [thread:$0]  (!%p12720_p6), %s13831_s3, 49152, %s365_s15, [#allocation6], %s12592_s22, %s12592_s22, %s12593_s19  }
  0xa9   : > { %s12594_s23 = smov [#allocation10]   ;;  %s12356_s21 = scalar_lea.hbm %s13806_s5, 24576 }
  0xaa   : > { %s388_s24 = sshll.u32 %s12594_s23, 4  ;;  %p12357_p13 = scmp.ne.s32.totalorder %s13806_s5, %s12356_s21  ;;  %s389_s24 = int_to_ptr.vmem [resolvable:$true] %s388_s24 }
  0xab   : > { %p12363_p4 = scmp.lt.u32.totalorder %s12356_s21, %s13806_s5 }
  0xac   : > { %p12359_p0 = pnand %p12357_p13, %p12736_p8 }
  0xae   : > { %p12360_p1 = pneg %p12359_p0 }
  0xb0   : > { %p12365_p2 = pnand %p12363_p4, %p12360_p1 }
  0xb2   : > { %12368 = shalt.err (!%p12365_p2)
}
  0xb3   : > { %s12369_s15 = scalar_lea.vmem %s389_s24, 24576  ;;  %p12377_p10 = scmp.lt.s32.totalorder %s389_s24, %s389_s24 }
  0xb4   : > { %p12370_p5 = scmp.ne.s32.totalorder %s389_s24, %s12369_s15  ;;  %p12378_p3 = scmp.lt.s32.totalorder %s12369_s15, %s12369_s15 }
  0xb6   : > { %p12372_p7 = pnand %p12370_p5, %p12736_p8  ;;  %p12379_p11 = por %p12378_p3, %p12377_p10 }
  0xb8   : > { %p12373_p9 = pneg %p12372_p7 }
  0xba   : > { %p12380_p12 = pnand %p12379_p11, %p12373_p9 }
  0xbc   : > { %12383 = shalt.err (!%p12380_p12)
}
  0xbd   : > { %s12595_s22 = smov 256   ;;  %s12596_s19 = smov 16  }
  0xbe   : > { %11090 = dma.hbm_to_vmem [thread:$0]  (!%p12720_p6), %s13806_s5, 24576, %s389_s24, [#allocation9], %s12595_s22, %s12595_s22, %s12596_s19  }
  0xbf   : > { %s12597_s1 = smov [#allocation13]   ;;  %s12384_s21 = scalar_lea.hbm %s13808_s7, 8192 }
  0xc0   : > { %s412_s23 = sshll.u32 %s12597_s1, 4  ;;  %p12385_p13 = scmp.ne.s32.totalorder %s13808_s7, %s12384_s21  ;;  %s413_s23 = int_to_ptr.vmem [resolvable:$true] %s412_s23 }
  0xc1   : > { %p12391_p4 = scmp.lt.u32.totalorder %s12384_s21, %s13808_s7 }
  0xc2   : > { %p12387_p0 = pnand %p12385_p13, %p12736_p8 }
  0xc4   : > { %p12388_p1 = pneg %p12387_p0 }
  0xc6   : > { %p12393_p2 = pnand %p12391_p4, %p12388_p1 }
  0xc8   : > { %12396 = shalt.err (!%p12393_p2)
}
  0xc9   : > { %s12397_s24 = scalar_lea.vmem %s413_s23, 8192  ;;  %p12405_p10 = scmp.lt.s32.totalorder %s413_s23, %s413_s23 }
  0xca   : > { %p12398_p5 = scmp.ne.s32.totalorder %s413_s23, %s12397_s24  ;;  %p12406_p3 = scmp.lt.s32.totalorder %s12397_s24, %s12397_s24 }
  0xcc   : > { %p12400_p7 = pnand %p12398_p5, %p12736_p8  ;;  %p12407_p11 = por %p12406_p3, %p12405_p10 }
  0xce   : > { %p12401_p9 = pneg %p12400_p7 }
  0xd0   : > { %p12408_p12 = pnand %p12407_p11, %p12401_p9 }
  0xd2   : > { %12411 = shalt.err (!%p12408_p12)
}
  0xd3   : > { %s12598_s22 = smov 128   ;;  %s12599_s19 = smov 8  }
  0xd4   : > { %11096 = dma.hbm_to_vmem [thread:$0]  (!%p12720_p6), %s13808_s7, 8192, %s413_s23, [#allocation12], %s12598_s22, %s12598_s22, %s12599_s19  }
  0xd5   : > { %s12600_s1 = smov [#allocation16]   ;;  %s12412_s13 = scalar_lea.hbm %s13810_s9, 2048 }
  0xd6   : > { %s436_s29 = sshll.u32 %s12600_s1, 4  ;;  %p12413_p13 = scmp.ne.s32.totalorder %s13810_s9, %s12412_s13  ;;  %s437_s29 = int_to_ptr.vmem [resolvable:$true] %s436_s29 }
  0xd7   : > { %p12419_p4 = scmp.lt.u32.totalorder %s12412_s13, %s13810_s9 }
  0xd8   : > { %p12415_p0 = pnand %p12413_p13, %p12736_p8 }
  0xda   : > { %p12416_p1 = pneg %p12415_p0 }
  0xdc   : > { %p12421_p2 = pnand %p12419_p4, %p12416_p1 }
  0xde   : > { %12424 = shalt.err (!%p12421_p2)
}
  0xdf   : > { %s12425_s23 = scalar_lea.vmem %s437_s29, 2048  ;;  %p12433_p10 = scmp.lt.s32.totalorder %s437_s29, %s437_s29 }
  0xe0   : > { %p12426_p5 = scmp.ne.s32.totalorder %s437_s29, %s12425_s23  ;;  %p12434_p3 = scmp.lt.s32.totalorder %s12425_s23, %s12425_s23 }
  0xe2   : > { %p12428_p7 = pnand %p12426_p5, %p12736_p8  ;;  %p12435_p11 = por %p12434_p3, %p12433_p10 }
  0xe4   : > { %p12429_p9 = pneg %p12428_p7 }
  0xe6   : > { %p12436_p12 = pnand %p12435_p11, %p12429_p9 }
  0xe8   : > { %12439 = shalt.err (!%p12436_p12)
}
  0xe9   : > { %s12601_s22 = smov 64   ;;  %s12602_s19 = smov 4  }
  0xea   : > { %11102 = dma.hbm_to_vmem [thread:$0]  (!%p12720_p6), %s13810_s9, 2048, %s437_s29, [#allocation15], %s12601_s22, %s12601_s22, %s12602_s19  }
  0xeb   : > { %s12603_s1 = smov [#allocation19]   ;;  %s12604_s21 = smov [#allocation20]  }
  0xec   : > { %s460_s16 = sshll.u32 %s12603_s1, 4  ;;  %s474_s13 = sshll.u32 %s12604_s21, 4  ;;  %s461_s16 = int_to_ptr.vmem [resolvable:$true] %s460_s16  ;;  %s475_s13 = int_to_ptr.vmem [resolvable:$true] %s474_s13 }
  0xed   : > { %s12440_s15 = scalar_lea.hbm %s13812_s11, 1024 }
  0xee   : > { %p12441_p13 = scmp.ne.s32.totalorder %s13812_s11, %s12440_s15  ;;  %p12447_p4 = scmp.lt.u32.totalorder %s12440_s15, %s13812_s11 }
  0xf0   : > { %p12443_p0 = pnand %p12441_p13, %p12736_p8 }
  0xf2   : > { %p12444_p1 = pneg %p12443_p0 }
  0xf4   : > { %p12449_p2 = pnand %p12447_p4, %p12444_p1 }
  0xf6   : > { %12452 = shalt.err (!%p12449_p2)
}
  0xf7   : > { %s12453_s29 = scalar_lea.vmem %s461_s16, 1024  ;;  %p12461_p10 = scmp.lt.s32.totalorder %s461_s16, %s461_s16 }
  0xf8   : > { %p12454_p5 = scmp.ne.s32.totalorder %s461_s16, %s12453_s29  ;;  %p12462_p3 = scmp.lt.s32.totalorder %s12453_s29, %s12453_s29 }
  0xfa   : > { %p12456_p7 = pnand %p12454_p5, %p12736_p8  ;;  %p12463_p11 = por %p12462_p3, %p12461_p10 }
  0xfc   : > { %p12457_p9 = pneg %p12456_p7 }
  0xfe   : > { %p12464_p12 = pnand %p12463_p11, %p12457_p9 }
 0x100   : > { %12467 = shalt.err (!%p12464_p12)
}
 0x101   : > { %11108 = dma.hbm_to_vmem [thread:$0]  (!%p12720_p6), %s13812_s11, 1024, %s461_s16, [#allocation18], %s12601_s22, %s12601_s22, %s12602_s19  }
 0x102   : > { %s12468_s1 = scalar_lea.hbm %s13813_s12, 16 }
 0x103   : > { %p12469_p13 = scmp.ne.s32.totalorder %s13813_s12, %s12468_s1  ;;  %p12475_p4 = scmp.lt.u32.totalorder %s12468_s1, %s13813_s12 }
 0x105   : > { %p12471_p0 = pnand %p12469_p13, %p12736_p8 }
 0x107   : > { %p12472_p1 = pneg %p12471_p0 }
 0x109   : > { %p12477_p2 = pnand %p12475_p4, %p12472_p1 }
 0x10b   : > { %12480 = shalt.err (!%p12477_p2)
}
 0x10c   : > { %s12481_s24 = scalar_lea.vmem %s475_s13, 16  ;;  %s12488_s22 = scalar_lea.vmem %s475_s13, 32 }
 0x10d   : > { %p12482_p5 = scmp.ne.s32.totalorder %s475_s13, %s12481_s24  ;;  %p12489_p10 = scmp.lt.s32.totalorder %s475_s13, %s475_s13 }
 0x10e   : > { %p12490_p3 = scmp.lt.s32.totalorder %s12488_s22, %s12481_s24 }
 0x10f   : > { %p12484_p7 = pnand %p12482_p5, %p12736_p8 }
 0x110   : > { %p12491_p11 = por %p12490_p3, %p12489_p10 }
 0x111   : > { %p12485_p9 = pneg %p12484_p7 }
 0x113   : > { %p12492_p12 = pnand %p12491_p11, %p12485_p9 }
 0x115   : > { %12495 = shalt.err (!%p12492_p12)
}
 0x116   : > { %11111 = dma.hbm_to_vmem [thread:$0]  (!%p12720_p6), %s13813_s12, 16, %s475_s13, [#allocation21]  }
 0x117   : > { %s12949_s18 = sadd.s32 1, %s12584_s28   ;;  %s65_s23 = sadd.s32 1, %s12580_s27 }
 0x118   : > { %s62_s20 = ssub.s32 %s12584_s28, %s12949_s18  ;;  %p72_p13 = scmp.ne.s32.totalorder %s12580_s27, %s12576_s26 }
 0x119   : > { %p63_p8 = scmp.eq.s32.totalorder %s62_s20, 0  ;;  %p73_p0 = scmp.eq.s32.totalorder %s12584_s28, 0 }
 0x11a   : > { %p78_p1 = scmp.ne.s32.totalorder %s12576_s26, %s12572_s25  ;;  %p13832_p2 = scmp.eq.s32.totalorder %s12702_s14, 0 }
 0x11b   : > { %s12960_s29 = scalar_select %p63_p8, %s12580_s27, %s65_s23  }
 0x11c   : > { %p74_p4 = por %p73_p0, %p72_p13  ;;  %p12964_p5 = por %p13832_p2, %p78_p1 }
 0x11d   : > { %p11127_p7 = scmp.lt.s32.totalorder %s12584_s28, 4  ;;  %s494_s30 = sand.u32 1, %s12580_s27  }
 0x11e   : > { %s9702_s13 = sshll.u32 %s494_s30, 12  ;;  %s10912_s3 = sshll.u32 %s12584_s28, 16 }
 0x11f   : > { %s13834_s21 = sld [smem:[#allocation31_spill]]  ;;  %s498_s25 = scalar_lea.vmem [#allocation3], %s9702_s13 }
 0x120   : > { %s506_s0 = sshll.u32 %s498_s25, 4  ;;  %p12978_p6 = pnand %p11127_p7, %p74_p4  ;;  %s12976_s0 = int_to_ptr.vmem [resolvable:$true] %s506_s0 }
 0x121   : > { %s12982_s28 = scalar_lea.sflag [#allocation4], %s494_s30 }
 0x122   : > { %p12498_p10 = pneg %p12978_p6 }
 0x125   : > { %s12974_s17 = scalar_lea.hbm %s13834_s21, %s10912_s3  ;;  %s12501_s16 = scalar_lea.hbm %s13834_s21, 262144 }
 0x126   : > { %s12496_s24 = scalar_lea.hbm %s12974_s17, 65536  ;;  %p12502_p12 = scmp.lt.u32.totalorder %s12974_s17, %s13834_s21 }
 0x127   : > { %p12497_p9 = scmp.ne.s32.totalorder %s12974_s17, %s12496_s24  ;;  %p12503_p8 = scmp.lt.u32.totalorder %s12501_s16, %s12496_s24 }
 0x128   : > { %p12505_p0 = scmp.lt.u32.totalorder %s12496_s24, %s12974_s17 }
 0x129   : > { %p12499_p3 = pnand %p12498_p10, %p12497_p9  ;;  %p12504_p13 = por %p12503_p8, %p12502_p12 }
 0x12b   : > { %p12500_p11 = pneg %p12499_p3  ;;  %p12506_p1 = por %p12505_p0, %p12504_p13 }
 0x12d   : > { %p12507_p4 = pnand %p12506_p1, %p12500_p11 }
 0x12f   : > { %12510 = shalt.err (!%p12507_p4)
}
 0x130   : > { %s12511_s30 = scalar_lea.vmem %s12976_s0, 65536  ;;  %s12605_s13 = smov [#allocation3]  }
 0x131   : > { %p12512_p2 = scmp.ne.s32.totalorder %s12976_s0, %s12511_s30  ;;  %s12516_s3 = sshll.u32 %s12605_s13, 4  ;;  %s12517_s3 = int_to_ptr.vmem [resolvable:$false] %s12516_s3 }
 0x132   : > { %s12518_s4 = scalar_lea.vmem %s12517_s3, 131072  ;;  %p12519_p3 = scmp.lt.s32.totalorder %s12976_s0, %s12517_s3 }
 0x133   : > { %p12514_p7 = pnand %p12512_p2, %p12498_p10  ;;  %p12520_p12 = scmp.lt.s32.totalorder %s12518_s4, %s12511_s30 }
 0x135   : > { %p12515_p9 = pneg %p12514_p7  ;;  %p12521_p8 = por %p12520_p12, %p12519_p3 }
 0x137   : > { %p12522_p13 = pnand %p12521_p8, %p12515_p9 }
 0x139   : > { %12525 = shalt.err (!%p12522_p13)
}
 0x13a   : > { %s12606_s1 = smov 512   ;;  %s12607_s25 = smov 32  }
 0x13b   : > { %11115 = dma.hbm_to_vmem [thread:$0]  (!%p12978_p6), %s12974_s17, 65536, %s12976_s0, %s12982_s28, %s12606_s1, %s12606_s1, %s12607_s25  }
 0x13c   : > { %s13836_s24 = sld [smem:[#allocation29_spill]] }
 0x142   : > { %p13837_p10 = scmp.ne.s32.totalorder %s13836_s24, 0 }
 0x143   : > { %s520_s22 = sand.u32 (!%p13837_p10), 1, %s12576_s26  }
 0x144   : > { %518 = sbr.rel (%p13837_p10) target bundleno = 2851 (0xb23), region = 72  ;;  %s9707_s19 = sshll.u32 (!%p13837_p10), %s520_s22, 12 }
 0x145   : > { %s521_s16 = scalar_lea.sflag (!%p13837_p10), [#allocation4], %s520_s22  ;;  %s13013_s20 = scalar_lea.vmem (!%p13837_p10), [#allocation3], %s9707_s19 }
 0x14b   : > { %12543 = dma.done.wait (%p12964_p5), %s521_s16, 65536  }
 0x14c   : > { %12545 = vsyncadd (%p12964_p5), %s521_s16, 4294901760  ;;  %p13838_p11 = scmp.eq.s32.totalorder %s12702_s14, 0 }
 0x14e   : > { %12547 = dma.done.wait (%p13838_p11), [#allocation6], 49280   ;;  %p13839_p6 = pmov %p13838_p11 }
 0x150   : > { %12549 = vsyncadd (%p13839_p6), [#allocation6], 4294918016  ;;  %p13840_p0 = pmov %p13839_p6 }
 0x152   : > { %12551 = dma.done.wait (%p13840_p0), [#allocation9], 24672   ;;  %p13841_p1 = pmov %p13840_p0 }
 0x153   : > { %p13842_p4 = pmov %p13840_p0 }
 0x154   : > { %12553 = vsyncadd (%p13841_p1), [#allocation9], 4294942624 }
 0x155   : > { %12555 = dma.done.wait (%p13842_p4), [#allocation12], 8256   ;;  %p13843_p2 = pmov %p13840_p0 }
 0x156   : > { %p13844_p5 = pmov %p13840_p0 }
 0x157   : > { %12557 = vsyncadd (%p13843_p2), [#allocation12], 4294959040 }
 0x158   : > { %12559 = dma.done.wait (%p13844_p5), [#allocation15], 2080   ;;  %p13845_p7 = pmov %p13840_p0 }
 0x159   : > { %p13846_p9 = pmov %p13840_p0 }
 0x15a   : > { %12561 = vsyncadd (%p13845_p7), [#allocation15], 4294965216 }
 0x15b   : > { %12563 = dma.done.wait (%p13846_p9), [#allocation18], 1040   ;;  %p13847_p3 = pmov %p13840_p0 }
 0x15c   : > { %p13848_p12 = pmov %p13840_p0 }
 0x15d   : > { %12565 = vsyncadd (%p13847_p3), [#allocation18], 4294966256 }
 0x15e   : > { %12567 = dma.done.wait (%p13848_p12), [#allocation21], 16   ;;  %p13849_p8 = pmov %p13840_p0 }
 0x15f   : > { %s9719_s2 = sshll.u32 %s12702_s14, 3  ;;  %s13850_s28 = sld [smem:[#allocation30_spill]] }
 0x160   : > { %12569 = vsyncadd (%p13849_p8), [#allocation21], 4294967280  ;;  %p612_p13 = scmp.lt.s32.totalorder %s9719_s2, 31  ;;  %p13851_p10 = scmp.ne.s32.totalorder %s12702_s14, 0 }
 0x161   : > { %v12608_v0 = vmov (!%p13851_p10), 0.0  }
 0x162   : > { %s13858_s2 = smov (!%p612_p13, %s9719_s2), 31  ;;  %622 = sbr.rel (%p13851_p10) target bundleno = 361 (0x169), region = 124 }
 0x163   : > { %s9720_s17 = sshll.u32 %s13858_s2, 2  ;;  %623 = vst [vmem:[#allocation2] sm:$0xff] (!%p13851_p10), %v12608_v0  ;;  %624 = vst [vmem:[#allocation2 + $0x8] sm:$0xff] (!%p13851_p10), %v12608_v0 }
 0x164   : > { %625 = vst [vmem:[#allocation2 + $0x10] sm:$0xff] (!%p13851_p10), %v12608_v0  ;;  %626 = vst [vmem:[#allocation2 + $0x18] sm:$0xff] (!%p13851_p10), %v12608_v0 }
 0x165   : > { %s13047_s23 = scalar_lea.vmem %s13850_s28, %s9720_s17  ;;  %627 = vst [vmem:[#allocation2 + $0x20] sm:$0xff] (!%p13851_p10), %v12608_v0  ;;  %628 = vst [vmem:[#allocation2 + $0x28] sm:$0xff] (!%p13851_p10), %v12608_v0 }
 0x166   : > { %629 = vst [vmem:[#allocation2 + $0x30] sm:$0xff] (!%p13851_p10), %v12608_v0  ;;  %630 = vst [vmem:[#allocation2 + $0x38] sm:$0xff] (!%p13851_p10), %v12608_v0 }
 0x169 PF: > { %v643_v1 = vld [vmem:[%s13013_s20] sm:$0xff]  ;;  %v13083_v55 = vld [vmem:[%s13047_s23 + $0x8] sm:$0xff]  ;;  %p10242_p11 = scmp.ne.s32.totalorder %s12702_s14, 3 }
 0x16a   : > { %v647_v2 = vld [vmem:[%s13013_s20 + $0x20] sm:$0xff]  ;;  %v13093_v60 = vcombine.high %v13083_v55, %v13083_v55  ;;  %vm12610_vm0 = vmmov (!%p10242_p11), 0   ;;  %s13852_s13 = sld [smem:[#allocation35_spill]] (!%p10242_p11) }
 0x16b   : > { %v771_v3 = vld [vmem:[%s13013_s20 + $0x400] sm:$0xff]  ;;  %v9731_v4 = vcombine.high %v643_v1, %v647_v2  ;;  %v9730_v6 = vcombine.low %v643_v1, %v647_v2 }
 0x16c   : > { %v775_v5 = vld [vmem:[%s13013_s20 + $0x420] sm:$0xff]  ;;  %3816 = vmatprep.mubr.bf16.mxu1 %v13093_v60 }
 0x16d   : > { %v651_v7 = vld [vmem:[%s13013_s20 + $0x40] sm:$0xff]  ;;  %v9859_v9 = vcombine.high %v771_v3, %v775_v5  ;;  %v9858_v10 = vcombine.low %v771_v3, %v775_v5  ;;  %3743 = vmatprep.subr.bf16.mxu0 %v9731_v4 }
 0x16e   : > { %v655_v8 = vld [vmem:[%s13013_s20 + $0x60] sm:$0xff]  ;;  %3744 = vmatpush1.bf16.msra.mxu0 %v9730_v6 }
 0x16f   : > { %v9739_v11 = vcombine.high %v651_v7, %v655_v8  ;;  %v779_v12 = vld [vmem:[%s13013_s20 + $0x440] sm:$0xff]  ;;  %3784 = vmatprep.subr.bf16.mxu1 %v9859_v9  ;;  %v9738_v19 = vcombine.low %v651_v7, %v655_v8 }
 0x170   : > { %v783_v13 = vld [vmem:[%s13013_s20 + $0x460] sm:$0xff]  ;;  %3785 = vmatpush1.bf16.msra.mxu1 %v9858_v10 }
 0x171   : > { %v659_v14 = vld [vmem:[%s13013_s20 + $0x80] sm:$0xff]  ;;  %v9867_v15 = vcombine.high %v779_v12, %v783_v13  ;;  %3745 = vmatprep.subr.bf16.mxu0 %v9739_v11  ;;  %v9866_v20 = vcombine.low %v779_v12, %v783_v13 }
 0x172   : > { %v663_v16 = vld [vmem:[%s13013_s20 + $0xa0] sm:$0xff]  ;;  %3746 = vmatpush1.bf16.msra.mxu0 %v9738_v19 }
 0x173   : > { %v787_v17 = vld [vmem:[%s13013_s20 + $0x480] sm:$0xff]  ;;  %v9747_v21 = vcombine.high %v659_v14, %v663_v16  ;;  %3786 = vmatprep.subr.bf16.mxu1 %v9867_v15  ;;  %v9746_v27 = vcombine.low %v659_v14, %v663_v16 }
 0x174   : > { %v791_v18 = vld [vmem:[%s13013_s20 + $0x4a0] sm:$0xff]  ;;  %3787 = vmatpush1.bf16.msra.mxu1 %v9866_v20 }
 0x175   : > { %v9875_v22 = vcombine.high %v787_v17, %v791_v18  ;;  %v667_v23 = vld [vmem:[%s13013_s20 + $0xc0] sm:$0xff]  ;;  %3747 = vmatprep.subr.bf16.mxu0 %v9747_v21  ;;  %v9874_v28 = vcombine.low %v787_v17, %v791_v18 }
 0x176   : > { %v671_v24 = vld [vmem:[%s13013_s20 + $0xe0] sm:$0xff]  ;;  %3748 = vmatpush1.bf16.msra.mxu0 %v9746_v27 }
 0x177   : > { %v795_v25 = vld [vmem:[%s13013_s20 + $0x4c0] sm:$0xff]  ;;  %v9755_v29 = vcombine.high %v667_v23, %v671_v24  ;;  %3788 = vmatprep.subr.bf16.mxu1 %v9875_v22  ;;  %v9754_v35 = vcombine.low %v667_v23, %v671_v24 }
 0x178   : > { %v799_v26 = vld [vmem:[%s13013_s20 + $0x4e0] sm:$0xff]  ;;  %3789 = vmatpush1.bf16.msra.mxu1 %v9874_v28 }
 0x179   : > { %v9883_v30 = vcombine.high %v795_v25, %v799_v26  ;;  %v675_v31 = vld [vmem:[%s13013_s20 + $0x100] sm:$0xff]  ;;  %3749 = vmatprep.subr.bf16.mxu0 %v9755_v29  ;;  %v9882_v36 = vcombine.low %v795_v25, %v799_v26 }
 0x17a   : > { %v679_v32 = vld [vmem:[%s13013_s20 + $0x120] sm:$0xff]  ;;  %3750 = vmatpush1.bf16.msra.mxu0 %v9754_v35 }
 0x17b   : > { %v803_v33 = vld [vmem:[%s13013_s20 + $0x500] sm:$0xff]  ;;  %v9763_v37 = vcombine.high %v675_v31, %v679_v32  ;;  %3790 = vmatprep.subr.bf16.mxu1 %v9883_v30  ;;  %v9762_v43 = vcombine.low %v675_v31, %v679_v32 }
 0x17c   : > { %v807_v34 = vld [vmem:[%s13013_s20 + $0x520] sm:$0xff]  ;;  %3791 = vmatpush1.bf16.msra.mxu1 %v9882_v36 }
 0x17d   : > { %v9891_v38 = vcombine.high %v803_v33, %v807_v34  ;;  %v683_v39 = vld [vmem:[%s13013_s20 + $0x140] sm:$0xff]  ;;  %3751 = vmatprep.subr.bf16.mxu0 %v9763_v37  ;;  %v9890_v44 = vcombine.low %v803_v33, %v807_v34 }
 0x17e   : > { %v687_v40 = vld [vmem:[%s13013_s20 + $0x160] sm:$0xff]  ;;  %3752 = vmatpush1.bf16.msra.mxu0 %v9762_v43 }
 0x17f   : > { %v811_v41 = vld [vmem:[%s13013_s20 + $0x540] sm:$0xff]  ;;  %v9771_v45 = vcombine.high %v683_v39, %v687_v40  ;;  %3792 = vmatprep.subr.bf16.mxu1 %v9891_v38  ;;  %v9770_v51 = vcombine.low %v683_v39, %v687_v40 }
 0x180   : > { %v815_v42 = vld [vmem:[%s13013_s20 + $0x560] sm:$0xff]  ;;  %3793 = vmatpush1.bf16.msra.mxu1 %v9890_v44 }
 0x181   : > { %v9899_v46 = vcombine.high %v811_v41, %v815_v42  ;;  %v691_v47 = vld [vmem:[%s13013_s20 + $0x180] sm:$0xff]  ;;  %3753 = vmatprep.subr.bf16.mxu0 %v9771_v45  ;;  %v9898_v52 = vcombine.low %v811_v41, %v815_v42 }
 0x182   : > { %v695_v48 = vld [vmem:[%s13013_s20 + $0x1a0] sm:$0xff]  ;;  %3754 = vmatpush1.bf16.msra.mxu0 %v9770_v51 }
 0x183   : > { %v819_v49 = vld [vmem:[%s13013_s20 + $0x580] sm:$0xff]  ;;  %v9779_v53 = vcombine.high %v691_v47, %v695_v48  ;;  %3794 = vmatprep.subr.bf16.mxu1 %v9899_v46  ;;  %v9778_v63 = vcombine.low %v691_v47, %v695_v48 }
 0x184   : > { %v823_v50 = vld [vmem:[%s13013_s20 + $0x5a0] sm:$0xff]  ;;  %3795 = vmatpush1.bf16.msra.mxu1 %v9898_v52 }
 0x185   : > { %v13080_v54 = vld [vmem:[%s13047_s23] sm:$0xff]  ;;  %v9907_v56 = vcombine.high %v819_v49, %v823_v50  ;;  %3755 = vmatprep.subr.bf16.mxu0 %v9779_v53  ;;  %v9906_v0 = vcombine.low %v819_v49, %v823_v50 }
 0x186   : > { %v699_v57 = vld [vmem:[%s13013_s20 + $0x1c0] sm:$0xff]  ;;  %v13089_v59 = vcombine.high %v13080_v54, %v13080_v54  ;;  %3756 = vmatpush1.bf16.msra.mxu0 %v9778_v63 }
 0x187   : > { %v703_v58 = vld [vmem:[%s13013_s20 + $0x1e0] sm:$0xff]  ;;  %3796 = vmatprep.subr.bf16.mxu1 %v9907_v56 }
 0x188   : > { %v827_v61 = vld [vmem:[%s13013_s20 + $0x5c0] sm:$0xff]  ;;  %3775 = vmatprep.mubr.bf16.mxu0 %v13089_v59  ;;  %v9787_v1 = vcombine.high %v699_v57, %v703_v58  ;;  %v9786_v7 = vcombine.low %v699_v57, %v703_v58  ;;  %3797 = vmatpush1.bf16.msra.mxu1 %v9906_v0 }
 0x189   : > { %v831_v62 = vld [vmem:[%s13013_s20 + $0x5e0] sm:$0xff] }
 0x18a   : > { %v9915_v2 = vcombine.high %v827_v61, %v831_v62  ;;  %v707_v3 = vld [vmem:[%s13013_s20 + $0x200] sm:$0xff]  ;;  %3757 = vmatprep.subr.bf16.mxu0 %v9787_v1  ;;  %v9914_v8 = vcombine.low %v827_v61, %v831_v62 }
 0x18b   : > { %v711_v4 = vld [vmem:[%s13013_s20 + $0x220] sm:$0xff]  ;;  %3758 = vmatpush1.bf16.msra.mxu0 %v9786_v7 }
 0x18c   : > { %v835_v5 = vld [vmem:[%s13013_s20 + $0x600] sm:$0xff]  ;;  %v9795_v9 = vcombine.high %v707_v3, %v711_v4  ;;  %3798 = vmatprep.subr.bf16.mxu1 %v9915_v2  ;;  %v9794_v15 = vcombine.low %v707_v3, %v711_v4 }
 0x18d   : > { %v839_v6 = vld [vmem:[%s13013_s20 + $0x620] sm:$0xff]  ;;  %3799 = vmatpush1.bf16.msra.mxu1 %v9914_v8 }
 0x18e   : > { %v9923_v10 = vcombine.high %v835_v5, %v839_v6  ;;  %v715_v11 = vld [vmem:[%s13013_s20 + $0x240] sm:$0xff]  ;;  %3759 = vmatprep.subr.bf16.mxu0 %v9795_v9  ;;  %v9922_v16 = vcombine.low %v835_v5, %v839_v6 }
 0x18f   : > { %v719_v12 = vld [vmem:[%s13013_s20 + $0x260] sm:$0xff]  ;;  %3760 = vmatpush1.bf16.msra.mxu0 %v9794_v15 }
 0x190   : > { %v843_v13 = vld [vmem:[%s13013_s20 + $0x640] sm:$0xff]  ;;  %v9803_v17 = vcombine.high %v715_v11, %v719_v12  ;;  %3800 = vmatprep.subr.bf16.mxu1 %v9923_v10  ;;  %v9802_v23 = vcombine.low %v715_v11, %v719_v12 }
 0x191   : > { %v847_v14 = vld [vmem:[%s13013_s20 + $0x660] sm:$0xff]  ;;  %3801 = vmatpush1.bf16.msra.mxu1 %v9922_v16 }
 0x192   : > { %v9931_v18 = vcombine.high %v843_v13, %v847_v14  ;;  %v723_v19 = vld [vmem:[%s13013_s20 + $0x280] sm:$0xff]  ;;  %3761 = vmatprep.subr.bf16.mxu0 %v9803_v17  ;;  %v9930_v24 = vcombine.low %v843_v13, %v847_v14  ;;  %v13139_v17 = vcombine.low %v13080_v54, %v13080_v54 }
 0x193   : > { %v727_v20 = vld [vmem:[%s13013_s20 + $0x2a0] sm:$0xff]  ;;  %3762 = vmatpush1.bf16.msra.mxu0 %v9802_v23  ;;  %v13151_v23 = vld [vmem:[%s13047_s23 + $0x18] sm:$0xff] }
 0x194   : > { %v851_v21 = vld [vmem:[%s13013_s20 + $0x680] sm:$0xff]  ;;  %v9811_v25 = vcombine.high %v723_v19, %v727_v20  ;;  %3802 = vmatprep.subr.bf16.mxu1 %v9931_v18  ;;  %v9810_v31 = vcombine.low %v723_v19, %v727_v20  ;;  %v13144_v20 = vld [vmem:[%s13047_s23 + $0x10] sm:$0xff] }
 0x195   : > { %v855_v22 = vld [vmem:[%s13013_s20 + $0x6a0] sm:$0xff]  ;;  %3803 = vmatpush1.bf16.msra.mxu1 %v9930_v24 }
 0x196   : > { %v9939_v26 = vcombine.high %v851_v21, %v855_v22  ;;  %v731_v27 = vld [vmem:[%s13013_s20 + $0x2c0] sm:$0xff]  ;;  %3763 = vmatprep.subr.bf16.mxu0 %v9811_v25  ;;  %v9938_v32 = vcombine.low %v851_v21, %v855_v22  ;;  %v13148_v21 = vcombine.low %v13083_v55, %v13083_v55 }
 0x197   : > { %v735_v28 = vld [vmem:[%s13013_s20 + $0x2e0] sm:$0xff]  ;;  %3764 = vmatpush1.bf16.msra.mxu0 %v9810_v31 }
 0x198   : > { %v859_v29 = vld [vmem:[%s13013_s20 + $0x6c0] sm:$0xff]  ;;  %v9819_v33 = vcombine.high %v731_v27, %v735_v28  ;;  %3804 = vmatprep.subr.bf16.mxu1 %v9939_v26  ;;  %v9818_v39 = vcombine.low %v731_v27, %v735_v28  ;;  %v13157_v28 = vcombine.high %v13144_v20, %v13144_v20 }
 0x199   : > { %v863_v30 = vld [vmem:[%s13013_s20 + $0x6e0] sm:$0xff]  ;;  %3805 = vmatpush1.bf16.msra.mxu1 %v9938_v32 }
 0x19a   : > { %v9947_v34 = vcombine.high %v859_v29, %v863_v30  ;;  %v739_v35 = vld [vmem:[%s13013_s20 + $0x300] sm:$0xff]  ;;  %3765 = vmatprep.subr.bf16.mxu0 %v9819_v33  ;;  %v9946_v40 = vcombine.low %v859_v29, %v863_v30  ;;  %v13164_v30 = vcombine.high %v13151_v23, %v13151_v23 }
 0x19b   : > { %v743_v36 = vld [vmem:[%s13013_s20 + $0x320] sm:$0xff]  ;;  %3766 = vmatpush1.bf16.msra.mxu0 %v9818_v39 }
 0x19c   : > { %v867_v37 = vld [vmem:[%s13013_s20 + $0x700] sm:$0xff]  ;;  %v9827_v41 = vcombine.high %v739_v35, %v743_v36  ;;  %3806 = vmatprep.subr.bf16.mxu1 %v9947_v34  ;;  %v9826_v47 = vcombine.low %v739_v35, %v743_v36 }
 0x19d   : > { %v871_v38 = vld [vmem:[%s13013_s20 + $0x720] sm:$0xff]  ;;  %3807 = vmatpush1.bf16.msra.mxu1 %v9946_v40 }
 0x19e   : > { %v9955_v42 = vcombine.high %v867_v37, %v871_v38  ;;  %v747_v43 = vld [vmem:[%s13013_s20 + $0x340] sm:$0xff]  ;;  %3767 = vmatprep.subr.bf16.mxu0 %v9827_v41  ;;  %v9954_v48 = vcombine.low %v867_v37, %v871_v38 }
 0x19f   : > { %v751_v44 = vld [vmem:[%s13013_s20 + $0x360] sm:$0xff]  ;;  %3768 = vmatpush1.bf16.msra.mxu0 %v9826_v47 }
 0x1a0   : > { %v875_v45 = vld [vmem:[%s13013_s20 + $0x740] sm:$0xff]  ;;  %v9835_v49 = vcombine.high %v747_v43, %v751_v44  ;;  %3808 = vmatprep.subr.bf16.mxu1 %v9955_v42  ;;  %v9834_v57 = vcombine.low %v747_v43, %v751_v44 }
 0x1a1   : > { %v879_v46 = vld [vmem:[%s13013_s20 + $0x760] sm:$0xff]  ;;  %3809 = vmatpush1.bf16.msra.mxu1 %v9954_v48 }
 0x1a2   : > { %v9963_v50 = vcombine.high %v875_v45, %v879_v46  ;;  %v755_v51 = vld [vmem:[%s13013_s20 + $0x380] sm:$0xff]  ;;  %3769 = vmatprep.subr.bf16.mxu0 %v9835_v49  ;;  %v9962_v58 = vcombine.low %v875_v45, %v879_v46 }
 0x1a3   : > { %v759_v52 = vld [vmem:[%s13013_s20 + $0x3a0] sm:$0xff]  ;;  %3770 = vmatpush1.bf16.msra.mxu0 %v9834_v57 }
 0x1a4   : > { %v883_v53 = vld [vmem:[%s13013_s20 + $0x780] sm:$0xff]  ;;  %v9843_v61 = vcombine.high %v755_v51, %v759_v52  ;;  %3810 = vmatprep.subr.bf16.mxu1 %v9963_v50  ;;  %v9842_v3 = vcombine.low %v755_v51, %v759_v52 }
 0x1a5   : > { %v887_v56 = vld [vmem:[%s13013_s20 + $0x7a0] sm:$0xff]  ;;  %3811 = vmatpush1.bf16.msra.mxu1 %v9962_v58 }
 0x1a6   : > { %v9971_v62 = vcombine.high %v883_v53, %v887_v56  ;;  %v763_v63 = vld [vmem:[%s13013_s20 + $0x3c0] sm:$0xff]  ;;  %3771 = vmatprep.subr.bf16.mxu0 %v9843_v61  ;;  %v9970_v4 = vcombine.low %v883_v53, %v887_v56 }
 0x1a7   : > { %v767_v0 = vld [vmem:[%s13013_s20 + $0x3e0] sm:$0xff]  ;;  %3772 = vmatpush1.bf16.msra.mxu0 %v9842_v3 }
 0x1a8   : > { %v891_v1 = vld [vmem:[%s13013_s20 + $0x7c0] sm:$0xff]  ;;  %v9851_v5 = vcombine.high %v763_v63, %v767_v0  ;;  %3812 = vmatprep.subr.bf16.mxu1 %v9971_v62  ;;  %v9850_v11 = vcombine.low %v763_v63, %v767_v0 }
 0x1a9   : > { %v895_v2 = vld [vmem:[%s13013_s20 + $0x7e0] sm:$0xff]  ;;  %3813 = vmatpush1.bf16.msra.mxu1 %v9970_v4 }
 0x1aa   : > { %v9979_v6 = vcombine.high %v891_v1, %v895_v2  ;;  %v899_v7 = vld [vmem:[%s13013_s20 + $0x800] sm:$0xff]  ;;  %3773 = vmatprep.subr.bf16.mxu0 %v9851_v5  ;;  %v9978_v12 = vcombine.low %v891_v1, %v895_v2 }
 0x1ab   : > { %v903_v8 = vld [vmem:[%s13013_s20 + $0x820] sm:$0xff]  ;;  %3774 = vmatpush1.bf16.msra.mxu0 %v9850_v11 }
 0x1ac   : > { %v1027_v9 = vld [vmem:[%s13013_s20 + $0xc00] sm:$0xff]  ;;  %v9987_v13 = vcombine.high %v899_v7, %v903_v8  ;;  %3814 = vmatprep.subr.bf16.mxu1 %v9979_v6  ;;  %v9986_v22 = vcombine.low %v899_v7, %v903_v8 }
 0x1ad   : > { %v1031_v10 = vld [vmem:[%s13013_s20 + $0xc20] sm:$0xff]  ;;  %3815 = vmatpush1.bf16.msra.mxu1 %v9978_v12 }
 0x1ae   : > { %v10115_v14 = vcombine.high %v1027_v9, %v1031_v10  ;;  %v907_v15 = vld [vmem:[%s13013_s20 + $0x840] sm:$0xff]  ;;  %3825 = vmatprep.subr.bf16.mxu0 %v9987_v13  ;;  %v10114_v24 = vcombine.low %v1027_v9, %v1031_v10  ;;  %3776 = vmatmul.mubr.bf16.vlgmr.msra.gmra.mrb[0].mxu0 %v13139_v17 }
 0x1af   : > { %v911_v16 = vld [vmem:[%s13013_s20 + $0x860] sm:$0xff]  ;;  %3826 = vmatpush1.bf16.msra.mxu0 %v9986_v22  ;;  %3857 = vmatprep.mubr.bf16.mxu0 %v13157_v28 }
 0x1b0   : > { %v1035_v18 = vld [vmem:[%s13013_s20 + $0xc40] sm:$0xff]  ;;  %v9995_v25 = vcombine.high %v907_v15, %v911_v16  ;;  %3866 = vmatprep.subr.bf16.mxu1 %v10115_v14  ;;  %3817 = vmatmul.mubr.bf16.vlgmr.msra.gmra.mrb[0].mxu1 %v13148_v21  ;;  %v9994_v31 = vcombine.low %v907_v15, %v911_v16 }
 0x1b1   : > { %v1039_v19 = vld [vmem:[%s13013_s20 + $0xc60] sm:$0xff]  ;;  %3867 = vmatpush1.bf16.msra.mxu1 %v10114_v24  ;;  %3898 = vmatprep.mubr.bf16.mxu1 %v13164_v30 }
 0x1b2   : > { %v10123_v54 = vcombine.high %v1035_v18, %v1039_v19  ;;  %v915_v26 = vld [vmem:[%s13013_s20 + $0x880] sm:$0xff]  ;;  %3827 = vmatprep.subr.bf16.mxu0 %v9995_v25  ;;  %v10122_v32 = vcombine.low %v1035_v18, %v1039_v19 }
 0x1b3   : > { %v919_v27 = vld [vmem:[%s13013_s20 + $0x8a0] sm:$0xff]  ;;  %3828 = vmatpush1.bf16.msra.mxu0 %v9994_v31 }
 0x1b4   : > { %v1043_v55 = vld [vmem:[%s13013_s20 + $0xc80] sm:$0xff]  ;;  %v10003_v33 = vcombine.high %v915_v26, %v919_v27  ;;  %3868 = vmatprep.subr.bf16.mxu1 %v10123_v54  ;;  %v10002_v39 = vcombine.low %v915_v26, %v919_v27 }
 0x1b5   : > { %v1047_v29 = vld [vmem:[%s13013_s20 + $0xca0] sm:$0xff]  ;;  %3869 = vmatpush1.bf16.msra.mxu1 %v10122_v32 }
 0x1b6   : > { %v10131_v34 = vcombine.high %v1043_v55, %v1047_v29  ;;  %v923_v35 = vld [vmem:[%s13013_s20 + $0x8c0] sm:$0xff]  ;;  %3829 = vmatprep.subr.bf16.mxu0 %v10003_v33  ;;  %v10130_v40 = vcombine.low %v1043_v55, %v1047_v29 }
 0x1b7   : > { %v927_v36 = vld [vmem:[%s13013_s20 + $0x8e0] sm:$0xff]  ;;  %3830 = vmatpush1.bf16.msra.mxu0 %v10002_v39 }
 0x1b8   : > { %v1051_v37 = vld [vmem:[%s13013_s20 + $0xcc0] sm:$0xff]  ;;  %v10011_v41 = vcombine.high %v923_v35, %v927_v36  ;;  %3870 = vmatprep.subr.bf16.mxu1 %v10131_v34  ;;  %v10010_v47 = vcombine.low %v923_v35, %v927_v36 }
 0x1b9   : > { %v1055_v38 = vld [vmem:[%s13013_s20 + $0xce0] sm:$0xff]  ;;  %3871 = vmatpush1.bf16.msra.mxu1 %v10130_v40 }
 0x1ba   : > { %v10139_v42 = vcombine.high %v1051_v37, %v1055_v38  ;;  %v931_v43 = vld [vmem:[%s13013_s20 + $0x900] sm:$0xff]  ;;  %3831 = vmatprep.subr.bf16.mxu0 %v10011_v41  ;;  %v10138_v48 = vcombine.low %v1051_v37, %v1055_v38 }
 0x1bb   : > { %v935_v44 = vld [vmem:[%s13013_s20 + $0x920] sm:$0xff]  ;;  %3832 = vmatpush1.bf16.msra.mxu0 %v10010_v47 }
 0x1bc   : > { %v1059_v45 = vld [vmem:[%s13013_s20 + $0xd00] sm:$0xff]  ;;  %v10019_v49 = vcombine.high %v931_v43, %v935_v44  ;;  %3872 = vmatprep.subr.bf16.mxu1 %v10139_v42  ;;  %v10018_v57 = vcombine.low %v931_v43, %v935_v44 }
 0x1bd   : > { %v1063_v46 = vld [vmem:[%s13013_s20 + $0xd20] sm:$0xff]  ;;  %3873 = vmatpush1.bf16.msra.mxu1 %v10138_v48 }
 0x1be   : > { %v10147_v50 = vcombine.high %v1059_v45, %v1063_v46  ;;  %v939_v51 = vld [vmem:[%s13013_s20 + $0x940] sm:$0xff]  ;;  %3833 = vmatprep.subr.bf16.mxu0 %v10019_v49  ;;  %v10146_v58 = vcombine.low %v1059_v45, %v1063_v46 }
 0x1bf   : > { %v943_v52 = vld [vmem:[%s13013_s20 + $0x960] sm:$0xff]  ;;  %3834 = vmatpush1.bf16.msra.mxu0 %v10018_v57 }
 0x1c0   : > { %v1067_v53 = vld [vmem:[%s13013_s20 + $0xd40] sm:$0xff]  ;;  %v10027_v61 = vcombine.high %v939_v51, %v943_v52  ;;  %3874 = vmatprep.subr.bf16.mxu1 %v10147_v50  ;;  %v10026_v3 = vcombine.low %v939_v51, %v943_v52 }
 0x1c1   : > { %v1071_v56 = vld [vmem:[%s13013_s20 + $0xd60] sm:$0xff]  ;;  %3875 = vmatpush1.bf16.msra.mxu1 %v10146_v58 }
 0x1c2   : > { %v10155_v62 = vcombine.high %v1067_v53, %v1071_v56  ;;  %v947_v63 = vld [vmem:[%s13013_s20 + $0x980] sm:$0xff]  ;;  %3835 = vmatprep.subr.bf16.mxu0 %v10027_v61  ;;  %v10154_v4 = vcombine.low %v1067_v53, %v1071_v56 }
 0x1c3   : > { %v951_v0 = vld [vmem:[%s13013_s20 + $0x9a0] sm:$0xff]  ;;  %3836 = vmatpush1.bf16.msra.mxu0 %v10026_v3 }
 0x1c4   : > { %v1075_v1 = vld [vmem:[%s13013_s20 + $0xd80] sm:$0xff]  ;;  %v10035_v5 = vcombine.high %v947_v63, %v951_v0  ;;  %3876 = vmatprep.subr.bf16.mxu1 %v10155_v62  ;;  %v10034_v11 = vcombine.low %v947_v63, %v951_v0 }
 0x1c5   : > { %v1079_v2 = vld [vmem:[%s13013_s20 + $0xda0] sm:$0xff]  ;;  %3877 = vmatpush1.bf16.msra.mxu1 %v10154_v4 }
 0x1c6   : > { %v10163_v6 = vcombine.high %v1075_v1, %v1079_v2  ;;  %v955_v7 = vld [vmem:[%s13013_s20 + $0x9c0] sm:$0xff]  ;;  %3837 = vmatprep.subr.bf16.mxu0 %v10035_v5  ;;  %v10162_v12 = vcombine.low %v1075_v1, %v1079_v2 }
 0x1c7   : > { %v959_v8 = vld [vmem:[%s13013_s20 + $0x9e0] sm:$0xff]  ;;  %3838 = vmatpush1.bf16.msra.mxu0 %v10034_v11 }
 0x1c8   : > { %v1083_v9 = vld [vmem:[%s13013_s20 + $0xdc0] sm:$0xff]  ;;  %v10043_v13 = vcombine.high %v955_v7, %v959_v8  ;;  %3878 = vmatprep.subr.bf16.mxu1 %v10163_v6  ;;  %v10042_v22 = vcombine.low %v955_v7, %v959_v8 }
 0x1c9   : > { %v1087_v10 = vld [vmem:[%s13013_s20 + $0xde0] sm:$0xff]  ;;  %3879 = vmatpush1.bf16.msra.mxu1 %v10162_v12 }
 0x1ca   : > { %v10171_v14 = vcombine.high %v1083_v9, %v1087_v10  ;;  %v963_v15 = vld [vmem:[%s13013_s20 + $0xa00] sm:$0xff]  ;;  %3839 = vmatprep.subr.bf16.mxu0 %v10043_v13  ;;  %v10170_v24 = vcombine.low %v1083_v9, %v1087_v10 }
 0x1cb   : > { %v967_v16 = vld [vmem:[%s13013_s20 + $0xa20] sm:$0xff]  ;;  %3840 = vmatpush1.bf16.msra.mxu0 %v10042_v22 }
 0x1cc   : > { %v1091_v18 = vld [vmem:[%s13013_s20 + $0xe00] sm:$0xff]  ;;  %v10051_v25 = vcombine.high %v963_v15, %v967_v16  ;;  %3880 = vmatprep.subr.bf16.mxu1 %v10171_v14  ;;  %v10050_v31 = vcombine.low %v963_v15, %v967_v16 }
 0x1cd   : > { %v1095_v19 = vld [vmem:[%s13013_s20 + $0xe20] sm:$0xff]  ;;  %3881 = vmatpush1.bf16.msra.mxu1 %v10170_v24 }
 0x1ce   : > { %v10179_v54 = vcombine.high %v1091_v18, %v1095_v19  ;;  %v971_v26 = vld [vmem:[%s13013_s20 + $0xa40] sm:$0xff]  ;;  %3841 = vmatprep.subr.bf16.mxu0 %v10051_v25  ;;  %v10178_v32 = vcombine.low %v1091_v18, %v1095_v19 }
 0x1cf   : > { %v975_v27 = vld [vmem:[%s13013_s20 + $0xa60] sm:$0xff]  ;;  %3842 = vmatpush1.bf16.msra.mxu0 %v10050_v31 }
 0x1d0   : > { %v1099_v55 = vld [vmem:[%s13013_s20 + $0xe40] sm:$0xff]  ;;  %v10059_v33 = vcombine.high %v971_v26, %v975_v27  ;;  %3882 = vmatprep.subr.bf16.mxu1 %v10179_v54  ;;  %v10058_v39 = vcombine.low %v971_v26, %v975_v27  ;;  %v644_v26 = vld [vmem:[%s13013_s20 + $0x8] sm:$0xff] }
 0x1d1   : > { %v1103_v29 = vld [vmem:[%s13013_s20 + $0xe60] sm:$0xff]  ;;  %3883 = vmatpush1.bf16.msra.mxu1 %v10178_v32  ;;  %v648_v27 = vld [vmem:[%s13013_s20 + $0x28] sm:$0xff] }
 0x1d2   : > { %v10187_v34 = vcombine.high %v1099_v55, %v1103_v29  ;;  %v979_v35 = vld [vmem:[%s13013_s20 + $0xa80] sm:$0xff]  ;;  %3843 = vmatprep.subr.bf16.mxu0 %v10059_v33  ;;  %v10186_v40 = vcombine.low %v1099_v55, %v1103_v29  ;;  %v772_v55 = vld [vmem:[%s13013_s20 + $0x408] sm:$0xff]  ;;  %v9733_v33 = vcombine.high %v644_v26, %v648_v27 }
 0x1d3   : > { %v983_v36 = vld [vmem:[%s13013_s20 + $0xaa0] sm:$0xff]  ;;  %3844 = vmatpush1.bf16.msra.mxu0 %v10058_v39  ;;  %v776_v29 = vld [vmem:[%s13013_s20 + $0x428] sm:$0xff] }
 0x1d4   : > { %v1107_v37 = vld [vmem:[%s13013_s20 + $0xe80] sm:$0xff]  ;;  %v10067_v41 = vcombine.high %v979_v35, %v983_v36  ;;  %3884 = vmatprep.subr.bf16.mxu1 %v10187_v34  ;;  %v10066_v47 = vcombine.low %v979_v35, %v983_v36  ;;  %v9861_v34 = vcombine.high %v772_v55, %v776_v29  ;;  %v652_v35 = vld [vmem:[%s13013_s20 + $0x48] sm:$0xff] }
 0x1d5   : > { %v1111_v38 = vld [vmem:[%s13013_s20 + $0xea0] sm:$0xff]  ;;  %3885 = vmatpush1.bf16.msra.mxu1 %v10186_v40  ;;  %v656_v36 = vld [vmem:[%s13013_s20 + $0x68] sm:$0xff]  ;;  %v13235_v40 = vcombine.low %v13151_v23, %v13151_v23 }
 0x1d6   : > { %v10195_v42 = vcombine.high %v1107_v37, %v1111_v38  ;;  %v987_v43 = vld [vmem:[%s13013_s20 + $0xac0] sm:$0xff]  ;;  %3845 = vmatprep.subr.bf16.mxu0 %v10067_v41  ;;  %v10194_v48 = vcombine.low %v1107_v37, %v1111_v38  ;;  %v13229_v37 = vcombine.low %v13144_v20, %v13144_v20  ;;  %v780_v38 = vld [vmem:[%s13013_s20 + $0x448] sm:$0xff]  ;;  %v9732_v41 = vcombine.low %v644_v26, %v648_v27 }
 0x1d7   : > { %v991_v44 = vld [vmem:[%s13013_s20 + $0xae0] sm:$0xff]  ;;  %3846 = vmatpush1.bf16.msra.mxu0 %v10066_v47  ;;  %v784_v39 = vld [vmem:[%s13013_s20 + $0x468] sm:$0xff]  ;;  %v9740_v23 = vcombine.low %v652_v35, %v656_v36 }
 0x1d8   : > { %v1115_v45 = vld [vmem:[%s13013_s20 + $0xec0] sm:$0xff]  ;;  %v10075_v49 = vcombine.high %v987_v43, %v991_v44  ;;  %3886 = vmatprep.subr.bf16.mxu1 %v10195_v42  ;;  %v10074_v57 = vcombine.low %v987_v43, %v991_v44  ;;  %v9860_v42 = vcombine.low %v772_v55, %v776_v29  ;;  %v9741_v43 = vcombine.high %v652_v35, %v656_v36  ;;  %v664_v20 = vld [vmem:[%s13013_s20 + $0xa8] sm:$0xff] }
 0x1d9   : > { %v1119_v46 = vld [vmem:[%s13013_s20 + $0xee0] sm:$0xff]  ;;  %3887 = vmatpush1.bf16.msra.mxu1 %v10194_v48  ;;  %v9869_v44 = vcombine.high %v780_v38, %v784_v39  ;;  %v792_v47 = vld [vmem:[%s13013_s20 + $0x4a8] sm:$0xff]  ;;  %v9868_v48 = vcombine.low %v780_v38, %v784_v39 }
 0x1da   : > { %v10203_v50 = vcombine.high %v1115_v45, %v1119_v46  ;;  %v995_v51 = vld [vmem:[%s13013_s20 + $0xb00] sm:$0xff]  ;;  %3847 = vmatprep.subr.bf16.mxu0 %v10075_v49  ;;  %v10202_v58 = vcombine.low %v1115_v45, %v1119_v46  ;;  %v660_v45 = vld [vmem:[%s13013_s20 + $0x88] sm:$0xff] }
 0x1db   : > { %v999_v52 = vld [vmem:[%s13013_s20 + $0xb20] sm:$0xff]  ;;  %3848 = vmatpush1.bf16.msra.mxu0 %v10074_v57  ;;  %v788_v46 = vld [vmem:[%s13013_s20 + $0x488] sm:$0xff]  ;;  %v9749_v49 = vcombine.high %v660_v45, %v664_v20  ;;  %v9748_v57 = vcombine.low %v660_v45, %v664_v20 }
 0x1dc   : > { %v1123_v53 = vld [vmem:[%s13013_s20 + $0xf00] sm:$0xff]  ;;  %v10083_v61 = vcombine.high %v995_v51, %v999_v52  ;;  %3888 = vmatprep.subr.bf16.mxu1 %v10203_v50  ;;  %v10082_v3 = vcombine.low %v995_v51, %v999_v52  ;;  %v9877_v50 = vcombine.high %v788_v46, %v792_v47  ;;  %v668_v51 = vld [vmem:[%s13013_s20 + $0xc8] sm:$0xff] }
 0x1dd   : > { %v1127_v56 = vld [vmem:[%s13013_s20 + $0xf20] sm:$0xff]  ;;  %3889 = vmatpush1.bf16.msra.mxu1 %v10202_v58  ;;  %v672_v52 = vld [vmem:[%s13013_s20 + $0xe8] sm:$0xff]  ;;  %v9876_v58 = vcombine.low %v788_v46, %v792_v47 }
 0x1de   : > { %v10211_v62 = vcombine.high %v1123_v53, %v1127_v56  ;;  %v1003_v63 = vld [vmem:[%s13013_s20 + $0xb40] sm:$0xff]  ;;  %3849 = vmatprep.subr.bf16.mxu0 %v10083_v61  ;;  %v10210_v4 = vcombine.low %v1123_v53, %v1127_v56  ;;  %v796_v53 = vld [vmem:[%s13013_s20 + $0x4c8] sm:$0xff]  ;;  %v9757_v61 = vcombine.high %v668_v51, %v672_v52 }
 0x1df   : > { %v1007_v0 = vld [vmem:[%s13013_s20 + $0xb60] sm:$0xff]  ;;  %3850 = vmatpush1.bf16.msra.mxu0 %v10082_v3  ;;  %v800_v56 = vld [vmem:[%s13013_s20 + $0x4e8] sm:$0xff]  ;;  %v9756_v3 = vcombine.low %v668_v51, %v672_v52 }
 0x1e0   : > { %v1131_v1 = vld [vmem:[%s13013_s20 + $0xf40] sm:$0xff]  ;;  %v10091_v5 = vcombine.high %v1003_v63, %v1007_v0  ;;  %3890 = vmatprep.subr.bf16.mxu1 %v10211_v62  ;;  %v10090_v11 = vcombine.low %v1003_v63, %v1007_v0  ;;  %v9885_v62 = vcombine.high %v796_v53, %v800_v56  ;;  %v676_v63 = vld [vmem:[%s13013_s20 + $0x108] sm:$0xff] }
 0x1e1   : > { %v1135_v2 = vld [vmem:[%s13013_s20 + $0xf60] sm:$0xff]  ;;  %3891 = vmatpush1.bf16.msra.mxu1 %v10210_v4  ;;  %v680_v0 = vld [vmem:[%s13013_s20 + $0x128] sm:$0xff]  ;;  %v9884_v4 = vcombine.low %v796_v53, %v800_v56 }
 0x1e2   : > { %v10219_v6 = vcombine.high %v1131_v1, %v1135_v2  ;;  %v1011_v7 = vld [vmem:[%s13013_s20 + $0xb80] sm:$0xff]  ;;  %3851 = vmatprep.subr.bf16.mxu0 %v10091_v5  ;;  %v10218_v12 = vcombine.low %v1131_v1, %v1135_v2  ;;  %v804_v1 = vld [vmem:[%s13013_s20 + $0x508] sm:$0xff]  ;;  %v9765_v5 = vcombine.high %v676_v63, %v680_v0 }
 0x1e3   : > { %v1015_v8 = vld [vmem:[%s13013_s20 + $0xba0] sm:$0xff]  ;;  %3852 = vmatpush1.bf16.msra.mxu0 %v10090_v11  ;;  %v808_v2 = vld [vmem:[%s13013_s20 + $0x528] sm:$0xff]  ;;  %v9764_v11 = vcombine.low %v676_v63, %v680_v0 }
 0x1e4   : > { %v1139_v9 = vld [vmem:[%s13013_s20 + $0xf80] sm:$0xff]  ;;  %v10099_v13 = vcombine.high %v1011_v7, %v1015_v8  ;;  %3892 = vmatprep.subr.bf16.mxu1 %v10219_v6  ;;  %v10098_v22 = vcombine.low %v1011_v7, %v1015_v8  ;;  %v9893_v6 = vcombine.high %v804_v1, %v808_v2  ;;  %v684_v7 = vld [vmem:[%s13013_s20 + $0x148] sm:$0xff] }
 0x1e5   : > { %v1143_v10 = vld [vmem:[%s13013_s20 + $0xfa0] sm:$0xff]  ;;  %3893 = vmatpush1.bf16.msra.mxu1 %v10218_v12  ;;  %v688_v8 = vld [vmem:[%s13013_s20 + $0x168] sm:$0xff]  ;;  %v9892_v12 = vcombine.low %v804_v1, %v808_v2 }
 0x1e6   : > { %v10227_v14 = vcombine.high %v1139_v9, %v1143_v10  ;;  %v1019_v15 = vld [vmem:[%s13013_s20 + $0xbc0] sm:$0xff]  ;;  %3853 = vmatprep.subr.bf16.mxu0 %v10099_v13  ;;  %v10226_v24 = vcombine.low %v1139_v9, %v1143_v10  ;;  %v812_v9 = vld [vmem:[%s13013_s20 + $0x548] sm:$0xff]  ;;  %v9773_v13 = vcombine.high %v684_v7, %v688_v8 }
 0x1e7   : > { %v1023_v16 = vld [vmem:[%s13013_s20 + $0xbe0] sm:$0xff]  ;;  %3854 = vmatpush1.bf16.msra.mxu0 %v10098_v22  ;;  %v816_v10 = vld [vmem:[%s13013_s20 + $0x568] sm:$0xff]  ;;  %v9772_v22 = vcombine.low %v684_v7, %v688_v8 }
 0x1e8   : > { %v1147_v18 = vld [vmem:[%s13013_s20 + $0xfc0] sm:$0xff]  ;;  %v10107_v25 = vcombine.high %v1019_v15, %v1023_v16  ;;  %3894 = vmatprep.subr.bf16.mxu1 %v10227_v14  ;;  %v10106_v31 = vcombine.low %v1019_v15, %v1023_v16  ;;  %v9901_v14 = vcombine.high %v812_v9, %v816_v10  ;;  %v692_v15 = vld [vmem:[%s13013_s20 + $0x188] sm:$0xff] }
 0x1e9   : > { %v1151_v19 = vld [vmem:[%s13013_s20 + $0xfe0] sm:$0xff]  ;;  %3895 = vmatpush1.bf16.msra.mxu1 %v10226_v24  ;;  %v696_v16 = vld [vmem:[%s13013_s20 + $0x1a8] sm:$0xff]  ;;  %v9900_v24 = vcombine.low %v812_v9, %v816_v10 }
 0x1ea   : > { %v10235_v54 = vcombine.high %v1147_v18, %v1151_v19  ;;  %3855 = vmatprep.subr.bf16.mxu0 %v10107_v25  ;;  %v10234_v32 = vcombine.low %v1147_v18, %v1151_v19  ;;  %v820_v18 = vld [vmem:[%s13013_s20 + $0x588] sm:$0xff]  ;;  %v9781_v25 = vcombine.high %v692_v15, %v696_v16 }
 0x1eb   : > { %3856 = vmatpush1.bf16.msra.mxu0 %v10106_v31  ;;  %v824_v19 = vld [vmem:[%s13013_s20 + $0x5a8] sm:$0xff]  ;;  %v9780_v31 = vcombine.low %v692_v15, %v696_v16 }
 0x1ec   : > { %3896 = vmatprep.subr.bf16.mxu1 %v10235_v54  ;;  %3907 = vmatprep.subr.bf16.mxu0 %v9733_v33  ;;  %v9909_v54 = vcombine.high %v820_v18, %v824_v19  ;;  %v700_v26 = vld [vmem:[%s13013_s20 + $0x1c8] sm:$0xff] }
 0x1ed   : > { %3897 = vmatpush1.bf16.msra.mxu1 %v10234_v32  ;;  %v704_v27 = vld [vmem:[%s13013_s20 + $0x1e8] sm:$0xff]  ;;  %v9908_v32 = vcombine.low %v820_v18, %v824_v19 }
 0x1ee   : > { %3948 = vmatprep.subr.bf16.mxu1 %v9861_v34  ;;  %3858 = vmatmul.mubr.bf16.vlgmr.msra.gmra.mrb[4].mxu0 %v13229_v37  ;;  %v828_v55 = vld [vmem:[%s13013_s20 + $0x5c8] sm:$0xff]  ;;  %v9789_v33 = vcombine.high %v700_v26, %v704_v27 }
 0x1ef   : > { %3908 = vmatpush1.bf16.msra.mxu0 %v9732_v41  ;;  %3939 = vmatprep.mubr.bf16.mxu0 %v13089_v59  ;;  %v832_v29 = vld [vmem:[%s13013_s20 + $0x5e8] sm:$0xff]  ;;  %v9788_v41 = vcombine.low %v700_v26, %v704_v27 }
 0x1f0   : > { %3899 = vmatmul.mubr.bf16.vlgmr.msra.gmra.mrb[4].mxu1 %v13235_v40  ;;  %3909 = vmatprep.subr.bf16.mxu0 %v9741_v43  ;;  %v9917_v34 = vcombine.high %v828_v55, %v832_v29  ;;  %v708_v35 = vld [vmem:[%s13013_s20 + $0x208] sm:$0xff] }
 0x1f1   : > { %3949 = vmatpush1.bf16.msra.mxu1 %v9860_v42  ;;  %3980 = vmatprep.mubr.bf16.mxu1 %v13093_v60  ;;  %v712_v36 = vld [vmem:[%s13013_s20 + $0x228] sm:$0xff]  ;;  %v9916_v42 = vcombine.low %v828_v55, %v832_v29 }
 0x1f2   : > { %3950 = vmatprep.subr.bf16.mxu1 %v9869_v44  ;;  %v836_v38 = vld [vmem:[%s13013_s20 + $0x608] sm:$0xff]  ;;  %v9797_v43 = vcombine.high %v708_v35, %v712_v36 }
 0x1f3   : > { %3910 = vmatpush1.bf16.msra.mxu0 %v9740_v23  ;;  %v840_v39 = vld [vmem:[%s13013_s20 + $0x628] sm:$0xff]  ;;  %v9796_v23 = vcombine.low %v708_v35, %v712_v36 }
 0x1f4   : > { %3911 = vmatprep.subr.bf16.mxu0 %v9749_v49  ;;  %v9925_v44 = vcombine.high %v836_v38, %v840_v39  ;;  %v716_v45 = vld [vmem:[%s13013_s20 + $0x248] sm:$0xff] }
 0x1f5   : > { %3951 = vmatpush1.bf16.msra.mxu1 %v9868_v48  ;;  %v720_v20 = vld [vmem:[%s13013_s20 + $0x268] sm:$0xff]  ;;  %v9924_v48 = vcombine.low %v836_v38, %v840_v39 }
 0x1f6   : > { %3952 = vmatprep.subr.bf16.mxu1 %v9877_v50  ;;  %v844_v46 = vld [vmem:[%s13013_s20 + $0x648] sm:$0xff]  ;;  %v9805_v49 = vcombine.high %v716_v45, %v720_v20 }
 0x1f7   : > { %3912 = vmatpush1.bf16.msra.mxu0 %v9748_v57  ;;  %v848_v47 = vld [vmem:[%s13013_s20 + $0x668] sm:$0xff]  ;;  %v9804_v57 = vcombine.low %v716_v45, %v720_v20 }
 0x1f8   : > { %3913 = vmatprep.subr.bf16.mxu0 %v9757_v61  ;;  %v9933_v50 = vcombine.high %v844_v46, %v848_v47  ;;  %v724_v51 = vld [vmem:[%s13013_s20 + $0x288] sm:$0xff] }
 0x1f9   : > { %3953 = vmatpush1.bf16.msra.mxu1 %v9876_v58  ;;  %v728_v52 = vld [vmem:[%s13013_s20 + $0x2a8] sm:$0xff]  ;;  %v9932_v58 = vcombine.low %v844_v46, %v848_v47 }
 0x1fa   : > { %3954 = vmatprep.subr.bf16.mxu1 %v9885_v62  ;;  %v852_v53 = vld [vmem:[%s13013_s20 + $0x688] sm:$0xff]  ;;  %v9813_v61 = vcombine.high %v724_v51, %v728_v52 }
 0x1fb   : > { %3914 = vmatpush1.bf16.msra.mxu0 %v9756_v3  ;;  %v856_v56 = vld [vmem:[%s13013_s20 + $0x6a8] sm:$0xff]  ;;  %v9812_v3 = vcombine.low %v724_v51, %v728_v52 }
 0x1fc   : > { %3915 = vmatprep.subr.bf16.mxu0 %v9765_v5  ;;  %v9941_v62 = vcombine.high %v852_v53, %v856_v56  ;;  %v732_v63 = vld [vmem:[%s13013_s20 + $0x2c8] sm:$0xff] }
 0x1fd   : > { %3955 = vmatpush1.bf16.msra.mxu1 %v9884_v4  ;;  %v736_v0 = vld [vmem:[%s13013_s20 + $0x2e8] sm:$0xff]  ;;  %v9940_v4 = vcombine.low %v852_v53, %v856_v56 }
 0x1fe   : > { %3956 = vmatprep.subr.bf16.mxu1 %v9893_v6  ;;  %v860_v1 = vld [vmem:[%s13013_s20 + $0x6c8] sm:$0xff]  ;;  %v9821_v5 = vcombine.high %v732_v63, %v736_v0 }
 0x1ff   : > { %3916 = vmatpush1.bf16.msra.mxu0 %v9764_v11  ;;  %v864_v2 = vld [vmem:[%s13013_s20 + $0x6e8] sm:$0xff]  ;;  %v9820_v11 = vcombine.low %v732_v63, %v736_v0 }
 0x200   : > { %3917 = vmatprep.subr.bf16.mxu0 %v9773_v13  ;;  %v9949_v6 = vcombine.high %v860_v1, %v864_v2  ;;  %v740_v7 = vld [vmem:[%s13013_s20 + $0x308] sm:$0xff] }
 0x201   : > { %3957 = vmatpush1.bf16.msra.mxu1 %v9892_v12  ;;  %v744_v8 = vld [vmem:[%s13013_s20 + $0x328] sm:$0xff]  ;;  %v9948_v12 = vcombine.low %v860_v1, %v864_v2 }
 0x202   : > { %3958 = vmatprep.subr.bf16.mxu1 %v9901_v14  ;;  %v868_v9 = vld [vmem:[%s13013_s20 + $0x708] sm:$0xff]  ;;  %v9829_v13 = vcombine.high %v740_v7, %v744_v8 }
 0x203   : > { %3918 = vmatpush1.bf16.msra.mxu0 %v9772_v22  ;;  %v872_v10 = vld [vmem:[%s13013_s20 + $0x728] sm:$0xff]  ;;  %v9828_v22 = vcombine.low %v740_v7, %v744_v8 }
 0x204   : > { %3919 = vmatprep.subr.bf16.mxu0 %v9781_v25  ;;  %v9957_v14 = vcombine.high %v868_v9, %v872_v10  ;;  %v748_v15 = vld [vmem:[%s13013_s20 + $0x348] sm:$0xff] }
 0x205   : > { %3959 = vmatpush1.bf16.msra.mxu1 %v9900_v24  ;;  %v752_v16 = vld [vmem:[%s13013_s20 + $0x368] sm:$0xff]  ;;  %v9956_v24 = vcombine.low %v868_v9, %v872_v10 }
 0x206   : > { %3960 = vmatprep.subr.bf16.mxu1 %v9909_v54  ;;  %v876_v18 = vld [vmem:[%s13013_s20 + $0x748] sm:$0xff]  ;;  %v9837_v25 = vcombine.high %v748_v15, %v752_v16 }
 0x207   : > { %3920 = vmatpush1.bf16.msra.mxu0 %v9780_v31  ;;  %v880_v19 = vld [vmem:[%s13013_s20 + $0x768] sm:$0xff]  ;;  %v9836_v31 = vcombine.low %v748_v15, %v752_v16 }
 0x208   : > { %3921 = vmatprep.subr.bf16.mxu0 %v9789_v33  ;;  %v9965_v54 = vcombine.high %v876_v18, %v880_v19  ;;  %v756_v26 = vld [vmem:[%s13013_s20 + $0x388] sm:$0xff] }
 0x209   : > { %3961 = vmatpush1.bf16.msra.mxu1 %v9908_v32  ;;  %v760_v27 = vld [vmem:[%s13013_s20 + $0x3a8] sm:$0xff]  ;;  %v9964_v32 = vcombine.low %v876_v18, %v880_v19 }
 0x20a   : > { %3962 = vmatprep.subr.bf16.mxu1 %v9917_v34  ;;  %v884_v55 = vld [vmem:[%s13013_s20 + $0x788] sm:$0xff]  ;;  %v9845_v33 = vcombine.high %v756_v26, %v760_v27 }
 0x20b   : > { %3922 = vmatpush1.bf16.msra.mxu0 %v9788_v41  ;;  %v888_v29 = vld [vmem:[%s13013_s20 + $0x7a8] sm:$0xff]  ;;  %v9844_v41 = vcombine.low %v756_v26, %v760_v27 }
 0x20c   : > { %3923 = vmatprep.subr.bf16.mxu0 %v9797_v43  ;;  %v9973_v34 = vcombine.high %v884_v55, %v888_v29  ;;  %v764_v35 = vld [vmem:[%s13013_s20 + $0x3c8] sm:$0xff] }
 0x20d   : > { %3963 = vmatpush1.bf16.msra.mxu1 %v9916_v42  ;;  %v768_v36 = vld [vmem:[%s13013_s20 + $0x3e8] sm:$0xff]  ;;  %v9972_v42 = vcombine.low %v884_v55, %v888_v29 }
 0x20e   : > { %3964 = vmatprep.subr.bf16.mxu1 %v9925_v44  ;;  %v892_v38 = vld [vmem:[%s13013_s20 + $0x7c8] sm:$0xff]  ;;  %v9853_v43 = vcombine.high %v764_v35, %v768_v36 }
 0x20f   : > { %3924 = vmatpush1.bf16.msra.mxu0 %v9796_v23  ;;  %v896_v39 = vld [vmem:[%s13013_s20 + $0x7e8] sm:$0xff]  ;;  %v9852_v23 = vcombine.low %v764_v35, %v768_v36 }
 0x210   : > { %3925 = vmatprep.subr.bf16.mxu0 %v9805_v49  ;;  %v9981_v44 = vcombine.high %v892_v38, %v896_v39  ;;  %v900_v45 = vld [vmem:[%s13013_s20 + $0x808] sm:$0xff] }
 0x211   : > { %3965 = vmatpush1.bf16.msra.mxu1 %v9924_v48  ;;  %v904_v20 = vld [vmem:[%s13013_s20 + $0x828] sm:$0xff]  ;;  %v9980_v48 = vcombine.low %v892_v38, %v896_v39 }
 0x212   : > { %3966 = vmatprep.subr.bf16.mxu1 %v9933_v50  ;;  %v1028_v46 = vld [vmem:[%s13013_s20 + $0xc08] sm:$0xff]  ;;  %v9989_v49 = vcombine.high %v900_v45, %v904_v20 }
 0x213   : > { %3926 = vmatpush1.bf16.msra.mxu0 %v9804_v57  ;;  %v1032_v47 = vld [vmem:[%s13013_s20 + $0xc28] sm:$0xff]  ;;  %v9988_v57 = vcombine.low %v900_v45, %v904_v20 }
 0x214   : > { %3927 = vmatprep.subr.bf16.mxu0 %v9813_v61  ;;  %v10117_v50 = vcombine.high %v1028_v46, %v1032_v47  ;;  %v908_v51 = vld [vmem:[%s13013_s20 + $0x848] sm:$0xff] }
 0x215   : > { %3967 = vmatpush1.bf16.msra.mxu1 %v9932_v58  ;;  %v912_v52 = vld [vmem:[%s13013_s20 + $0x868] sm:$0xff]  ;;  %v10116_v58 = vcombine.low %v1028_v46, %v1032_v47 }
 0x216   : > { %3968 = vmatprep.subr.bf16.mxu1 %v9941_v62  ;;  %v1036_v53 = vld [vmem:[%s13013_s20 + $0xc48] sm:$0xff]  ;;  %v9997_v61 = vcombine.high %v908_v51, %v912_v52 }
 0x217   : > { %3928 = vmatpush1.bf16.msra.mxu0 %v9812_v3  ;;  %v1040_v56 = vld [vmem:[%s13013_s20 + $0xc68] sm:$0xff]  ;;  %v9996_v3 = vcombine.low %v908_v51, %v912_v52 }
 0x218   : > { %3929 = vmatprep.subr.bf16.mxu0 %v9821_v5  ;;  %v10125_v62 = vcombine.high %v1036_v53, %v1040_v56  ;;  %v916_v63 = vld [vmem:[%s13013_s20 + $0x888] sm:$0xff] }
 0x219   : > { %3969 = vmatpush1.bf16.msra.mxu1 %v9940_v4  ;;  %v920_v0 = vld [vmem:[%s13013_s20 + $0x8a8] sm:$0xff]  ;;  %v10124_v4 = vcombine.low %v1036_v53, %v1040_v56 }
 0x21a   : > { %3970 = vmatprep.subr.bf16.mxu1 %v9949_v6  ;;  %v1044_v1 = vld [vmem:[%s13013_s20 + $0xc88] sm:$0xff]  ;;  %v10005_v5 = vcombine.high %v916_v63, %v920_v0 }
 0x21b   : > { %3930 = vmatpush1.bf16.msra.mxu0 %v9820_v11  ;;  %v1048_v2 = vld [vmem:[%s13013_s20 + $0xca8] sm:$0xff]  ;;  %v10004_v11 = vcombine.low %v916_v63, %v920_v0 }
 0x21c   : > { %3931 = vmatprep.subr.bf16.mxu0 %v9829_v13  ;;  %v10133_v6 = vcombine.high %v1044_v1, %v1048_v2  ;;  %v924_v7 = vld [vmem:[%s13013_s20 + $0x8c8] sm:$0xff] }
 0x21d   : > { %3971 = vmatpush1.bf16.msra.mxu1 %v9948_v12  ;;  %v928_v8 = vld [vmem:[%s13013_s20 + $0x8e8] sm:$0xff]  ;;  %v10132_v12 = vcombine.low %v1044_v1, %v1048_v2 }
 0x21e   : > { %3972 = vmatprep.subr.bf16.mxu1 %v9957_v14  ;;  %v1052_v9 = vld [vmem:[%s13013_s20 + $0xcc8] sm:$0xff]  ;;  %v10013_v13 = vcombine.high %v924_v7, %v928_v8 }
 0x21f   : > { %3932 = vmatpush1.bf16.msra.mxu0 %v9828_v22  ;;  %v1056_v10 = vld [vmem:[%s13013_s20 + $0xce8] sm:$0xff]  ;;  %v10012_v22 = vcombine.low %v924_v7, %v928_v8 }
 0x220   : > { %3933 = vmatprep.subr.bf16.mxu0 %v9837_v25  ;;  %v10141_v14 = vcombine.high %v1052_v9, %v1056_v10  ;;  %v932_v15 = vld [vmem:[%s13013_s20 + $0x908] sm:$0xff] }
 0x221   : > { %3973 = vmatpush1.bf16.msra.mxu1 %v9956_v24  ;;  %v936_v16 = vld [vmem:[%s13013_s20 + $0x928] sm:$0xff]  ;;  %v10140_v24 = vcombine.low %v1052_v9, %v1056_v10 }
 0x222   : > { %3974 = vmatprep.subr.bf16.mxu1 %v9965_v54  ;;  %v1060_v18 = vld [vmem:[%s13013_s20 + $0xd08] sm:$0xff]  ;;  %v10021_v25 = vcombine.high %v932_v15, %v936_v16 }
 0x223   : > { %3934 = vmatpush1.bf16.msra.mxu0 %v9836_v31  ;;  %v1064_v19 = vld [vmem:[%s13013_s20 + $0xd28] sm:$0xff]  ;;  %v10020_v31 = vcombine.low %v932_v15, %v936_v16 }
 0x224   : > { %3935 = vmatprep.subr.bf16.mxu0 %v9845_v33  ;;  %v10149_v54 = vcombine.high %v1060_v18, %v1064_v19  ;;  %v940_v26 = vld [vmem:[%s13013_s20 + $0x948] sm:$0xff] }
 0x225   : > { %3975 = vmatpush1.bf16.msra.mxu1 %v9964_v32  ;;  %v944_v27 = vld [vmem:[%s13013_s20 + $0x968] sm:$0xff]  ;;  %v10148_v32 = vcombine.low %v1060_v18, %v1064_v19 }
 0x226   : > { %3976 = vmatprep.subr.bf16.mxu1 %v9973_v34  ;;  %v1068_v55 = vld [vmem:[%s13013_s20 + $0xd48] sm:$0xff]  ;;  %v10029_v33 = vcombine.high %v940_v26, %v944_v27 }
 0x227   : > { %3936 = vmatpush1.bf16.msra.mxu0 %v9844_v41  ;;  %v1072_v29 = vld [vmem:[%s13013_s20 + $0xd68] sm:$0xff]  ;;  %v10028_v41 = vcombine.low %v940_v26, %v944_v27 }
 0x228   : > { %3937 = vmatprep.subr.bf16.mxu0 %v9853_v43  ;;  %v10157_v34 = vcombine.high %v1068_v55, %v1072_v29  ;;  %v948_v35 = vld [vmem:[%s13013_s20 + $0x988] sm:$0xff] }
 0x229   : > { %3977 = vmatpush1.bf16.msra.mxu1 %v9972_v42  ;;  %v952_v36 = vld [vmem:[%s13013_s20 + $0x9a8] sm:$0xff]  ;;  %v10156_v42 = vcombine.low %v1068_v55, %v1072_v29 }
 0x22a   : > { %3978 = vmatprep.subr.bf16.mxu1 %v9981_v44  ;;  %v1076_v38 = vld [vmem:[%s13013_s20 + $0xd88] sm:$0xff]  ;;  %v10037_v43 = vcombine.high %v948_v35, %v952_v36 }
 0x22b   : > { %3938 = vmatpush1.bf16.msra.mxu0 %v9852_v23  ;;  %v1080_v39 = vld [vmem:[%s13013_s20 + $0xda8] sm:$0xff]  ;;  %v10036_v23 = vcombine.low %v948_v35, %v952_v36 }
 0x22c   : > { %3989 = vmatprep.subr.bf16.mxu0 %v9989_v49  ;;  %v10165_v44 = vcombine.high %v1076_v38, %v1080_v39  ;;  %v956_v45 = vld [vmem:[%s13013_s20 + $0x9c8] sm:$0xff] }
 0x22d   : > { %3979 = vmatpush1.bf16.msra.mxu1 %v9980_v48  ;;  %v960_v20 = vld [vmem:[%s13013_s20 + $0x9e8] sm:$0xff]  ;;  %v10164_v48 = vcombine.low %v1076_v38, %v1080_v39 }
 0x22e   : > { %4030 = vmatprep.subr.bf16.mxu1 %v10117_v50  ;;  %3940 = vmatmul.mubr.bf16.vlgmr.msra.gmra.mrb[8].mxu0 %v13139_v17  ;;  %v1084_v46 = vld [vmem:[%s13013_s20 + $0xdc8] sm:$0xff]  ;;  %v10045_v49 = vcombine.high %v956_v45, %v960_v20 }
 0x22f   : > { %3990 = vmatpush1.bf16.msra.mxu0 %v9988_v57  ;;  %4021 = vmatprep.mubr.bf16.mxu0 %v13157_v28  ;;  %v1088_v47 = vld [vmem:[%s13013_s20 + $0xde8] sm:$0xff]  ;;  %v10044_v57 = vcombine.low %v956_v45, %v960_v20 }
 0x230   : > { %3981 = vmatmul.mubr.bf16.vlgmr.msra.gmra.mrb[8].mxu1 %v13148_v21  ;;  %3991 = vmatprep.subr.bf16.mxu0 %v9997_v61  ;;  %v10173_v50 = vcombine.high %v1084_v46, %v1088_v47  ;;  %v964_v51 = vld [vmem:[%s13013_s20 + $0xa08] sm:$0xff] }
 0x231   : > { %4031 = vmatpush1.bf16.msra.mxu1 %v10116_v58  ;;  %4062 = vmatprep.mubr.bf16.mxu1 %v13164_v30  ;;  %v968_v52 = vld [vmem:[%s13013_s20 + $0xa28] sm:$0xff]  ;;  %v10172_v58 = vcombine.low %v1084_v46, %v1088_v47 }
 0x232   : > { %4032 = vmatprep.subr.bf16.mxu1 %v10125_v62  ;;  %v1092_v53 = vld [vmem:[%s13013_s20 + $0xe08] sm:$0xff]  ;;  %v10053_v61 = vcombine.high %v964_v51, %v968_v52 }
 0x233   : > { %3992 = vmatpush1.bf16.msra.mxu0 %v9996_v3  ;;  %v1096_v56 = vld [vmem:[%s13013_s20 + $0xe28] sm:$0xff]  ;;  %v10052_v3 = vcombine.low %v964_v51, %v968_v52 }
 0x234   : > { %3993 = vmatprep.subr.bf16.mxu0 %v10005_v5  ;;  %v10181_v62 = vcombine.high %v1092_v53, %v1096_v56  ;;  %v972_v63 = vld [vmem:[%s13013_s20 + $0xa48] sm:$0xff] }
 0x235   : > { %4033 = vmatpush1.bf16.msra.mxu1 %v10124_v4  ;;  %v976_v0 = vld [vmem:[%s13013_s20 + $0xa68] sm:$0xff]  ;;  %v10180_v4 = vcombine.low %v1092_v53, %v1096_v56 }
 0x236   : > { %4034 = vmatprep.subr.bf16.mxu1 %v10133_v6  ;;  %v1100_v1 = vld [vmem:[%s13013_s20 + $0xe48] sm:$0xff]  ;;  %v10061_v5 = vcombine.high %v972_v63, %v976_v0 }
 0x237   : > { %3994 = vmatpush1.bf16.msra.mxu0 %v10004_v11  ;;  %v1104_v2 = vld [vmem:[%s13013_s20 + $0xe68] sm:$0xff]  ;;  %v10060_v11 = vcombine.low %v972_v63, %v976_v0  ;;  %v645_v63 = vld [vmem:[%s13013_s20 + $0x10] sm:$0xff] }
 0x238   : > { %3995 = vmatprep.subr.bf16.mxu0 %v10013_v13  ;;  %v10189_v6 = vcombine.high %v1100_v1, %v1104_v2  ;;  %v980_v7 = vld [vmem:[%s13013_s20 + $0xa88] sm:$0xff]  ;;  %v649_v0 = vld [vmem:[%s13013_s20 + $0x30] sm:$0xff] }
 0x239   : > { %4035 = vmatpush1.bf16.msra.mxu1 %v10132_v12  ;;  %v984_v8 = vld [vmem:[%s13013_s20 + $0xaa8] sm:$0xff]  ;;  %v10188_v12 = vcombine.low %v1100_v1, %v1104_v2  ;;  %v773_v1 = vld [vmem:[%s13013_s20 + $0x410] sm:$0xff] }
 0x23a   : > { %4036 = vmatprep.subr.bf16.mxu1 %v10141_v14  ;;  %v1108_v9 = vld [vmem:[%s13013_s20 + $0xe88] sm:$0xff]  ;;  %v10069_v13 = vcombine.high %v980_v7, %v984_v8  ;;  %v777_v2 = vld [vmem:[%s13013_s20 + $0x430] sm:$0xff] }
 0x23b   : > { %3996 = vmatpush1.bf16.msra.mxu0 %v10012_v22  ;;  %v1112_v10 = vld [vmem:[%s13013_s20 + $0xea8] sm:$0xff]  ;;  %v10068_v22 = vcombine.low %v980_v7, %v984_v8  ;;  %v653_v7 = vld [vmem:[%s13013_s20 + $0x50] sm:$0xff] }
 0x23c   : > { %3997 = vmatprep.subr.bf16.mxu0 %v10021_v25  ;;  %v10197_v14 = vcombine.high %v1108_v9, %v1112_v10  ;;  %v988_v15 = vld [vmem:[%s13013_s20 + $0xac8] sm:$0xff]  ;;  %v657_v8 = vld [vmem:[%s13013_s20 + $0x70] sm:$0xff] }
 0x23d   : > { %4037 = vmatpush1.bf16.msra.mxu1 %v10140_v24  ;;  %v992_v16 = vld [vmem:[%s13013_s20 + $0xae8] sm:$0xff]  ;;  %v10196_v24 = vcombine.low %v1108_v9, %v1112_v10  ;;  %v781_v9 = vld [vmem:[%s13013_s20 + $0x450] sm:$0xff] }
 0x23e   : > { %4038 = vmatprep.subr.bf16.mxu1 %v10149_v54  ;;  %v1116_v18 = vld [vmem:[%s13013_s20 + $0xec8] sm:$0xff]  ;;  %v10077_v25 = vcombine.high %v988_v15, %v992_v16  ;;  %v785_v10 = vld [vmem:[%s13013_s20 + $0x470] sm:$0xff] }
 0x23f   : > { %3998 = vmatpush1.bf16.msra.mxu0 %v10020_v31  ;;  %v1120_v19 = vld [vmem:[%s13013_s20 + $0xee8] sm:$0xff]  ;;  %v10076_v31 = vcombine.low %v988_v15, %v992_v16  ;;  %v661_v15 = vld [vmem:[%s13013_s20 + $0x90] sm:$0xff] }
 0x240   : > { %3999 = vmatprep.subr.bf16.mxu0 %v10029_v33  ;;  %v10205_v54 = vcombine.high %v1116_v18, %v1120_v19  ;;  %v996_v26 = vld [vmem:[%s13013_s20 + $0xb08] sm:$0xff]  ;;  %v665_v16 = vld [vmem:[%s13013_s20 + $0xb0] sm:$0xff] }
 0x241   : > { %4039 = vmatpush1.bf16.msra.mxu1 %v10148_v32  ;;  %v1000_v27 = vld [vmem:[%s13013_s20 + $0xb28] sm:$0xff]  ;;  %v10204_v32 = vcombine.low %v1116_v18, %v1120_v19  ;;  %v789_v18 = vld [vmem:[%s13013_s20 + $0x490] sm:$0xff] }
 0x242   : > { %4040 = vmatprep.subr.bf16.mxu1 %v10157_v34  ;;  %v1124_v55 = vld [vmem:[%s13013_s20 + $0xf08] sm:$0xff]  ;;  %v10085_v33 = vcombine.high %v996_v26, %v1000_v27  ;;  %v793_v19 = vld [vmem:[%s13013_s20 + $0x4b0] sm:$0xff] }
 0x243   : > { %4000 = vmatpush1.bf16.msra.mxu0 %v10028_v41  ;;  %v1128_v29 = vld [vmem:[%s13013_s20 + $0xf28] sm:$0xff]  ;;  %v10084_v41 = vcombine.low %v996_v26, %v1000_v27  ;;  %v669_v26 = vld [vmem:[%s13013_s20 + $0xd0] sm:$0xff] }
 0x244   : > { %4001 = vmatprep.subr.bf16.mxu0 %v10037_v43  ;;  %v10213_v34 = vcombine.high %v1124_v55, %v1128_v29  ;;  %v1004_v35 = vld [vmem:[%s13013_s20 + $0xb48] sm:$0xff]  ;;  %v673_v27 = vld [vmem:[%s13013_s20 + $0xf0] sm:$0xff] }
 0x245   : > { %4041 = vmatpush1.bf16.msra.mxu1 %v10156_v42  ;;  %v1008_v36 = vld [vmem:[%s13013_s20 + $0xb68] sm:$0xff]  ;;  %v10212_v42 = vcombine.low %v1124_v55, %v1128_v29  ;;  %v797_v55 = vld [vmem:[%s13013_s20 + $0x4d0] sm:$0xff] }
 0x246   : > { %4042 = vmatprep.subr.bf16.mxu1 %v10165_v44  ;;  %v1132_v38 = vld [vmem:[%s13013_s20 + $0xf48] sm:$0xff]  ;;  %v10093_v43 = vcombine.high %v1004_v35, %v1008_v36  ;;  %v801_v29 = vld [vmem:[%s13013_s20 + $0x4f0] sm:$0xff] }
 0x247   : > { %4002 = vmatpush1.bf16.msra.mxu0 %v10036_v23  ;;  %v1136_v39 = vld [vmem:[%s13013_s20 + $0xf68] sm:$0xff]  ;;  %v10092_v23 = vcombine.low %v1004_v35, %v1008_v36  ;;  %v677_v35 = vld [vmem:[%s13013_s20 + $0x110] sm:$0xff] }
 0x248   : > { %4003 = vmatprep.subr.bf16.mxu0 %v10045_v49  ;;  %v10221_v44 = vcombine.high %v1132_v38, %v1136_v39  ;;  %v1012_v45 = vld [vmem:[%s13013_s20 + $0xb88] sm:$0xff]  ;;  %v681_v36 = vld [vmem:[%s13013_s20 + $0x130] sm:$0xff] }
 0x249   : > { %4043 = vmatpush1.bf16.msra.mxu1 %v10164_v48  ;;  %v1016_v20 = vld [vmem:[%s13013_s20 + $0xba8] sm:$0xff]  ;;  %v10220_v48 = vcombine.low %v1132_v38, %v1136_v39  ;;  %v805_v38 = vld [vmem:[%s13013_s20 + $0x510] sm:$0xff] }
 0x24a   : > { %4044 = vmatprep.subr.bf16.mxu1 %v10173_v50  ;;  %v1140_v46 = vld [vmem:[%s13013_s20 + $0xf88] sm:$0xff]  ;;  %v10101_v49 = vcombine.high %v1012_v45, %v1016_v20  ;;  %v809_v39 = vld [vmem:[%s13013_s20 + $0x530] sm:$0xff] }
 0x24b   : > { %4004 = vmatpush1.bf16.msra.mxu0 %v10044_v57  ;;  %v1144_v47 = vld [vmem:[%s13013_s20 + $0xfa8] sm:$0xff]  ;;  %v10100_v57 = vcombine.low %v1012_v45, %v1016_v20  ;;  %v685_v45 = vld [vmem:[%s13013_s20 + $0x150] sm:$0xff] }
 0x24c   : > { %4005 = vmatprep.subr.bf16.mxu0 %v10053_v61  ;;  %v10229_v50 = vcombine.high %v1140_v46, %v1144_v47  ;;  %v1020_v51 = vld [vmem:[%s13013_s20 + $0xbc8] sm:$0xff]  ;;  %v689_v20 = vld [vmem:[%s13013_s20 + $0x170] sm:$0xff] }
 0x24d   : > { %4045 = vmatpush1.bf16.msra.mxu1 %v10172_v58  ;;  %v1024_v52 = vld [vmem:[%s13013_s20 + $0xbe8] sm:$0xff]  ;;  %v10228_v58 = vcombine.low %v1140_v46, %v1144_v47  ;;  %v813_v46 = vld [vmem:[%s13013_s20 + $0x550] sm:$0xff] }
 0x24e   : > { %4046 = vmatprep.subr.bf16.mxu1 %v10181_v62  ;;  %v1148_v53 = vld [vmem:[%s13013_s20 + $0xfc8] sm:$0xff]  ;;  %v10109_v61 = vcombine.high %v1020_v51, %v1024_v52  ;;  %v817_v47 = vld [vmem:[%s13013_s20 + $0x570] sm:$0xff] }
 0x24f   : > { %4006 = vmatpush1.bf16.msra.mxu0 %v10052_v3  ;;  %v1152_v56 = vld [vmem:[%s13013_s20 + $0xfe8] sm:$0xff]  ;;  %v10108_v3 = vcombine.low %v1020_v51, %v1024_v52  ;;  %v693_v51 = vld [vmem:[%s13013_s20 + $0x190] sm:$0xff] }
 0x250   : > { %4007 = vmatprep.subr.bf16.mxu0 %v10061_v5  ;;  %v10237_v62 = vcombine.high %v1148_v53, %v1152_v56  ;;  %v9735_v5 = vcombine.high %v645_v63, %v649_v0  ;;  %v697_v52 = vld [vmem:[%s13013_s20 + $0x1b0] sm:$0xff] }
 0x251   : > { %4047 = vmatpush1.bf16.msra.mxu1 %v10180_v4  ;;  %v10236_v4 = vcombine.low %v1148_v53, %v1152_v56  ;;  %v821_v53 = vld [vmem:[%s13013_s20 + $0x590] sm:$0xff] }
 0x252   : > { %4048 = vmatprep.subr.bf16.mxu1 %v10189_v6  ;;  %v9863_v6 = vcombine.high %v773_v1, %v777_v2  ;;  %v825_v56 = vld [vmem:[%s13013_s20 + $0x5b0] sm:$0xff] }
 0x253   : > { %4008 = vmatpush1.bf16.msra.mxu0 %v10060_v11  ;;  %v9734_v11 = vcombine.low %v645_v63, %v649_v0  ;;  %v9911_v63 = vcombine.high %v821_v53, %v825_v56  ;;  %v701_v0 = vld [vmem:[%s13013_s20 + $0x1d0] sm:$0xff] }
 0x254   : > { %4009 = vmatprep.subr.bf16.mxu0 %v10069_v13  ;;  %v9743_v13 = vcombine.high %v653_v7, %v657_v8 }
 0x255   : > { %4049 = vmatpush1.bf16.msra.mxu1 %v10188_v12  ;;  %v9862_v12 = vcombine.low %v773_v1, %v777_v2  ;;  %v705_v1 = vld [vmem:[%s13013_s20 + $0x1f0] sm:$0xff] }
 0x256   : > { %4050 = vmatprep.subr.bf16.mxu1 %v10197_v14  ;;  %v9871_v14 = vcombine.high %v781_v9, %v785_v10 }
 0x257   : > { %4010 = vmatpush1.bf16.msra.mxu0 %v10068_v22  ;;  %v9742_v22 = vcombine.low %v653_v7, %v657_v8 }
 0x258   : > { %4011 = vmatprep.subr.bf16.mxu0 %v10077_v25  ;;  %v9751_v25 = vcombine.high %v661_v15, %v665_v16 }
 0x259   : > { %4051 = vmatpush1.bf16.msra.mxu1 %v10196_v24  ;;  %v9870_v24 = vcombine.low %v781_v9, %v785_v10  ;;  %v9782_v9 = vcombine.low %v693_v51, %v697_v52 }
 0x25a   : > { %4052 = vmatprep.subr.bf16.mxu1 %v10205_v54  ;;  %v9879_v54 = vcombine.high %v789_v18, %v793_v19 }
 0x25b   : > { %4012 = vmatpush1.bf16.msra.mxu0 %v10076_v31  ;;  %v9750_v31 = vcombine.low %v661_v15, %v665_v16 }
 0x25c   : > { %4013 = vmatprep.subr.bf16.mxu0 %v10085_v33  ;;  %v9759_v33 = vcombine.high %v669_v26, %v673_v27 }
 0x25d   : > { %4053 = vmatpush1.bf16.msra.mxu1 %v10204_v32  ;;  %v9878_v32 = vcombine.low %v789_v18, %v793_v19  ;;  %v709_v18 = vld [vmem:[%s13013_s20 + $0x210] sm:$0xff] }
 0x25e   : > { %4054 = vmatprep.subr.bf16.mxu1 %v10213_v34  ;;  %v9887_v34 = vcombine.high %v797_v55, %v801_v29  ;;  %v713_v19 = vld [vmem:[%s13013_s20 + $0x230] sm:$0xff] }
 0x25f   : > { %4014 = vmatpush1.bf16.msra.mxu0 %v10084_v41  ;;  %v9758_v41 = vcombine.low %v669_v26, %v673_v27  ;;  %v9799_v26 = vcombine.high %v709_v18, %v713_v19 }
 0x260   : > { %4015 = vmatprep.subr.bf16.mxu0 %v10093_v43  ;;  %v9767_v43 = vcombine.high %v677_v35, %v681_v36 }
 0x261   : > { %4055 = vmatpush1.bf16.msra.mxu1 %v10212_v42  ;;  %v9886_v42 = vcombine.low %v797_v55, %v801_v29  ;;  %v717_v55 = vld [vmem:[%s13013_s20 + $0x250] sm:$0xff] }
 0x262   : > { %4056 = vmatprep.subr.bf16.mxu1 %v10221_v44  ;;  %v9895_v44 = vcombine.high %v805_v38, %v809_v39  ;;  %v721_v29 = vld [vmem:[%s13013_s20 + $0x270] sm:$0xff] }
 0x263   : > { %4016 = vmatpush1.bf16.msra.mxu0 %v10092_v23  ;;  %v9766_v23 = vcombine.low %v677_v35, %v681_v36  ;;  %v9807_v35 = vcombine.high %v717_v55, %v721_v29 }
 0x264   : > { %4017 = vmatprep.subr.bf16.mxu0 %v10101_v49  ;;  %v9775_v49 = vcombine.high %v685_v45, %v689_v20 }
 0x265   : > { %4057 = vmatpush1.bf16.msra.mxu1 %v10220_v48  ;;  %v9894_v48 = vcombine.low %v805_v38, %v809_v39  ;;  %v725_v38 = vld [vmem:[%s13013_s20 + $0x290] sm:$0xff] }
 0x266   : > { %4058 = vmatprep.subr.bf16.mxu1 %v10229_v50  ;;  %v9903_v50 = vcombine.high %v813_v46, %v817_v47  ;;  %v729_v39 = vld [vmem:[%s13013_s20 + $0x2b0] sm:$0xff] }
 0x267   : > { %4018 = vmatpush1.bf16.msra.mxu0 %v10100_v57  ;;  %v9774_v57 = vcombine.low %v685_v45, %v689_v20  ;;  %v9815_v45 = vcombine.high %v725_v38, %v729_v39 }
 0x268   : > { %4019 = vmatprep.subr.bf16.mxu0 %v10109_v61  ;;  %v9783_v61 = vcombine.high %v693_v51, %v697_v52 }
 0x269   : > { %4059 = vmatpush1.bf16.msra.mxu1 %v10228_v58  ;;  %v9902_v58 = vcombine.low %v813_v46, %v817_v47  ;;  %v733_v46 = vld [vmem:[%s13013_s20 + $0x2d0] sm:$0xff] }
 0x26a   : > { %4060 = vmatprep.subr.bf16.mxu1 %v10237_v62  ;;  %v737_v47 = vld [vmem:[%s13013_s20 + $0x2f0] sm:$0xff] }
 0x26b   : > { %4020 = vmatpush1.bf16.msra.mxu0 %v10108_v3  ;;  %v9823_v51 = vcombine.high %v733_v46, %v737_v47 }
 0x26c   : > { %4071 = vmatprep.subr.bf16.mxu0 %v9735_v5  ;;  %v833_v5 = vld [vmem:[%s13013_s20 + $0x5f0] sm:$0xff] }
 0x26d   : > { %4061 = vmatpush1.bf16.msra.mxu1 %v10236_v4  ;;  %v829_v4 = vld [vmem:[%s13013_s20 + $0x5d0] sm:$0xff] }
 0x26e   : > { %4112 = vmatprep.subr.bf16.mxu1 %v9863_v6  ;;  %4022 = vmatmul.mubr.bf16.vlgmr.msra.gmra.mrb[12].mxu0 %v13229_v37  ;;  %v9919_v16 = vcombine.high %v829_v4, %v833_v5 }
 0x26f   : > { %4072 = vmatpush1.bf16.msra.mxu0 %v9734_v11  ;;  %4103 = vmatprep.mubr.bf16.mxu0 %v13089_v59 }
 0x270   : > { %4063 = vmatmul.mubr.bf16.vlgmr.msra.gmra.mrb[12].mxu1 %v13235_v40  ;;  %4073 = vmatprep.subr.bf16.mxu0 %v9743_v13  ;;  %v9910_v13 = vcombine.low %v821_v53, %v825_v56  ;;  %v741_v53 = vld [vmem:[%s13013_s20 + $0x310] sm:$0xff] }
 0x271   : > { %4113 = vmatpush1.bf16.msra.mxu1 %v9862_v12  ;;  %4144 = vmatprep.mubr.bf16.mxu1 %v13093_v60  ;;  %v745_v56 = vld [vmem:[%s13013_s20 + $0x330] sm:$0xff] }
 0x272   : > { %4114 = vmatprep.subr.bf16.mxu1 %v9871_v14  ;;  %v9791_v14 = vcombine.high %v701_v0, %v705_v1 }
 0x273   : > { %4074 = vmatpush1.bf16.msra.mxu0 %v9742_v22  ;;  %v837_v22 = vld [vmem:[%s13013_s20 + $0x610] sm:$0xff] }
 0x274   : > { %4075 = vmatprep.subr.bf16.mxu0 %v9751_v25  ;;  %v9790_v25 = vcombine.low %v701_v0, %v705_v1  ;;  %v749_v1 = vld [vmem:[%s13013_s20 + $0x350] sm:$0xff] }
 0x275   : > { %4115 = vmatpush1.bf16.msra.mxu1 %v9870_v24  ;;  %v841_v24 = vld [vmem:[%s13013_s20 + $0x630] sm:$0xff] }
 0x276   : > { %4116 = vmatprep.subr.bf16.mxu1 %v9879_v54  ;;  %v9918_v54 = vcombine.low %v829_v4, %v833_v5  ;;  %v9927_v27 = vcombine.high %v837_v22, %v841_v24  ;;  %v881_v4 = vld [vmem:[%s13013_s20 + $0x770] sm:$0xff]  ;;  %v9830_v5 = vcombine.low %v741_v53, %v745_v56 }
 0x277   : > { %4076 = vmatpush1.bf16.msra.mxu0 %v9750_v31  ;;  %v845_v31 = vld [vmem:[%s13013_s20 + $0x650] sm:$0xff] }
 0x278   : > { %4077 = vmatprep.subr.bf16.mxu0 %v9759_v33  ;;  %v9798_v33 = vcombine.low %v709_v18, %v713_v19 }
 0x279   : > { %4117 = vmatpush1.bf16.msra.mxu1 %v9878_v32  ;;  %v849_v32 = vld [vmem:[%s13013_s20 + $0x670] sm:$0xff] }
 0x27a   : > { %4118 = vmatprep.subr.bf16.mxu1 %v9887_v34  ;;  %v9926_v34 = vcombine.low %v837_v22, %v841_v24  ;;  %v9935_v36 = vcombine.high %v845_v31, %v849_v32  ;;  %v765_v22 = vld [vmem:[%s13013_s20 + $0x3d0] sm:$0xff] }
 0x27b   : > { %4078 = vmatpush1.bf16.msra.mxu0 %v9758_v41  ;;  %v853_v41 = vld [vmem:[%s13013_s20 + $0x690] sm:$0xff] }
 0x27c   : > { %4079 = vmatprep.subr.bf16.mxu0 %v9767_v43  ;;  %v9806_v43 = vcombine.low %v717_v55, %v721_v29  ;;  %v769_v24 = vld [vmem:[%s13013_s20 + $0x3f0] sm:$0xff] }
 0x27d   : > { %4119 = vmatpush1.bf16.msra.mxu1 %v9886_v42  ;;  %v857_v42 = vld [vmem:[%s13013_s20 + $0x6b0] sm:$0xff]  ;;  %v9855_v55 = vcombine.high %v765_v22, %v769_v24 }
 0x27e   : > { %4120 = vmatprep.subr.bf16.mxu1 %v9895_v44  ;;  %v9934_v44 = vcombine.low %v845_v31, %v849_v32  ;;  %v9943_v20 = vcombine.high %v853_v41, %v857_v42  ;;  %v901_v31 = vld [vmem:[%s13013_s20 + $0x810] sm:$0xff] }
 0x27f   : > { %4080 = vmatpush1.bf16.msra.mxu0 %v9766_v23  ;;  %v861_v23 = vld [vmem:[%s13013_s20 + $0x6d0] sm:$0xff] }
 0x280   : > { %4081 = vmatprep.subr.bf16.mxu0 %v9775_v49  ;;  %v9814_v49 = vcombine.low %v725_v38, %v729_v39  ;;  %v905_v32 = vld [vmem:[%s13013_s20 + $0x830] sm:$0xff] }
 0x281   : > { %4121 = vmatpush1.bf16.msra.mxu1 %v9894_v48  ;;  %v3777_v62 = vpop.f32.mrb[0].mxu0  ;;  %v865_v48 = vld [vmem:[%s13013_s20 + $0x6f0] sm:$0xff]  ;;  %v9991_v38 = vcombine.high %v901_v31, %v905_v32 }
 0x282   : > { %4122 = vmatprep.subr.bf16.mxu1 %v9903_v50  ;;  %v3779_v3 = vpop.f32.mrb[1].mxu0  ;;  %v9942_v50 = vcombine.low %v853_v41, %v857_v42  ;;  %v9951_v52 = vcombine.high %v861_v23, %v865_v48  ;;  %v909_v41 = vld [vmem:[%s13013_s20 + $0x850] sm:$0xff] }
 0x283   : > { %v3818_v2 = vpop.f32.mrb[0].mxu1  ;;  %v3781_v8 = vpop.f32.mrb[2].mxu0  ;;  %4082 = vmatpush1.bf16.msra.mxu0 %v9774_v57  ;;  %v869_v57 = vld [vmem:[%s13013_s20 + $0x710] sm:$0xff] }
 0x284   : > { %v13401_v6 = vadd.f32 %v3818_v2, %v3777_v62  ;;  %v3820_v7 = vpop.f32.mrb[1].mxu1  ;;  %v3782_v12 = vpop.f32.mrb[3].mxu0  ;;  %4083 = vmatprep.subr.bf16.mxu0 %v9783_v61  ;;  %v9822_v61 = vcombine.low %v733_v46, %v737_v47  ;;  %v9950_v62 = vcombine.low %v861_v23, %v865_v48  ;;  %v753_v2 = vld [vmem:[%s13013_s20 + $0x370] sm:$0xff] }
 0x285   : > { %v13403_v10 = vadd.f32 %v3820_v7, %v3779_v3  ;;  %v3822_v11 = vpop.f32.mrb[2].mxu1  ;;  %4123 = vmatpush1.bf16.msra.mxu1 %v9902_v58  ;;  %v873_v58 = vld [vmem:[%s13013_s20 + $0x730] sm:$0xff]  ;;  %v9839_v8 = vcombine.high %v749_v1, %v753_v2 }
 0x286   : > { %v3823_v15 = vpop.f32.mrb[3].mxu1  ;;  %4124 = vmatprep.subr.bf16.mxu1 %v9911_v63  ;;  %v9831_v63 = vcombine.high %v741_v53, %v745_v56  ;;  %v9959_v0 = vcombine.high %v869_v57, %v873_v58  ;;  %v877_v3 = vld [vmem:[%s13013_s20 + $0x750] sm:$0xff]  ;;  %v9958_v7 = vcombine.low %v869_v57, %v873_v58 }
 0x287   : > { %4084 = vmatpush1.bf16.msra.mxu0 %v9782_v9  ;;  %v9967_v9 = vcombine.high %v877_v3, %v881_v4  ;;  %v757_v11 = vld [vmem:[%s13013_s20 + $0x390] sm:$0xff]  ;;  %v9838_v15 = vcombine.low %v749_v1, %v753_v2 }
 0x288   : > { %4085 = vmatprep.subr.bf16.mxu0 %v9791_v14  ;;  %v761_v12 = vld [vmem:[%s13013_s20 + $0x3b0] sm:$0xff] }
 0x289   : > { %4125 = vmatpush1.bf16.msra.mxu1 %v9910_v13  ;;  %v885_v13 = vld [vmem:[%s13013_s20 + $0x790] sm:$0xff]  ;;  %v9847_v18 = vcombine.high %v757_v11, %v761_v12 }
 0x28a   : > { %4126 = vmatprep.subr.bf16.mxu1 %v9919_v16  ;;  %v889_v14 = vld [vmem:[%s13013_s20 + $0x7b0] sm:$0xff]  ;;  %v9966_v16 = vcombine.low %v877_v3, %v881_v4 }
 0x28b   : > { %4086 = vmatpush1.bf16.msra.mxu0 %v9790_v25  ;;  %v9975_v19 = vcombine.high %v885_v13, %v889_v14  ;;  %v893_v25 = vld [vmem:[%s13013_s20 + $0x7d0] sm:$0xff] }
 0x28c   : > { %4087 = vmatprep.subr.bf16.mxu0 %v9799_v26  ;;  %v9846_v26 = vcombine.low %v757_v11, %v761_v12  ;;  %v913_v42 = vld [vmem:[%s13013_s20 + $0x870] sm:$0xff] }
 0x28d   : > { %4127 = vmatpush1.bf16.msra.mxu1 %v9918_v54  ;;  %v897_v54 = vld [vmem:[%s13013_s20 + $0x7f0] sm:$0xff]  ;;  %v9999_v46 = vcombine.high %v909_v41, %v913_v42 }
 0x28e   : > { %4128 = vmatprep.subr.bf16.mxu1 %v9927_v27  ;;  %v9974_v27 = vcombine.low %v885_v13, %v889_v14  ;;  %v9983_v29 = vcombine.high %v893_v25, %v897_v54  ;;  %v917_v23 = vld [vmem:[%s13013_s20 + $0x890] sm:$0xff] }
 0x28f   : > { %4088 = vmatpush1.bf16.msra.mxu0 %v9798_v33  ;;  %v1029_v33 = vld [vmem:[%s13013_s20 + $0xc10] sm:$0xff] }
 0x290   : > { %4089 = vmatprep.subr.bf16.mxu0 %v9807_v35  ;;  %v9854_v35 = vcombine.low %v765_v22, %v769_v24  ;;  %v921_v48 = vld [vmem:[%s13013_s20 + $0x8b0] sm:$0xff] }
 0x291   : > { %4129 = vmatpush1.bf16.msra.mxu1 %v9926_v34  ;;  %v1033_v34 = vld [vmem:[%s13013_s20 + $0xc30] sm:$0xff]  ;;  %v10007_v53 = vcombine.high %v917_v23, %v921_v48 }
 0x292   : > { %4130 = vmatprep.subr.bf16.mxu1 %v9935_v36  ;;  %v9982_v36 = vcombine.low %v893_v25, %v897_v54  ;;  %v10119_v39 = vcombine.high %v1029_v33, %v1033_v34  ;;  %v925_v57 = vld [vmem:[%s13013_s20 + $0x8d0] sm:$0xff] }
 0x293   : > { %4090 = vmatpush1.bf16.msra.mxu0 %v9806_v43  ;;  %v1037_v43 = vld [vmem:[%s13013_s20 + $0xc50] sm:$0xff] }
 0x294   : > { %4091 = vmatprep.subr.bf16.mxu0 %v9815_v45  ;;  %v9990_v45 = vcombine.low %v901_v31, %v905_v32  ;;  %v929_v58 = vld [vmem:[%s13013_s20 + $0x8f0] sm:$0xff] }
 0x295   : > { %4131 = vmatpush1.bf16.msra.mxu1 %v9934_v44  ;;  %v1041_v44 = vld [vmem:[%s13013_s20 + $0xc70] sm:$0xff]  ;;  %v10015_v1 = vcombine.high %v925_v57, %v929_v58 }
 0x296   : > { %4132 = vmatprep.subr.bf16.mxu1 %v9943_v20  ;;  %v10118_v20 = vcombine.low %v1029_v33, %v1033_v34  ;;  %v10127_v47 = vcombine.high %v1037_v43, %v1041_v44  ;;  %v933_v3 = vld [vmem:[%s13013_s20 + $0x910] sm:$0xff] }
 0x297   : > { %4092 = vmatpush1.bf16.msra.mxu0 %v9814_v49  ;;  %v1045_v49 = vld [vmem:[%s13013_s20 + $0xc90] sm:$0xff] }
 0x298   : > { %4093 = vmatprep.subr.bf16.mxu0 %v9823_v51  ;;  %v9998_v51 = vcombine.low %v909_v41, %v913_v42  ;;  %v937_v4 = vld [vmem:[%s13013_s20 + $0x930] sm:$0xff] }
 0x299   : > { %4133 = vmatpush1.bf16.msra.mxu1 %v9942_v50  ;;  %v1049_v50 = vld [vmem:[%s13013_s20 + $0xcb0] sm:$0xff]  ;;  %v10023_v11 = vcombine.high %v933_v3, %v937_v4 }
 0x29a   : > { %4134 = vmatprep.subr.bf16.mxu1 %v9951_v52  ;;  %v10126_v52 = vcombine.low %v1037_v43, %v1041_v44  ;;  %v10135_v56 = vcombine.high %v1045_v49, %v1049_v50  ;;  %v941_v13 = vld [vmem:[%s13013_s20 + $0x950] sm:$0xff]  ;;  %v631_v43 = vld [vmem:[#allocation2] sm:$0xff] }
 0x29b   : > { %4094 = vmatpush1.bf16.msra.mxu0 %v9822_v61  ;;  %v1053_v61 = vld [vmem:[%s13013_s20 + $0xcd0] sm:$0xff] }
 0x29c   : > { %4095 = vmatprep.subr.bf16.mxu0 %v9831_v63  ;;  %v10006_v63 = vcombine.low %v917_v23, %v921_v48  ;;  %v945_v14 = vld [vmem:[%s13013_s20 + $0x970] sm:$0xff]  ;;  %v632_v23 = vld [vmem:[#allocation2 + $0x8] sm:$0xff] }
 0x29d   : > { %4135 = vmatpush1.bf16.msra.mxu1 %v9950_v62  ;;  %v1057_v62 = vld [vmem:[%s13013_s20 + $0xcf0] sm:$0xff]  ;;  %v10031_v22 = vcombine.high %v941_v13, %v945_v14 }
 0x29e   : > { %4136 = vmatprep.subr.bf16.mxu1 %v9959_v0  ;;  %v10134_v0 = vcombine.low %v1045_v49, %v1049_v50  ;;  %v10143_v2 = vcombine.high %v1053_v61, %v1057_v62  ;;  %v949_v25 = vld [vmem:[%s13013_s20 + $0x990] sm:$0xff] }
 0x29f   : > { %4096 = vmatpush1.bf16.msra.mxu0 %v9830_v5  ;;  %v1061_v5 = vld [vmem:[%s13013_s20 + $0xd10] sm:$0xff] }
 0x2a0   : > { %4097 = vmatprep.subr.bf16.mxu0 %v9839_v8  ;;  %v10014_v8 = vcombine.low %v925_v57, %v929_v58  ;;  %v953_v54 = vld [vmem:[%s13013_s20 + $0x9b0] sm:$0xff] }
 0x2a1   : > { %4137 = vmatpush1.bf16.msra.mxu1 %v9958_v7  ;;  %v1065_v7 = vld [vmem:[%s13013_s20 + $0xd30] sm:$0xff]  ;;  %v10039_v31 = vcombine.high %v949_v25, %v953_v54 }
 0x2a2   : > { %4138 = vmatprep.subr.bf16.mxu1 %v9967_v9  ;;  %v10142_v9 = vcombine.low %v1053_v61, %v1057_v62  ;;  %v10151_v12 = vcombine.high %v1061_v5, %v1065_v7  ;;  %v957_v34 = vld [vmem:[%s13013_s20 + $0x9d0] sm:$0xff] }
 0x2a3   : > { %4098 = vmatpush1.bf16.msra.mxu0 %v9838_v15  ;;  %v1069_v15 = vld [vmem:[%s13013_s20 + $0xd50] sm:$0xff] }
 0x2a4   : > { %4099 = vmatprep.subr.bf16.mxu0 %v9847_v18  ;;  %v10022_v18 = vcombine.low %v933_v3, %v937_v4  ;;  %v1085_v41 = vld [vmem:[%s13013_s20 + $0xdd0] sm:$0xff] }
 0x2a5   : > { %4139 = vmatpush1.bf16.msra.mxu1 %v9966_v16  ;;  %v1073_v16 = vld [vmem:[%s13013_s20 + $0xd70] sm:$0xff] }
 0x2a6   : > { %4140 = vmatprep.subr.bf16.mxu1 %v9975_v19  ;;  %v10150_v19 = vcombine.low %v1061_v5, %v1065_v7  ;;  %v10159_v24 = vcombine.high %v1069_v15, %v1073_v16  ;;  %v1089_v42 = vld [vmem:[%s13013_s20 + $0xdf0] sm:$0xff] }
 0x2a7   : > { %4100 = vmatpush1.bf16.msra.mxu0 %v9846_v26  ;;  %v1077_v26 = vld [vmem:[%s13013_s20 + $0xd90] sm:$0xff] }
 0x2a8   : > { %4101 = vmatprep.subr.bf16.mxu0 %v9855_v55  ;;  %v10030_v55 = vcombine.low %v941_v13, %v945_v14  ;;  %v1093_v58 = vld [vmem:[%s13013_s20 + $0xe10] sm:$0xff] }
 0x2a9   : > { %4141 = vmatpush1.bf16.msra.mxu1 %v9974_v27  ;;  %v1081_v27 = vld [vmem:[%s13013_s20 + $0xdb0] sm:$0xff] }
 0x2aa   : > { %4142 = vmatprep.subr.bf16.mxu1 %v9983_v29  ;;  %v10158_v29 = vcombine.low %v1069_v15, %v1073_v16  ;;  %v10167_v33 = vcombine.high %v1077_v26, %v1081_v27  ;;  %v10166_v49 = vcombine.low %v1077_v26, %v1081_v27  ;;  %v1097_v61 = vld [vmem:[%s13013_s20 + $0xe30] sm:$0xff] }
 0x2ab   : > { %4102 = vmatpush1.bf16.msra.mxu0 %v9854_v35  ;;  %v961_v35 = vld [vmem:[%s13013_s20 + $0x9f0] sm:$0xff] }
 0x2ac   : > { %4153 = vmatprep.subr.bf16.mxu0 %v9991_v38  ;;  %v10047_v50 = vcombine.high %v957_v34, %v961_v35  ;;  %v973_v3 = vld [vmem:[%s13013_s20 + $0xa50] sm:$0xff] }
 0x2ad   : > { %4143 = vmatpush1.bf16.msra.mxu1 %v9982_v36  ;;  %v977_v4 = vld [vmem:[%s13013_s20 + $0xa70] sm:$0xff] }
 0x2ae   : > { %4194 = vmatprep.subr.bf16.mxu1 %v10119_v39  ;;  %4104 = vmatmul.mubr.bf16.vlgmr.msra.gmra.mrb[16].mxu0 %v13139_v17  ;;  %v1101_v5 = vld [vmem:[%s13013_s20 + $0xe50] sm:$0xff] }
 0x2af   : > { %4154 = vmatpush1.bf16.msra.mxu0 %v9990_v45  ;;  %4185 = vmatprep.mubr.bf16.mxu0 %v13157_v28  ;;  %v1105_v7 = vld [vmem:[%s13013_s20 + $0xe70] sm:$0xff] }
 0x2b0   : > { %4145 = vmatmul.mubr.bf16.vlgmr.msra.gmra.mrb[16].mxu1 %v13148_v21  ;;  %4155 = vmatprep.subr.bf16.mxu0 %v9999_v46  ;;  %v10038_v46 = vcombine.low %v949_v25, %v953_v54  ;;  %v981_v13 = vld [vmem:[%s13013_s20 + $0xa90] sm:$0xff] }
 0x2b1   : > { %4195 = vmatpush1.bf16.msra.mxu1 %v10118_v20  ;;  %4226 = vmatprep.mubr.bf16.mxu1 %v13164_v30  ;;  %v985_v14 = vld [vmem:[%s13013_s20 + $0xab0] sm:$0xff] }
 0x2b2   : > { %4196 = vmatprep.subr.bf16.mxu1 %v10127_v47  ;;  %v1109_v15 = vld [vmem:[%s13013_s20 + $0xe90] sm:$0xff] }
 0x2b3   : > { %4156 = vmatpush1.bf16.msra.mxu0 %v9998_v51  ;;  %v1113_v16 = vld [vmem:[%s13013_s20 + $0xeb0] sm:$0xff] }
 0x2b4   : > { %4157 = vmatprep.subr.bf16.mxu0 %v10007_v53  ;;  %v965_v53 = vld [vmem:[%s13013_s20 + $0xa10] sm:$0xff] }
 0x2b5   : > { %4197 = vmatpush1.bf16.msra.mxu1 %v10126_v52  ;;  %v989_v25 = vld [vmem:[%s13013_s20 + $0xad0] sm:$0xff] }
 0x2b6   : > { %4198 = vmatprep.subr.bf16.mxu1 %v10135_v56  ;;  %v969_v56 = vld [vmem:[%s13013_s20 + $0xa30] sm:$0xff] }
 0x2b7   : > { %4158 = vmatpush1.bf16.msra.mxu0 %v10006_v63  ;;  %v10046_v63 = vcombine.low %v957_v34, %v961_v35  ;;  %v993_v54 = vld [vmem:[%s13013_s20 + $0xaf0] sm:$0xff] }
 0x2b8   : > { %4159 = vmatprep.subr.bf16.mxu0 %v10015_v1  ;;  %v10055_v1 = vcombine.high %v965_v53, %v969_v56  ;;  %v1117_v26 = vld [vmem:[%s13013_s20 + $0xed0] sm:$0xff] }
 0x2b9   : > { %4199 = vmatpush1.bf16.msra.mxu1 %v10134_v0  ;;  %v10174_v0 = vcombine.low %v1085_v41, %v1089_v42  ;;  %v1121_v27 = vld [vmem:[%s13013_s20 + $0xef0] sm:$0xff] }
 0x2ba   : > { %4200 = vmatprep.subr.bf16.mxu1 %v10143_v2  ;;  %v10183_v2 = vcombine.high %v1093_v58, %v1097_v61  ;;  %v1001_v34 = vld [vmem:[%s13013_s20 + $0xb30] sm:$0xff] }
 0x2bb   : > { %4160 = vmatpush1.bf16.msra.mxu0 %v10014_v8  ;;  %v10054_v8 = vcombine.low %v965_v53, %v969_v56  ;;  %v1125_v35 = vld [vmem:[%s13013_s20 + $0xf10] sm:$0xff] }
 0x2bc   : > { %4161 = vmatprep.subr.bf16.mxu0 %v10023_v11  ;;  %v10063_v11 = vcombine.high %v973_v3, %v977_v4 }
 0x2bd   : > { %4201 = vmatpush1.bf16.msra.mxu1 %v10142_v9  ;;  %v10182_v9 = vcombine.low %v1093_v58, %v1097_v61  ;;  %v1025_v58 = vld [vmem:[%s13013_s20 + $0xbf0] sm:$0xff] }
 0x2be   : > { %4202 = vmatprep.subr.bf16.mxu1 %v10151_v12  ;;  %v10191_v12 = vcombine.high %v1101_v5, %v1105_v7  ;;  %v1149_v61 = vld [vmem:[%s13013_s20 + $0xfd0] sm:$0xff] }
 0x2bf   : > { %4162 = vmatpush1.bf16.msra.mxu0 %v10022_v18  ;;  %v10062_v18 = vcombine.low %v973_v3, %v977_v4  ;;  %v646_v3 = vld [vmem:[%s13013_s20 + $0x18] sm:$0xff] }
 0x2c0   : > { %4163 = vmatprep.subr.bf16.mxu0 %v10031_v22  ;;  %v10071_v22 = vcombine.high %v981_v13, %v985_v14  ;;  %v650_v4 = vld [vmem:[%s13013_s20 + $0x38] sm:$0xff] }
 0x2c1   : > { %4203 = vmatpush1.bf16.msra.mxu1 %v10150_v19  ;;  %v3859_v32 = vpop.f32.mrb[4].mxu0  ;;  %v10190_v19 = vcombine.low %v1101_v5, %v1105_v7  ;;  %v774_v5 = vld [vmem:[%s13013_s20 + $0x418] sm:$0xff] }
 0x2c2   : > { %4204 = vmatprep.subr.bf16.mxu1 %v10159_v24  ;;  %v3860_v36 = vadd.f32 %v3859_v32, %v13401_v6  ;;  %v3861_v39 = vpop.f32.mrb[5].mxu0  ;;  %v10199_v24 = vcombine.high %v1109_v15, %v1113_v16  ;;  %v10207_v32 = vcombine.high %v1117_v26, %v1121_v27  ;;  %v778_v7 = vld [vmem:[%s13013_s20 + $0x438] sm:$0xff] }
 0x2c3   : > { %v3900_v38 = vpop.f32.mrb[4].mxu1  ;;  %v3862_v44 = vadd.f32 %v3861_v39, %v13403_v10  ;;  %v3863_v20 = vpop.f32.mrb[6].mxu0  ;;  %4164 = vmatpush1.bf16.msra.mxu0 %v10030_v55  ;;  %v10175_v10 = vcombine.high %v1085_v41, %v1089_v42  ;;  %v10070_v55 = vcombine.low %v981_v13, %v985_v14  ;;  %v10206_v39 = vcombine.low %v1117_v26, %v1121_v27  ;;  %v654_v13 = vld [vmem:[%s13013_s20 + $0x58] sm:$0xff] }
 0x2c4   : > { %v3902_v45 = vpop.f32.mrb[5].mxu1  ;;  %v3901_v47 = vadd.f32 %v3900_v38, %v3860_v36  ;;  %v3864_v6 = vpop.f32.mrb[7].mxu0  ;;  %4165 = vmatprep.subr.bf16.mxu0 %v10039_v31  ;;  %v10079_v31 = vcombine.high %v989_v25, %v993_v54  ;;  %v1129_v36 = vld [vmem:[%s13013_s20 + $0xf30] sm:$0xff]  ;;  %v10078_v38 = vcombine.low %v989_v25, %v993_v54  ;;  %v658_v14 = vld [vmem:[%s13013_s20 + $0x78] sm:$0xff] }
 0x2c5   : > { %v3904_v48 = vpop.f32.mrb[6].mxu1  ;;  %4205 = vmatpush1.bf16.msra.mxu1 %v10158_v29  ;;  %v3903_v51 = vadd.f32 %v3902_v45, %v3862_v44  ;;  %v10198_v29 = vcombine.low %v1109_v15, %v1113_v16  ;;  %v10215_v42 = vcombine.high %v1125_v35, %v1129_v36  ;;  %v1009_v44 = vld [vmem:[%s13013_s20 + $0xb70] sm:$0xff]  ;;  %v782_v15 = vld [vmem:[%s13013_s20 + $0x458] sm:$0xff] }
 0x2c6   : > { %v3905_v52 = vpop.f32.mrb[7].mxu1  ;;  %4206 = vmatprep.subr.bf16.mxu1 %v10167_v33  ;;  %v4399_v57 = vadd.f32 %v3901_v47, %v631_v43  ;;  %v997_v33 = vld [vmem:[%s13013_s20 + $0xb10] sm:$0xff]  ;;  %v10214_v47 = vcombine.low %v1125_v35, %v1129_v36  ;;  %v786_v16 = vld [vmem:[%s13013_s20 + $0x478] sm:$0xff] }
 0x2c7   : > { %v4400_v62 = vadd.f32 %v3903_v51, %v632_v23  ;;  %4166 = vmatpush1.bf16.msra.mxu0 %v10038_v46  ;;  %v10087_v41 = vcombine.high %v997_v33, %v1001_v34  ;;  %v1005_v43 = vld [vmem:[%s13013_s20 + $0xb50] sm:$0xff]  ;;  %v10086_v46 = vcombine.low %v997_v33, %v1001_v34  ;;  %v662_v25 = vld [vmem:[%s13013_s20 + $0x98] sm:$0xff] }
 0x2c8   : > { %4407 = vst [vmem:[#allocation2] sm:$0xff] %v4399_v57  ;;  %4167 = vmatprep.subr.bf16.mxu0 %v10047_v50  ;;  %v1133_v45 = vld [vmem:[%s13013_s20 + $0xf50] sm:$0xff]  ;;  %v10095_v23 = vcombine.high %v1005_v43, %v1009_v44  ;;  %v10094_v52 = vcombine.low %v1005_v43, %v1009_v44  ;;  %v666_v54 = vld [vmem:[%s13013_s20 + $0xb8] sm:$0xff] }
 0x2c9   : > { %4207 = vmatpush1.bf16.msra.mxu1 %v10166_v49  ;;  %4408 = vst [vmem:[#allocation2 + $0x8] sm:$0xff] %v4400_v62  ;;  %v1137_v20 = vld [vmem:[%s13013_s20 + $0xf70] sm:$0xff]  ;;  %v790_v26 = vld [vmem:[%s13013_s20 + $0x498] sm:$0xff] }
 0x2ca   : > { %4208 = vmatprep.subr.bf16.mxu1 %v10175_v10  ;;  %v10223_v48 = vcombine.high %v1133_v45, %v1137_v20  ;;  %v1013_v6 = vld [vmem:[%s13013_s20 + $0xb90] sm:$0xff]  ;;  %v10222_v10 = vcombine.low %v1133_v45, %v1137_v20  ;;  %v794_v27 = vld [vmem:[%s13013_s20 + $0x4b8] sm:$0xff] }
 0x2cb   : > { %4168 = vmatpush1.bf16.msra.mxu0 %v10046_v63  ;;  %v1017_v49 = vld [vmem:[%s13013_s20 + $0xbb0] sm:$0xff]  ;;  %v670_v33 = vld [vmem:[%s13013_s20 + $0xd8] sm:$0xff] }
 0x2cc   : > { %4169 = vmatprep.subr.bf16.mxu0 %v10055_v1  ;;  %v1141_v50 = vld [vmem:[%s13013_s20 + $0xf90] sm:$0xff]  ;;  %v10103_v53 = vcombine.high %v1013_v6, %v1017_v49  ;;  %v10102_v63 = vcombine.low %v1013_v6, %v1017_v49  ;;  %v674_v34 = vld [vmem:[%s13013_s20 + $0xf8] sm:$0xff] }
 0x2cd   : > { %4209 = vmatpush1.bf16.msra.mxu1 %v10174_v0  ;;  %v1145_v51 = vld [vmem:[%s13013_s20 + $0xfb0] sm:$0xff]  ;;  %v798_v35 = vld [vmem:[%s13013_s20 + $0x4d8] sm:$0xff]  ;;  %v9760_v20 = vcombine.low %v670_v33, %v674_v34 }
 0x2ce   : > { %4210 = vmatprep.subr.bf16.mxu1 %v10183_v2  ;;  %v10231_v56 = vcombine.high %v1141_v50, %v1145_v51  ;;  %v1021_v57 = vld [vmem:[%s13013_s20 + $0xbd0] sm:$0xff]  ;;  %v10230_v0 = vcombine.low %v1141_v50, %v1145_v51  ;;  %v802_v36 = vld [vmem:[%s13013_s20 + $0x4f8] sm:$0xff] }
 0x2cf   : > { %4170 = vmatpush1.bf16.msra.mxu0 %v10054_v8  ;;  %v1153_v62 = vld [vmem:[%s13013_s20 + $0xff0] sm:$0xff]  ;;  %v10111_v1 = vcombine.high %v1021_v57, %v1025_v58  ;;  %v10110_v8 = vcombine.low %v1021_v57, %v1025_v58  ;;  %v678_v43 = vld [vmem:[%s13013_s20 + $0x118] sm:$0xff] }
 0x2d0   : > { %4171 = vmatprep.subr.bf16.mxu0 %v10063_v11  ;;  %v10239_v2 = vcombine.high %v1149_v61, %v1153_v62  ;;  %v9737_v11 = vcombine.high %v646_v3, %v650_v4  ;;  %v682_v44 = vld [vmem:[%s13013_s20 + $0x138] sm:$0xff] }
 0x2d1   : > { %4211 = vmatpush1.bf16.msra.mxu1 %v10182_v9  ;;  %v10238_v9 = vcombine.low %v1149_v61, %v1153_v62  ;;  %v806_v45 = vld [vmem:[%s13013_s20 + $0x518] sm:$0xff]  ;;  %v9768_v50 = vcombine.low %v678_v43, %v682_v44 }
 0x2d2   : > { %4212 = vmatprep.subr.bf16.mxu1 %v10191_v12  ;;  %v9865_v12 = vcombine.high %v774_v5, %v778_v7  ;;  %v814_v6 = vld [vmem:[%s13013_s20 + $0x558] sm:$0xff] }
 0x2d3   : > { %4172 = vmatpush1.bf16.msra.mxu0 %v10062_v18  ;;  %v9736_v18 = vcombine.low %v646_v3, %v650_v4  ;;  %v818_v49 = vld [vmem:[%s13013_s20 + $0x578] sm:$0xff] }
 0x2d4   : > { %4173 = vmatprep.subr.bf16.mxu0 %v10071_v22  ;;  %v9745_v22 = vcombine.high %v654_v13, %v658_v14  ;;  %v822_v57 = vld [vmem:[%s13013_s20 + $0x598] sm:$0xff]  ;;  %v9904_v62 = vcombine.low %v814_v6, %v818_v49 }
 0x2d5   : > { %4213 = vmatpush1.bf16.msra.mxu1 %v10190_v19  ;;  %v9864_v19 = vcombine.low %v774_v5, %v778_v7  ;;  %v826_v58 = vld [vmem:[%s13013_s20 + $0x5b8] sm:$0xff] }
 0x2d6   : > { %4214 = vmatprep.subr.bf16.mxu1 %v10199_v24  ;;  %v9873_v24 = vcombine.high %v782_v15, %v786_v16  ;;  %v706_v3 = vld [vmem:[%s13013_s20 + $0x1f8] sm:$0xff] }
 0x2d7   : > { %4174 = vmatpush1.bf16.msra.mxu0 %v10070_v55  ;;  %v9744_v55 = vcombine.low %v654_v13, %v658_v14  ;;  %v830_v7 = vld [vmem:[%s13013_s20 + $0x5d8] sm:$0xff] }
 0x2d8   : > { %4175 = vmatprep.subr.bf16.mxu0 %v10079_v31  ;;  %v9753_v31 = vcombine.high %v662_v25, %v666_v54 }
 0x2d9   : > { %4215 = vmatpush1.bf16.msra.mxu1 %v10198_v29  ;;  %v9872_v29 = vcombine.low %v782_v15, %v786_v16 }
 0x2da   : > { %4216 = vmatprep.subr.bf16.mxu1 %v10207_v32  ;;  %v9881_v32 = vcombine.high %v790_v26, %v794_v27 }
 0x2db   : > { %4176 = vmatpush1.bf16.msra.mxu0 %v10078_v38  ;;  %v9752_v38 = vcombine.low %v662_v25, %v666_v54  ;;  %v710_v25 = vld [vmem:[%s13013_s20 + $0x218] sm:$0xff] }
 0x2dc   : > { %4177 = vmatprep.subr.bf16.mxu0 %v10087_v41  ;;  %v9761_v41 = vcombine.high %v670_v33, %v674_v34  ;;  %v714_v54 = vld [vmem:[%s13013_s20 + $0x238] sm:$0xff] }
 0x2dd   : > { %4217 = vmatpush1.bf16.msra.mxu1 %v10206_v39  ;;  %v9880_v39 = vcombine.low %v790_v26, %v794_v27  ;;  %v838_v26 = vld [vmem:[%s13013_s20 + $0x618] sm:$0xff] }
 0x2de   : > { %4218 = vmatprep.subr.bf16.mxu1 %v10215_v42  ;;  %v9889_v42 = vcombine.high %v798_v35, %v802_v36  ;;  %v842_v27 = vld [vmem:[%s13013_s20 + $0x638] sm:$0xff] }
 0x2df   : > { %4178 = vmatpush1.bf16.msra.mxu0 %v10086_v46  ;;  %v9769_v46 = vcombine.high %v678_v43, %v682_v44  ;;  %v718_v33 = vld [vmem:[%s13013_s20 + $0x258] sm:$0xff] }
 0x2e0   : > { %4179 = vmatprep.subr.bf16.mxu0 %v10095_v23  ;;  %v686_v23 = vld [vmem:[%s13013_s20 + $0x158] sm:$0xff] }
 0x2e1   : > { %4219 = vmatpush1.bf16.msra.mxu1 %v10214_v47  ;;  %v722_v34 = vld [vmem:[%s13013_s20 + $0x278] sm:$0xff] }
 0x2e2   : > { %4220 = vmatprep.subr.bf16.mxu1 %v10223_v48  ;;  %v690_v48 = vld [vmem:[%s13013_s20 + $0x178] sm:$0xff] }
 0x2e3   : > { %4180 = vmatpush1.bf16.msra.mxu0 %v10094_v52  ;;  %v9777_v52 = vcombine.high %v686_v23, %v690_v48  ;;  %v9776_v61 = vcombine.low %v686_v23, %v690_v48  ;;  %v726_v43 = vld [vmem:[%s13013_s20 + $0x298] sm:$0xff] }
 0x2e4   : > { %4181 = vmatprep.subr.bf16.mxu0 %v10103_v53  ;;  %v694_v53 = vld [vmem:[%s13013_s20 + $0x198] sm:$0xff] }
 0x2e5   : > { %4221 = vmatpush1.bf16.msra.mxu1 %v10222_v10  ;;  %v9905_v10 = vcombine.high %v814_v6, %v818_v49  ;;  %v730_v44 = vld [vmem:[%s13013_s20 + $0x2b8] sm:$0xff] }
 0x2e6   : > { %4222 = vmatprep.subr.bf16.mxu1 %v10231_v56  ;;  %v698_v56 = vld [vmem:[%s13013_s20 + $0x1b8] sm:$0xff] }
 0x2e7   : > { %4182 = vmatpush1.bf16.msra.mxu0 %v10102_v63  ;;  %v9785_v63 = vcombine.high %v694_v53, %v698_v56  ;;  %v9784_v13 = vcombine.low %v694_v53, %v698_v56  ;;  %v734_v23 = vld [vmem:[%s13013_s20 + $0x2d8] sm:$0xff] }
 0x2e8   : > { %4183 = vmatprep.subr.bf16.mxu0 %v10111_v1  ;;  %v9913_v1 = vcombine.high %v822_v57, %v826_v58  ;;  %v738_v48 = vld [vmem:[%s13013_s20 + $0x2f8] sm:$0xff] }
 0x2e9   : > { %4223 = vmatpush1.bf16.msra.mxu1 %v10230_v0  ;;  %v862_v6 = vld [vmem:[%s13013_s20 + $0x6d8] sm:$0xff] }
 0x2ea   : > { %4224 = vmatprep.subr.bf16.mxu1 %v10239_v2  ;;  %v702_v2 = vld [vmem:[%s13013_s20 + $0x1d8] sm:$0xff] }
 0x2eb   : > { %4184 = vmatpush1.bf16.msra.mxu0 %v10110_v8  ;;  %v834_v8 = vld [vmem:[%s13013_s20 + $0x5f8] sm:$0xff] }
 0x2ec   : > { %4235 = vmatprep.subr.bf16.mxu0 %v9737_v11  ;;  %v866_v49 = vld [vmem:[%s13013_s20 + $0x6f8] sm:$0xff] }
 0x2ed   : > { %4225 = vmatpush1.bf16.msra.mxu1 %v10238_v9  ;;  %v742_v53 = vld [vmem:[%s13013_s20 + $0x318] sm:$0xff] }
 0x2ee   : > { %4276 = vmatprep.subr.bf16.mxu1 %v9865_v12  ;;  %4186 = vmatmul.mubr.bf16.vlgmr.msra.gmra.mrb[20].mxu0 %v13229_v37  ;;  %v746_v56 = vld [vmem:[%s13013_s20 + $0x338] sm:$0xff] }
 0x2ef   : > { %4236 = vmatpush1.bf16.msra.mxu0 %v9736_v18  ;;  %4267 = vmatprep.mubr.bf16.mxu0 %v13089_v59  ;;  %v810_v59 = vld [vmem:[%s13013_s20 + $0x538] sm:$0xff]  ;;  %v9912_v18 = vcombine.low %v822_v57, %v826_v58 }
 0x2f0   : > { %4227 = vmatmul.mubr.bf16.vlgmr.msra.gmra.mrb[20].mxu1 %v13235_v40  ;;  %4237 = vmatprep.subr.bf16.mxu0 %v9745_v22  ;;  %v9897_v47 = vcombine.high %v806_v45, %v810_v59  ;;  %v9896_v51 = vcombine.low %v806_v45, %v810_v59  ;;  %v854_v45 = vld [vmem:[%s13013_s20 + $0x698] sm:$0xff] }
 0x2f1   : > { %4277 = vmatpush1.bf16.msra.mxu1 %v9864_v19  ;;  %4308 = vmatprep.mubr.bf16.mxu1 %v13093_v60  ;;  %v9888_v60 = vcombine.low %v798_v35, %v802_v36  ;;  %v9793_v19 = vcombine.high %v702_v2, %v706_v3  ;;  %v846_v35 = vld [vmem:[%s13013_s20 + $0x658] sm:$0xff] }
 0x2f2   : > { %4278 = vmatprep.subr.bf16.mxu1 %v9873_v24  ;;  %v9921_v24 = vcombine.high %v830_v7, %v834_v8  ;;  %v850_v36 = vld [vmem:[%s13013_s20 + $0x678] sm:$0xff] }
 0x2f3   : > { %4238 = vmatpush1.bf16.msra.mxu0 %v9744_v55  ;;  %v9792_v55 = vcombine.low %v702_v2, %v706_v3  ;;  %v858_v59 = vld [vmem:[%s13013_s20 + $0x6b8] sm:$0xff] }
 0x2f4   : > { %4239 = vmatprep.subr.bf16.mxu0 %v9753_v31  ;;  %v9801_v31 = vcombine.high %v710_v25, %v714_v54  ;;  %v870_v57 = vld [vmem:[%s13013_s20 + $0x718] sm:$0xff] }
 0x2f5   : > { %4279 = vmatpush1.bf16.msra.mxu1 %v9872_v29  ;;  %v9920_v29 = vcombine.low %v830_v7, %v834_v8  ;;  %v874_v58 = vld [vmem:[%s13013_s20 + $0x738] sm:$0xff] }
 0x2f6   : > { %4280 = vmatprep.subr.bf16.mxu1 %v9881_v32  ;;  %v9929_v32 = vcombine.high %v838_v26, %v842_v27  ;;  %v754_v2 = vld [vmem:[%s13013_s20 + $0x378] sm:$0xff]  ;;  %v9960_v7 = vcombine.low %v870_v57, %v874_v58 }
 0x2f7   : > { %4240 = vmatpush1.bf16.msra.mxu0 %v9752_v38  ;;  %v9800_v38 = vcombine.low %v710_v25, %v714_v54  ;;  %v878_v3 = vld [vmem:[%s13013_s20 + $0x758] sm:$0xff] }
 0x2f8   : > { %4241 = vmatprep.subr.bf16.mxu0 %v9761_v41  ;;  %v9809_v41 = vcombine.high %v718_v33, %v722_v34  ;;  %v766_v25 = vld [vmem:[%s13013_s20 + $0x3d8] sm:$0xff] }
 0x2f9   : > { %4281 = vmatpush1.bf16.msra.mxu1 %v9880_v39  ;;  %v9928_v39 = vcombine.low %v838_v26, %v842_v27  ;;  %v770_v54 = vld [vmem:[%s13013_s20 + $0x3f8] sm:$0xff] }
 0x2fa   : > { %4282 = vmatprep.subr.bf16.mxu1 %v9889_v42  ;;  %v9937_v42 = vcombine.high %v846_v35, %v850_v36  ;;  %v894_v26 = vld [vmem:[%s13013_s20 + $0x7d8] sm:$0xff] }
 0x2fb   : > { %4242 = vmatpush1.bf16.msra.mxu0 %v9760_v20  ;;  %v9808_v20 = vcombine.low %v718_v33, %v722_v34  ;;  %v898_v27 = vld [vmem:[%s13013_s20 + $0x7f8] sm:$0xff] }
 0x2fc   : > { %4243 = vmatprep.subr.bf16.mxu0 %v9769_v46  ;;  %v9817_v46 = vcombine.high %v726_v43, %v730_v44  ;;  %v902_v33 = vld [vmem:[%s13013_s20 + $0x818] sm:$0xff] }
 0x2fd   : > { %4283 = vmatpush1.bf16.msra.mxu1 %v9888_v60  ;;  %v9936_v60 = vcombine.low %v846_v35, %v850_v36  ;;  %v906_v34 = vld [vmem:[%s13013_s20 + $0x838] sm:$0xff] }
 0x2fe   : > { %4284 = vmatprep.subr.bf16.mxu1 %v9897_v47  ;;  %v9945_v47 = vcombine.high %v854_v45, %v858_v59  ;;  %v1030_v35 = vld [vmem:[%s13013_s20 + $0xc18] sm:$0xff] }
 0x2ff   : > { %4244 = vmatpush1.bf16.msra.mxu0 %v9768_v50  ;;  %v9816_v50 = vcombine.low %v726_v43, %v730_v44  ;;  %v1034_v36 = vld [vmem:[%s13013_s20 + $0xc38] sm:$0xff] }
 0x300   : > { %4245 = vmatprep.subr.bf16.mxu0 %v9777_v52  ;;  %v9825_v52 = vcombine.high %v734_v23, %v738_v48  ;;  %v910_v43 = vld [vmem:[%s13013_s20 + $0x858] sm:$0xff] }
 0x301   : > { %4285 = vmatpush1.bf16.msra.mxu1 %v9896_v51  ;;  %v3941_v0 = vpop.f32.mrb[8].mxu0  ;;  %v9944_v51 = vcombine.low %v854_v45, %v858_v59  ;;  %v914_v44 = vld [vmem:[%s13013_s20 + $0x878] sm:$0xff] }
 0x302   : > { %4286 = vmatprep.subr.bf16.mxu1 %v9905_v10  ;;  %v3943_v5 = vpop.f32.mrb[9].mxu0  ;;  %v9953_v10 = vcombine.high %v862_v6, %v866_v49  ;;  %v1038_v45 = vld [vmem:[%s13013_s20 + $0xc58] sm:$0xff] }
 0x303   : > { %v3982_v4 = vpop.f32.mrb[8].mxu1  ;;  %v3945_v12 = vpop.f32.mrb[10].mxu0  ;;  %4246 = vmatpush1.bf16.msra.mxu0 %v9776_v61  ;;  %v9824_v61 = vcombine.low %v734_v23, %v738_v48  ;;  %v1042_v59 = vld [vmem:[%s13013_s20 + $0xc78] sm:$0xff] }
 0x304   : > { %v13543_v9 = vadd.f32 %v3982_v4, %v3941_v0  ;;  %v3984_v11 = vpop.f32.mrb[9].mxu1  ;;  %v3946_v16 = vpop.f32.mrb[11].mxu0  ;;  %4247 = vmatprep.subr.bf16.mxu0 %v9785_v63  ;;  %v9833_v63 = vcombine.high %v742_v53, %v746_v56  ;;  %v9961_v0 = vcombine.high %v870_v57, %v874_v58  ;;  %v882_v4 = vld [vmem:[%s13013_s20 + $0x778] sm:$0xff] }
 0x305   : > { %v13545_v14 = vadd.f32 %v3984_v11, %v3943_v5  ;;  %v3986_v15 = vpop.f32.mrb[10].mxu1  ;;  %4287 = vmatpush1.bf16.msra.mxu1 %v9904_v62  ;;  %v9952_v62 = vcombine.low %v862_v6, %v866_v49  ;;  %v9832_v5 = vcombine.low %v742_v53, %v746_v56  ;;  %v9969_v11 = vcombine.high %v878_v3, %v882_v4  ;;  %v758_v12 = vld [vmem:[%s13013_s20 + $0x398] sm:$0xff] }
 0x306   : > { %v3987_v22 = vpop.f32.mrb[11].mxu1  ;;  %4288 = vmatprep.subr.bf16.mxu1 %v9913_v1  ;;  %v750_v1 = vld [vmem:[%s13013_s20 + $0x358] sm:$0xff] }
 0x307   : > { %4248 = vmatpush1.bf16.msra.mxu0 %v9784_v13  ;;  %v9841_v8 = vcombine.high %v750_v1, %v754_v2  ;;  %v762_v13 = vld [vmem:[%s13013_s20 + $0x3b8] sm:$0xff] }
 0x308   : > { %4249 = vmatprep.subr.bf16.mxu0 %v9793_v19  ;;  %v886_v15 = vld [vmem:[%s13013_s20 + $0x798] sm:$0xff]  ;;  %v9968_v19 = vcombine.low %v878_v3, %v882_v4  ;;  %v9849_v22 = vcombine.high %v758_v12, %v762_v13 }
 0x309   : > { %4289 = vmatpush1.bf16.msra.mxu1 %v9912_v18  ;;  %v890_v16 = vld [vmem:[%s13013_s20 + $0x7b8] sm:$0xff]  ;;  %v9840_v18 = vcombine.low %v750_v1, %v754_v2 }
 0x30a   : > { %4290 = vmatprep.subr.bf16.mxu1 %v9921_v24  ;;  %v9977_v24 = vcombine.high %v886_v15, %v890_v16  ;;  %v918_v23 = vld [vmem:[%s13013_s20 + $0x898] sm:$0xff] }
 0x30b   : > { %4250 = vmatpush1.bf16.msra.mxu0 %v9792_v55  ;;  %v9848_v55 = vcombine.low %v758_v12, %v762_v13  ;;  %v922_v48 = vld [vmem:[%s13013_s20 + $0x8b8] sm:$0xff] }
 0x30c   : > { %4251 = vmatprep.subr.bf16.mxu0 %v9801_v31  ;;  %v9857_v31 = vcombine.high %v766_v25, %v770_v54  ;;  %v1046_v6 = vld [vmem:[%s13013_s20 + $0xc98] sm:$0xff] }
 0x30d   : > { %4291 = vmatpush1.bf16.msra.mxu1 %v9920_v29  ;;  %v9976_v29 = vcombine.low %v886_v15, %v890_v16  ;;  %v1050_v49 = vld [vmem:[%s13013_s20 + $0xcb8] sm:$0xff] }
 0x30e   : > { %4292 = vmatprep.subr.bf16.mxu1 %v9929_v32  ;;  %v9985_v32 = vcombine.high %v894_v26, %v898_v27  ;;  %v926_v53 = vld [vmem:[%s13013_s20 + $0x8d8] sm:$0xff]  ;;  %v10136_v58 = vcombine.low %v1046_v6, %v1050_v49 }
 0x30f   : > { %4252 = vmatpush1.bf16.msra.mxu0 %v9800_v38  ;;  %v9856_v38 = vcombine.low %v766_v25, %v770_v54  ;;  %v930_v56 = vld [vmem:[%s13013_s20 + $0x8f8] sm:$0xff] }
 0x310   : > { %4253 = vmatprep.subr.bf16.mxu0 %v9809_v41  ;;  %v9993_v41 = vcombine.high %v902_v33, %v906_v34  ;;  %v1058_v57 = vld [vmem:[%s13013_s20 + $0xcf8] sm:$0xff]  ;;  %v10016_v2 = vcombine.low %v926_v53, %v930_v56 }
 0x311   : > { %4293 = vmatpush1.bf16.msra.mxu1 %v9928_v39  ;;  %v9984_v39 = vcombine.low %v894_v26, %v898_v27  ;;  %v1062_v1 = vld [vmem:[%s13013_s20 + $0xd18] sm:$0xff] }
 0x312   : > { %4294 = vmatprep.subr.bf16.mxu1 %v9937_v42  ;;  %v10121_v42 = vcombine.high %v1030_v35, %v1034_v36 }
 0x313   : > { %4254 = vmatpush1.bf16.msra.mxu0 %v9808_v20  ;;  %v9992_v20 = vcombine.low %v902_v33, %v906_v34 }
 0x314   : > { %4255 = vmatprep.subr.bf16.mxu0 %v9817_v46  ;;  %v10001_v46 = vcombine.high %v910_v43, %v914_v44 }
 0x315   : > { %4295 = vmatpush1.bf16.msra.mxu1 %v9936_v60  ;;  %v10120_v60 = vcombine.low %v1030_v35, %v1034_v36  ;;  %v1086_v35 = vld [vmem:[%s13013_s20 + $0xdd8] sm:$0xff] }
 0x316   : > { %4296 = vmatprep.subr.bf16.mxu1 %v9945_v47  ;;  %v10129_v47 = vcombine.high %v1038_v45, %v1042_v59  ;;  %v1090_v36 = vld [vmem:[%s13013_s20 + $0xdf8] sm:$0xff] }
 0x317   : > { %4256 = vmatpush1.bf16.msra.mxu0 %v9816_v50  ;;  %v10000_v50 = vcombine.low %v910_v43, %v914_v44 }
 0x318   : > { %4257 = vmatprep.subr.bf16.mxu0 %v9825_v52  ;;  %v10009_v52 = vcombine.high %v918_v23, %v922_v48 }
 0x319   : > { %4297 = vmatpush1.bf16.msra.mxu1 %v9944_v51  ;;  %v10128_v51 = vcombine.low %v1038_v45, %v1042_v59  ;;  %v634_v45 = vld [vmem:[#allocation2 + $0x18] sm:$0xff] }
 0x31a   : > { %4298 = vmatprep.subr.bf16.mxu1 %v9953_v10  ;;  %v10137_v10 = vcombine.high %v1046_v6, %v1050_v49  ;;  %v1094_v49 = vld [vmem:[%s13013_s20 + $0xe18] sm:$0xff] }
 0x31b   : > { %4258 = vmatpush1.bf16.msra.mxu0 %v9824_v61  ;;  %v10017_v61 = vcombine.high %v926_v53, %v930_v56 }
 0x31c   : > { %4259 = vmatprep.subr.bf16.mxu0 %v9833_v63  ;;  %v934_v63 = vld [vmem:[%s13013_s20 + $0x918] sm:$0xff] }
 0x31d   : > { %4299 = vmatpush1.bf16.msra.mxu1 %v9952_v62 }
 0x31e   : > { %4300 = vmatprep.subr.bf16.mxu1 %v9961_v0  ;;  %v938_v0 = vld [vmem:[%s13013_s20 + $0x938] sm:$0xff] }
 0x31f   : > { %4260 = vmatpush1.bf16.msra.mxu0 %v9832_v5  ;;  %v10025_v3 = vcombine.high %v934_v63, %v938_v0  ;;  %v942_v5 = vld [vmem:[%s13013_s20 + $0x958] sm:$0xff]  ;;  %v10024_v12 = vcombine.low %v934_v63, %v938_v0 }
 0x320   : > { %4261 = vmatprep.subr.bf16.mxu0 %v9841_v8  ;;  %v1070_v8 = vld [vmem:[%s13013_s20 + $0xd58] sm:$0xff] }
 0x321   : > { %4301 = vmatpush1.bf16.msra.mxu1 %v9960_v7  ;;  %v946_v7 = vld [vmem:[%s13013_s20 + $0x978] sm:$0xff] }
 0x322   : > { %4302 = vmatprep.subr.bf16.mxu1 %v9969_v11  ;;  %v1074_v11 = vld [vmem:[%s13013_s20 + $0xd78] sm:$0xff]  ;;  %v10033_v15 = vcombine.high %v942_v5, %v946_v7  ;;  %v10032_v25 = vcombine.low %v942_v5, %v946_v7 }
 0x323   : > { %4262 = vmatpush1.bf16.msra.mxu0 %v9840_v18  ;;  %v10161_v16 = vcombine.high %v1070_v8, %v1074_v11  ;;  %v950_v18 = vld [vmem:[%s13013_s20 + $0x998] sm:$0xff]  ;;  %v10160_v54 = vcombine.low %v1070_v8, %v1074_v11 }
 0x324   : > { %4263 = vmatprep.subr.bf16.mxu0 %v9849_v22  ;;  %v1078_v22 = vld [vmem:[%s13013_s20 + $0xd98] sm:$0xff] }
 0x325   : > { %4303 = vmatpush1.bf16.msra.mxu1 %v9968_v19  ;;  %v954_v19 = vld [vmem:[%s13013_s20 + $0x9b8] sm:$0xff] }
 0x326   : > { %4304 = vmatprep.subr.bf16.mxu1 %v9977_v24  ;;  %v1082_v24 = vld [vmem:[%s13013_s20 + $0xdb8] sm:$0xff]  ;;  %v10041_v26 = vcombine.high %v950_v18, %v954_v19  ;;  %v10040_v43 = vcombine.low %v950_v18, %v954_v19 }
 0x327   : > { %4264 = vmatpush1.bf16.msra.mxu0 %v9848_v55  ;;  %v10169_v55 = vcombine.high %v1078_v22, %v1082_v24  ;;  %v990_v8 = vld [vmem:[%s13013_s20 + $0xad8] sm:$0xff] }
 0x328   : > { %4265 = vmatprep.subr.bf16.mxu0 %v9857_v31  ;;  %v962_v31 = vld [vmem:[%s13013_s20 + $0x9f8] sm:$0xff] }
 0x329   : > { %4305 = vmatpush1.bf16.msra.mxu1 %v9976_v29  ;;  %v958_v29 = vld [vmem:[%s13013_s20 + $0x9d8] sm:$0xff] }
 0x32a   : > { %4306 = vmatprep.subr.bf16.mxu1 %v9985_v32  ;;  %v994_v11 = vld [vmem:[%s13013_s20 + $0xaf8] sm:$0xff] }
 0x32b   : > { %4266 = vmatpush1.bf16.msra.mxu0 %v9856_v38  ;;  %v633_v38 = vld [vmem:[#allocation2 + $0x10] sm:$0xff]  ;;  %v10081_v18 = vcombine.high %v990_v8, %v994_v11 }
 0x32c   : > { %4317 = vmatprep.subr.bf16.mxu0 %v9993_v41 }
 0x32d   : > { %4307 = vmatpush1.bf16.msra.mxu1 %v9984_v39 }
 0x32e   : > { %4358 = vmatprep.subr.bf16.mxu1 %v10121_v42  ;;  %4268 = vmatmul.mubr.bf16.vlgmr.msra.gmra.mrb[24].mxu0 %v13139_v17  ;;  %v1054_v17 = vld [vmem:[%s13013_s20 + $0xcd8] sm:$0xff] }
 0x32f   : > { %4318 = vmatpush1.bf16.msra.mxu0 %v9992_v20  ;;  %4349 = vmatprep.mubr.bf16.mxu0 %v13157_v28  ;;  %v10145_v62 = vcombine.high %v1054_v17, %v1058_v57  ;;  %v1066_v28 = vld [vmem:[%s13013_s20 + $0xd38] sm:$0xff]  ;;  %v10168_v20 = vcombine.low %v1078_v22, %v1082_v24 }
 0x330   : > { %4309 = vmatmul.mubr.bf16.vlgmr.msra.gmra.mrb[24].mxu1 %v13148_v21  ;;  %4319 = vmatprep.subr.bf16.mxu0 %v10001_v46  ;;  %v10008_v21 = vcombine.low %v918_v23, %v922_v48  ;;  %v10153_v4 = vcombine.high %v1062_v1, %v1066_v28  ;;  %v10152_v13 = vcombine.low %v1062_v1, %v1066_v28  ;;  %v966_v23 = vld [vmem:[%s13013_s20 + $0xa18] sm:$0xff] }
 0x331   : > { %4359 = vmatpush1.bf16.msra.mxu1 %v10120_v60  ;;  %4390 = vmatprep.mubr.bf16.mxu1 %v13164_v30  ;;  %v10144_v30 = vcombine.low %v1054_v17, %v1058_v57  ;;  %v10049_v60 = vcombine.high %v958_v29, %v962_v31  ;;  %v970_v48 = vld [vmem:[%s13013_s20 + $0xa38] sm:$0xff] }
 0x332   : > { %4360 = vmatprep.subr.bf16.mxu1 %v10129_v47  ;;  %v10057_v53 = vcombine.high %v966_v23, %v970_v48  ;;  %v974_v17 = vld [vmem:[%s13013_s20 + $0xa58] sm:$0xff] }
 0x333   : > { %4320 = vmatpush1.bf16.msra.mxu0 %v10000_v50  ;;  %v1098_v50 = vld [vmem:[%s13013_s20 + $0xe38] sm:$0xff] }
 0x334   : > { %4321 = vmatprep.subr.bf16.mxu0 %v10009_v52  ;;  %v10048_v52 = vcombine.low %v958_v29, %v962_v31  ;;  %v10185_v56 = vcombine.high %v1094_v49, %v1098_v50  ;;  %v978_v57 = vld [vmem:[%s13013_s20 + $0xa78] sm:$0xff] }
 0x335   : > { %4361 = vmatpush1.bf16.msra.mxu1 %v10128_v51  ;;  %v10065_v63 = vcombine.high %v974_v17, %v978_v57  ;;  %v982_v1 = vld [vmem:[%s13013_s20 + $0xa98] sm:$0xff] }
 0x336   : > { %4362 = vmatprep.subr.bf16.mxu1 %v10137_v10  ;;  %v10176_v10 = vcombine.low %v1086_v35, %v1090_v36  ;;  %v986_v28 = vld [vmem:[%s13013_s20 + $0xab8] sm:$0xff] }
 0x337   : > { %4322 = vmatpush1.bf16.msra.mxu0 %v10008_v21  ;;  %v1102_v21 = vld [vmem:[%s13013_s20 + $0xe58] sm:$0xff]  ;;  %v10073_v5 = vcombine.high %v982_v1, %v986_v28 }
 0x338   : > { %4323 = vmatprep.subr.bf16.mxu0 %v10017_v61  ;;  %v10056_v61 = vcombine.low %v966_v23, %v970_v48  ;;  %v998_v22 = vld [vmem:[%s13013_s20 + $0xb18] sm:$0xff] }
 0x339   : > { %4363 = vmatpush1.bf16.msra.mxu1 %v10136_v58  ;;  %v1106_v58 = vld [vmem:[%s13013_s20 + $0xe78] sm:$0xff] }
 0x33a   : > { %4364 = vmatprep.subr.bf16.mxu1 %v10145_v62  ;;  %v10184_v62 = vcombine.low %v1094_v49, %v1098_v50  ;;  %v10193_v0 = vcombine.high %v1102_v21, %v1106_v58  ;;  %v1002_v24 = vld [vmem:[%s13013_s20 + $0xb38] sm:$0xff] }
 0x33b   : > { %4324 = vmatpush1.bf16.msra.mxu0 %v10016_v2  ;;  %v1110_v2 = vld [vmem:[%s13013_s20 + $0xe98] sm:$0xff] }
 0x33c   : > { %4325 = vmatprep.subr.bf16.mxu0 %v10025_v3  ;;  %v10064_v3 = vcombine.low %v974_v17, %v978_v57  ;;  %v1006_v31 = vld [vmem:[%s13013_s20 + $0xb58] sm:$0xff] }
 0x33d   : > { %4365 = vmatpush1.bf16.msra.mxu1 %v10144_v30  ;;  %v1114_v30 = vld [vmem:[%s13013_s20 + $0xeb8] sm:$0xff] }
 0x33e   : > { %4366 = vmatprep.subr.bf16.mxu1 %v10153_v4  ;;  %v10192_v4 = vcombine.low %v1102_v21, %v1106_v58  ;;  %v10201_v7 = vcombine.high %v1110_v2, %v1114_v30 }
 0x33f   : > { %4326 = vmatpush1.bf16.msra.mxu0 %v10024_v12  ;;  %v1118_v12 = vld [vmem:[%s13013_s20 + $0xed8] sm:$0xff] }
 0x340   : > { %4327 = vmatprep.subr.bf16.mxu0 %v10033_v15  ;;  %v10072_v15 = vcombine.low %v982_v1, %v986_v28 }
 0x341   : > { %4367 = vmatpush1.bf16.msra.mxu1 %v10152_v13  ;;  %v4023_v27 = vpop.f32.mrb[12].mxu0  ;;  %v1122_v13 = vld [vmem:[%s13013_s20 + $0xef8] sm:$0xff] }
 0x342   : > { %4368 = vmatprep.subr.bf16.mxu1 %v10161_v16  ;;  %v4024_v32 = vadd.f32 %v4023_v27, %v13543_v9  ;;  %v4025_v34 = vpop.f32.mrb[13].mxu0  ;;  %v10200_v16 = vcombine.low %v1110_v2, %v1114_v30  ;;  %v10209_v19 = vcombine.high %v1118_v12, %v1122_v13  ;;  %v10208_v27 = vcombine.low %v1118_v12, %v1122_v13  ;;  %v635_v2 = vld [vmem:[#allocation2 + $0x20] sm:$0xff] }
 0x343   : > { %v4064_v33 = vpop.f32.mrb[12].mxu1  ;;  %v4026_v39 = vadd.f32 %v4025_v34, %v13545_v14  ;;  %v4027_v42 = vpop.f32.mrb[14].mxu0  ;;  %4328 = vmatpush1.bf16.msra.mxu0 %v10032_v25  ;;  %v10177_v14 = vcombine.high %v1086_v35, %v1090_v36  ;;  %v1126_v25 = vld [vmem:[%s13013_s20 + $0xf18] sm:$0xff]  ;;  %v10088_v35 = vcombine.low %v998_v22, %v1002_v24 }
 0x344   : > { %v4066_v41 = vpop.f32.mrb[13].mxu1  ;;  %v4065_v44 = vadd.f32 %v4064_v33, %v4024_v32  ;;  %v4028_v9 = vpop.f32.mrb[15].mxu0  ;;  %4329 = vmatprep.subr.bf16.mxu0 %v10041_v26  ;;  %v10080_v26 = vcombine.low %v990_v8, %v994_v11  ;;  %v1010_v32 = vld [vmem:[%s13013_s20 + $0xb78] sm:$0xff] }
 0x345   : > { %v4068_v59 = vpop.f32.mrb[14].mxu1  ;;  %4369 = vmatpush1.bf16.msra.mxu1 %v10160_v54  ;;  %v4067_v46 = vadd.f32 %v4066_v41, %v4026_v39  ;;  %v1130_v54 = vld [vmem:[%s13013_s20 + $0xf38] sm:$0xff] }
 0x346   : > { %v4069_v47 = vpop.f32.mrb[15].mxu1  ;;  %4370 = vmatprep.subr.bf16.mxu1 %v10169_v55  ;;  %v4401_v6 = vadd.f32 %v4065_v44, %v633_v38  ;;  %v10089_v55 = vcombine.high %v998_v22, %v1002_v24  ;;  %v10217_v29 = vcombine.high %v1126_v25, %v1130_v54  ;;  %v1134_v33 = vld [vmem:[%s13013_s20 + $0xf58] sm:$0xff]  ;;  %v10216_v36 = vcombine.low %v1126_v25, %v1130_v54 }
 0x347   : > { %v4402_v51 = vadd.f32 %v4067_v46, %v634_v45  ;;  %4330 = vmatpush1.bf16.msra.mxu0 %v10040_v43  ;;  %v1138_v34 = vld [vmem:[%s13013_s20 + $0xf78] sm:$0xff]  ;;  %v10097_v38 = vcombine.high %v1006_v31, %v1010_v32  ;;  %v10096_v45 = vcombine.low %v1006_v31, %v1010_v32 }
 0x348   : > { %4409 = vst [vmem:[#allocation2 + $0x10] sm:$0xff] %v4401_v6  ;;  %4331 = vmatprep.subr.bf16.mxu0 %v10049_v60  ;;  %v10225_v39 = vcombine.high %v1134_v33, %v1138_v34  ;;  %v1014_v41 = vld [vmem:[%s13013_s20 + $0xb98] sm:$0xff]  ;;  %v10224_v59 = vcombine.low %v1134_v33, %v1138_v34  ;;  %v637_v33 = vld [vmem:[#allocation2 + $0x30] sm:$0xff] }
 0x349   : > { %4371 = vmatpush1.bf16.msra.mxu1 %v10168_v20  ;;  %4410 = vst [vmem:[#allocation2 + $0x18] sm:$0xff] %v4402_v51  ;;  %v1018_v42 = vld [vmem:[%s13013_s20 + $0xbb8] sm:$0xff] }
 0x34a   : > { %4372 = vmatprep.subr.bf16.mxu1 %v10177_v14  ;;  %v1142_v43 = vld [vmem:[%s13013_s20 + $0xf98] sm:$0xff]  ;;  %v10105_v9 = vcombine.high %v1014_v41, %v1018_v42  ;;  %v10104_v23 = vcombine.low %v1014_v41, %v1018_v42 }
 0x34b   : > { %4332 = vmatpush1.bf16.msra.mxu0 %v10048_v52  ;;  %v1146_v44 = vld [vmem:[%s13013_s20 + $0xfb8] sm:$0xff] }
 0x34c   : > { %4333 = vmatprep.subr.bf16.mxu0 %v10057_v53  ;;  %v10233_v20 = vcombine.high %v1142_v43, %v1146_v44  ;;  %v1022_v60 = vld [vmem:[%s13013_s20 + $0xbd8] sm:$0xff]  ;;  %v10232_v48 = vcombine.low %v1142_v43, %v1146_v44 }
 0x34d   : > { %4373 = vmatpush1.bf16.msra.mxu1 %v10176_v10  ;;  %v1026_v46 = vld [vmem:[%s13013_s20 + $0xbf8] sm:$0xff] }
 0x34e   : > { %4374 = vmatprep.subr.bf16.mxu1 %v10185_v56  ;;  %v1150_v47 = vld [vmem:[%s13013_s20 + $0xfd8] sm:$0xff]  ;;  %v10113_v6 = vcombine.high %v1022_v60, %v1026_v46  ;;  %v10112_v50 = vcombine.low %v1022_v60, %v1026_v46  ;;  %v11207_v60 = vld [vmem:[#allocation7] ss:$24 sps:$4 sm:$0xff] (!%p10242_p11)  }
 0x34f   : > { %4334 = vmatpush1.bf16.msra.mxu0 %v10056_v61  ;;  %v1154_v14 = vld [vmem:[%s13013_s20 + $0xff8] sm:$0xff]  ;;  %v11208_v46 = vld [vmem:[#allocation7 + $0x8] ss:$24 sps:$4 sm:$0xff] (!%p10242_p11)  }
 0x350   : > { %4335 = vmatprep.subr.bf16.mxu0 %v10065_v63  ;;  %v10241_v49 = vcombine.high %v1150_v47, %v1154_v14  ;;  %v10240_v51 = vcombine.low %v1150_v47, %v1154_v14  ;;  %v11209_v47 = vld [vmem:[#allocation7 + $0x34] ss:$24 sps:$4 sm:$0xff] (!%p10242_p11)  }
 0x351   : > { %4375 = vmatpush1.bf16.msra.mxu1 %v10184_v62  ;;  %v11211_v14 = vld [vmem:[#allocation7 + $0x3c] ss:$24 sps:$4 sm:$0xff] (!%p10242_p11)  }
 0x352   : > { %4376 = vmatprep.subr.bf16.mxu1 %v10193_v0 }
 0x353   : > { %4336 = vmatpush1.bf16.msra.mxu0 %v10064_v3 }
 0x354   : > { %4337 = vmatprep.subr.bf16.mxu0 %v10073_v5 }
 0x355   : > { %4377 = vmatpush1.bf16.msra.mxu1 %v10192_v4 }
 0x356   : > { %4378 = vmatprep.subr.bf16.mxu1 %v10201_v7 }
 0x357   : > { %4338 = vmatpush1.bf16.msra.mxu0 %v10072_v15 }
 0x358   : > { %4339 = vmatprep.subr.bf16.mxu0 %v10081_v18 }
 0x359   : > { %4379 = vmatpush1.bf16.msra.mxu1 %v10200_v16 }
 0x35a   : > { %4380 = vmatprep.subr.bf16.mxu1 %v10209_v19 }
 0x35b   : > { %4340 = vmatpush1.bf16.msra.mxu0 %v10080_v26 }
 0x35c   : > { %4341 = vmatprep.subr.bf16.mxu0 %v10089_v55 }
 0x35d   : > { %4381 = vmatpush1.bf16.msra.mxu1 %v10208_v27 }
 0x35e   : > { %4382 = vmatprep.subr.bf16.mxu1 %v10217_v29 }
 0x35f   : > { %4342 = vmatpush1.bf16.msra.mxu0 %v10088_v35 }
 0x360   : > { %4343 = vmatprep.subr.bf16.mxu0 %v10097_v38 }
 0x361   : > { %4383 = vmatpush1.bf16.msra.mxu1 %v10216_v36 }
 0x362   : > { %4384 = vmatprep.subr.bf16.mxu1 %v10225_v39  ;;  %v638_v39 = vld [vmem:[#allocation2 + $0x38] sm:$0xff] }
 0x363   : > { %4344 = vmatpush1.bf16.msra.mxu0 %v10096_v45 }
 0x364   : > { %4345 = vmatprep.subr.bf16.mxu0 %v10105_v9  ;;  %v11203_v9 = vld [vmem:[#allocation7 + $0x4] ss:$24 sps:$4 sm:$0xff] (!%p10242_p11)  }
 0x365   : > { %4385 = vmatpush1.bf16.msra.mxu1 %v10224_v59 }
 0x366   : > { %4386 = vmatprep.subr.bf16.mxu1 %v10233_v20  ;;  %v11205_v20 = vld [vmem:[#allocation7 + $0xc] ss:$24 sps:$4 sm:$0xff] (!%p10242_p11)  }
 0x367   : > { %4346 = vmatpush1.bf16.msra.mxu0 %v10104_v23  ;;  %v11213_v23 = vld [vmem:[#allocation7 + $0x30] ss:$24 sps:$4 sm:$0xff] (!%p10242_p11)  }
 0x368   : > { %4347 = vmatprep.subr.bf16.mxu0 %v10113_v6  ;;  %v11215_v6 = vld [vmem:[#allocation7 + $0x64] ss:$24 sps:$4 sm:$0xff] (!%p10242_p11)  }
 0x369   : > { %4387 = vmatpush1.bf16.msra.mxu1 %v10232_v48  ;;  %v11214_v48 = vld [vmem:[#allocation7 + $0x38] ss:$24 sps:$4 sm:$0xff] (!%p10242_p11)  }
 0x36a   : > { %4388 = vmatprep.subr.bf16.mxu1 %v10241_v49  ;;  %v11217_v49 = vld [vmem:[#allocation7 + $0x6c] ss:$24 sps:$4 sm:$0xff] (!%p10242_p11)  }
 0x36b   : > { %4348 = vmatpush1.bf16.msra.mxu0 %v10112_v50  ;;  %v11219_v50 = vld [vmem:[#allocation7 + $0x60] ss:$24 sps:$4 sm:$0xff] (!%p10242_p11)  }
 0x36c   : > { %6829 = vmatprep.subr.bf16.mxu0 (!%p10242_p11), %v11203_v9  ;;  %v11285_v9 = vld [vmem:[#allocation7 + $0x270] ss:$24 sps:$4 sm:$0xff] (!%p10242_p11)  }
 0x36d   : > { %4389 = vmatpush1.bf16.msra.mxu1 %v10240_v51  ;;  %v11220_v51 = vld [vmem:[#allocation7 + $0x68] ss:$24 sps:$4 sm:$0xff] (!%p10242_p11)  }
 0x36e   : > { %4350 = vmatmul.mubr.bf16.vlgmr.msra.gmra.mrb[28].mxu0 %v13229_v37  ;;  %6993 = vmatprep.subr.bf16.mxu1 (!%p10242_p11), %v11205_v20  ;;  %v11286_v20 = vld [vmem:[#allocation7 + $0x278] ss:$24 sps:$4 sm:$0xff] (!%p10242_p11)  }
 0x36f   : > { %6830 = vmatpush1.bf16.msra.mxu0 (!%p10242_p11), %v11207_v60 }
 0x370   : > { %4391 = vmatmul.mubr.bf16.vlgmr.msra.gmra.mrb[28].mxu1 %v13235_v40  ;;  %v636_v40 = vld [vmem:[#allocation2 + $0x28] sm:$0xff]  ;;  %6831 = vmatprep.subr.bf16.mxu0 (!%p10242_p11), %v11209_v47  ;;  %v4419_v47 = vld [vmem:[#allocation2] sm:$0xff] (!%p10242_p11) }
 0x371   : > { %6994 = vmatpush1.bf16.msra.mxu1 (!%p10242_p11), %v11208_v46  ;;  %v11287_v46 = vld [vmem:[#allocation7 + $0x2a4] ss:$24 sps:$4 sm:$0xff] (!%p10242_p11)  }
 0x372   : > { %6995 = vmatprep.subr.bf16.mxu1 (!%p10242_p11), %v11211_v14  ;;  %v11289_v14 = vld [vmem:[#allocation7 + $0x2ac] ss:$24 sps:$4 sm:$0xff] (!%p10242_p11)  }
 0x373   : > { %6832 = vmatpush1.bf16.msra.mxu0 (!%p10242_p11), %v11213_v23  ;;  %v11291_v23 = vld [vmem:[#allocation7 + $0x2a0] ss:$24 sps:$4 sm:$0xff] (!%p10242_p11)  }
 0x374   : > { %6833 = vmatprep.subr.bf16.mxu0 (!%p10242_p11), %v11215_v6  ;;  %v11292_v6 = vld [vmem:[#allocation7 + $0x2a8] ss:$24 sps:$4 sm:$0xff] (!%p10242_p11)  }
 0x375   : > { %6996 = vmatpush1.bf16.msra.mxu1 (!%p10242_p11), %v11214_v48 }
 0x376   : > { %6997 = vmatprep.subr.bf16.mxu1 (!%p10242_p11), %v11217_v49  ;;  %v11293_v49 = vld [vmem:[#allocation7 + $0x2d4] ss:$24 sps:$4 sm:$0xff] (!%p10242_p11)  }
 0x377   : > { %6834 = vmatpush1.bf16.msra.mxu0 (!%p10242_p11), %v11219_v50  ;;  %v11295_v50 = vld [vmem:[#allocation7 + $0x2dc] ss:$24 sps:$4 sm:$0xff] (!%p10242_p11)  }
 0x379   : > { %6998 = vmatpush1.bf16.msra.mxu1 (!%p10242_p11), %v11220_v51  ;;  %v11297_v51 = vld [vmem:[#allocation7 + $0x2d0] ss:$24 sps:$4 sm:$0xff] (!%p10242_p11)  }
 0x381   : > { %v4105_v52 = vpop.f32.mrb[16].mxu0 }
 0x382   : > { %v4107_v53 = vpop.f32.mrb[17].mxu0 }
 0x383   : > { %v4146_v10 = vpop.f32.mrb[16].mxu1  ;;  %v4109_v57 = vpop.f32.mrb[18].mxu0 }
 0x384   : > { %v4147_v56 = vadd.f32 %v4146_v10, %v4105_v52  ;;  %v4148_v17 = vpop.f32.mrb[17].mxu1  ;;  %v4110_v61 = vpop.f32.mrb[19].mxu0  ;;  %v11221_v52 = vld [vmem:[#allocation7 + $0x94] ss:$24 sps:$4 sm:$0xff] (!%p10242_p11)  }
 0x385   : > { %v4149_v21 = vadd.f32 %v4148_v17, %v4107_v53  ;;  %v4150_v58 = vpop.f32.mrb[18].mxu1  ;;  %v11223_v10 = vld [vmem:[#allocation7 + $0x9c] ss:$24 sps:$4 sm:$0xff] (!%p10242_p11)   ;;  %v11225_v53 = vld [vmem:[#allocation7 + $0x90] ss:$24 sps:$4 sm:$0xff] (!%p10242_p11)   ;;  %6835 = vmatprep.subr.bf16.mxu0 (!%p10242_p11), %v11221_v52 }
 0x386   : > { %v4151_v62 = vpop.f32.mrb[19].mxu1  ;;  %v11227_v17 = vld [vmem:[#allocation7 + $0xc4] ss:$24 sps:$4 sm:$0xff] (!%p10242_p11)   ;;  %6999 = vmatprep.subr.bf16.mxu1 (!%p10242_p11), %v11223_v10  ;;  %v11232_v58 = vld [vmem:[#allocation7 + $0xc8] ss:$24 sps:$4 sm:$0xff] (!%p10242_p11)   ;;  %6836 = vmatpush1.bf16.msra.mxu0 (!%p10242_p11), %v11225_v53 }
 0x387   : > { %v11229_v57 = vld [vmem:[#allocation7 + $0xcc] ss:$24 sps:$4 sm:$0xff] (!%p10242_p11)   ;;  %6837 = vmatprep.subr.bf16.mxu0 (!%p10242_p11), %v11227_v17  ;;  %v11235_v62 = vld [vmem:[#allocation7 + $0xfc] ss:$24 sps:$4 sm:$0xff] (!%p10242_p11)   ;;  %v11298_v10 = vld [vmem:[#allocation7 + $0x2d8] ss:$24 sps:$4 sm:$0xff] (!%p10242_p11)  }
 0x388   : > { %v11233_v61 = vld [vmem:[#allocation7 + $0xf4] ss:$24 sps:$4 sm:$0xff] (!%p10242_p11)   ;;  %v11301_v53 = vld [vmem:[#allocation7 + $0x304] ss:$24 sps:$4 sm:$0xff] (!%p10242_p11)   ;;  %v11299_v17 = vld [vmem:[#allocation7 + $0x300] ss:$24 sps:$4 sm:$0xff] (!%p10242_p11)  }
 0x3c1   : > { %v4187_v63 = vpop.f32.mrb[20].mxu0 }
 0x3c2   : > { %v4188_v0 = vadd.f32 %v4187_v63, %v4147_v56  ;;  %v4189_v28 = vpop.f32.mrb[21].mxu0  ;;  %v11226_v56 = vld [vmem:[#allocation7 + $0x98] ss:$24 sps:$4 sm:$0xff] (!%p10242_p11)  }
 0x3c3   : > { %v4228_v1 = vpop.f32.mrb[20].mxu1  ;;  %v4190_v30 = vadd.f32 %v4189_v28, %v4149_v21  ;;  %v4191_v37 = vpop.f32.mrb[22].mxu0  ;;  %v11231_v21 = vld [vmem:[#allocation7 + $0xc0] ss:$24 sps:$4 sm:$0xff] (!%p10242_p11)   ;;  %7000 = vmatpush1.bf16.msra.mxu1 (!%p10242_p11), %v11226_v56  ;;  %v11237_v63 = vld [vmem:[#allocation7 + $0xf0] ss:$24 sps:$4 sm:$0xff] (!%p10242_p11)  }
 0x3c4   : > { %v4230_v3 = vpop.f32.mrb[21].mxu1  ;;  %v4229_v4 = vadd.f32 %v4228_v1, %v4188_v0  ;;  %v4192_v7 = vpop.f32.mrb[23].mxu0  ;;  %7001 = vmatprep.subr.bf16.mxu1 (!%p10242_p11), %v11229_v57  ;;  %6838 = vmatpush1.bf16.msra.mxu0 (!%p10242_p11), %v11231_v21  ;;  %v11238_v0 = vld [vmem:[#allocation7 + $0xf8] ss:$24 sps:$4 sm:$0xff] (!%p10242_p11)   ;;  %v11239_v1 = vld [vmem:[#allocation7 + $0x124] ss:$24 sps:$4 sm:$0xff] (!%p10242_p11)  }
 0x3c5   : > { %v4232_v5 = vpop.f32.mrb[22].mxu1  ;;  %v4231_v8 = vadd.f32 %v4230_v3, %v4190_v30  ;;  %6839 = vmatprep.subr.bf16.mxu0 (!%p10242_p11), %v11233_v61  ;;  %v11241_v28 = vld [vmem:[#allocation7 + $0x12c] ss:$24 sps:$4 sm:$0xff] (!%p10242_p11)   ;;  %v11244_v30 = vld [vmem:[#allocation7 + $0x128] ss:$24 sps:$4 sm:$0xff] (!%p10242_p11)  }
 0x3c6   : > { %v4233_v11 = vpop.f32.mrb[23].mxu1  ;;  %v4403_v12 = vadd.f32 %v4229_v4, %v635_v2  ;;  %v11243_v2 = vld [vmem:[#allocation7 + $0x120] ss:$24 sps:$4 sm:$0xff] (!%p10242_p11)   ;;  %v11245_v3 = vld [vmem:[#allocation7 + $0x154] ss:$24 sps:$4 sm:$0xff] (!%p10242_p11)  }
 0x3c7   : > { %v4404_v13 = vadd.f32 %v4231_v8, %v636_v40  ;;  %7002 = vmatpush1.bf16.msra.mxu1 (!%p10242_p11), %v11232_v58  ;;  %v11247_v37 = vld [vmem:[#allocation7 + $0x15c] ss:$24 sps:$4 sm:$0xff] (!%p10242_p11)   ;;  %v11249_v4 = vld [vmem:[#allocation7 + $0x150] ss:$24 sps:$4 sm:$0xff] (!%p10242_p11)   ;;  %v11253_v7 = vld [vmem:[#allocation7 + $0x18c] ss:$24 sps:$4 sm:$0xff] (!%p10242_p11)  }
 0x3c8   : > { %4411 = vst [vmem:[#allocation2 + $0x20] sm:$0xff] %v4403_v12  ;;  %7003 = vmatprep.subr.bf16.mxu1 (!%p10242_p11), %v11235_v62  ;;  %6840 = vmatpush1.bf16.msra.mxu0 (!%p10242_p11), %v11237_v63  ;;  %v11250_v40 = vld [vmem:[#allocation7 + $0x158] ss:$24 sps:$4 sm:$0xff] (!%p10242_p11)   ;;  %v11251_v5 = vld [vmem:[#allocation7 + $0x184] ss:$24 sps:$4 sm:$0xff] (!%p10242_p11)  }
 0x3c9   : > { %4412 = vst [vmem:[#allocation2 + $0x28] sm:$0xff] %v4404_v13  ;;  %6841 = vmatprep.subr.bf16.mxu0 (!%p10242_p11), %v11239_v1  ;;  %v11255_v8 = vld [vmem:[#allocation7 + $0x180] ss:$24 sps:$4 sm:$0xff] (!%p10242_p11)   ;;  %v11257_v12 = vld [vmem:[#allocation7 + $0x1b4] ss:$24 sps:$4 sm:$0xff] (!%p10242_p11)   ;;  %v4429_v13 = vlaneseq (!%p10242_p11) }
 0x3ca   : > { %v11256_v11 = vld [vmem:[#allocation7 + $0x188] ss:$24 sps:$4 sm:$0xff] (!%p10242_p11)   ;;  %v11304_v56 = vld [vmem:[#allocation7 + $0x30c] ss:$24 sps:$4 sm:$0xff] (!%p10242_p11)   ;;  %v11310_v61 = vld [vmem:[#allocation7 + $0x33c] ss:$24 sps:$4 sm:$0xff] (!%p10242_p11)  }
 0x3cb   : > { %7004 = vmatpush1.bf16.msra.mxu1 (!%p10242_p11), %v11238_v0  ;;  %v11302_v21 = vld [vmem:[#allocation7 + $0x308] ss:$24 sps:$4 sm:$0xff] (!%p10242_p11)   ;;  %v11307_v58 = vld [vmem:[#allocation7 + $0x334] ss:$24 sps:$4 sm:$0xff] (!%p10242_p11)   ;;  %v11308_v63 = vld [vmem:[#allocation7 + $0x338] ss:$24 sps:$4 sm:$0xff] (!%p10242_p11)  }
 0x3cc   : > { %7005 = vmatprep.subr.bf16.mxu1 (!%p10242_p11), %v11241_v28  ;;  %6842 = vmatpush1.bf16.msra.mxu0 (!%p10242_p11), %v11243_v2  ;;  %v11305_v62 = vld [vmem:[#allocation7 + $0x330] ss:$24 sps:$4 sm:$0xff] (!%p10242_p11)   ;;  %v11313_v0 = vld [vmem:[#allocation7 + $0x364] ss:$24 sps:$4 sm:$0xff] (!%p10242_p11)   ;;  %v11311_v28 = vld [vmem:[#allocation7 + $0x360] ss:$24 sps:$4 sm:$0xff] (!%p10242_p11)  }
 0x3cd   : > { %6843 = vmatprep.subr.bf16.mxu0 (!%p10242_p11), %v11245_v3  ;;  %v11316_v1 = vld [vmem:[#allocation7 + $0x36c] ss:$24 sps:$4 sm:$0xff] (!%p10242_p11)   ;;  %v11314_v2 = vld [vmem:[#allocation7 + $0x368] ss:$24 sps:$4 sm:$0xff] (!%p10242_p11)   ;;  %v11322_v3 = vld [vmem:[#allocation7 + $0x39c] ss:$24 sps:$4 sm:$0xff] (!%p10242_p11)  }
 0x3cf   : > { %7006 = vmatpush1.bf16.msra.mxu1 (!%p10242_p11), %v11244_v30  ;;  %v11319_v30 = vld [vmem:[#allocation7 + $0x394] ss:$24 sps:$4 sm:$0xff] (!%p10242_p11)  }
 0x3d0   : > { %7007 = vmatprep.subr.bf16.mxu1 (!%p10242_p11), %v11247_v37  ;;  %6844 = vmatpush1.bf16.msra.mxu0 (!%p10242_p11), %v11249_v4  ;;  %v11317_v37 = vld [vmem:[#allocation7 + $0x390] ss:$24 sps:$4 sm:$0xff] (!%p10242_p11)  }
 0x3d1   : > { %6845 = vmatprep.subr.bf16.mxu0 (!%p10242_p11), %v11251_v5  ;;  %v11320_v4 = vld [vmem:[#allocation7 + $0x398] ss:$24 sps:$4 sm:$0xff] (!%p10242_p11)   ;;  %v11328_v5 = vld [vmem:[#allocation7 + $0x3cc] ss:$24 sps:$4 sm:$0xff] (!%p10242_p11)  }
 0x3d3   : > { %7008 = vmatpush1.bf16.msra.mxu1 (!%p10242_p11), %v11250_v40  ;;  %v11325_v40 = vld [vmem:[#allocation7 + $0x3c4] ss:$24 sps:$4 sm:$0xff] (!%p10242_p11)  }
 0x3d4   : > { %7009 = vmatprep.subr.bf16.mxu1 (!%p10242_p11), %v11253_v7  ;;  %6846 = vmatpush1.bf16.msra.mxu0 (!%p10242_p11), %v11255_v8  ;;  %v11323_v7 = vld [vmem:[#allocation7 + $0x3c0] ss:$24 sps:$4 sm:$0xff] (!%p10242_p11)  }
 0x3d5   : > { %6847 = vmatprep.subr.bf16.mxu0 (!%p10242_p11), %v11257_v12  ;;  %v11331_v12 = vld [vmem:[#allocation7 + $0x3f4] ss:$24 sps:$4 sm:$0xff] (!%p10242_p11)  }
 0x3d7   : > { %7010 = vmatpush1.bf16.msra.mxu1 (!%p10242_p11), %v11256_v11  ;;  %v11326_v11 = vld [vmem:[#allocation7 + $0x3c8] ss:$24 sps:$4 sm:$0xff] (!%p10242_p11)  }
 0x401   : > { %v4269_v15 = vpop.f32.mrb[24].mxu0 }
 0x402   : > { %v4271_v18 = vpop.f32.mrb[25].mxu0 }
 0x403   : > { %v4310_v16 = vpop.f32.mrb[24].mxu1  ;;  %v4273_v24 = vpop.f32.mrb[26].mxu0 }
 0x404   : > { %v4311_v19 = vadd.f32 %v4310_v16, %v4269_v15  ;;  %v4312_v22 = vpop.f32.mrb[25].mxu1  ;;  %v4274_v26 = vpop.f32.mrb[27].mxu0  ;;  %v11259_v15 = vld [vmem:[#allocation7 + $0x1bc] ss:$24 sps:$4 sm:$0xff] (!%p10242_p11)   ;;  %v11261_v16 = vld [vmem:[#allocation7 + $0x1b0] ss:$24 sps:$4 sm:$0xff] (!%p10242_p11)  }
 0x405   : > { %v4313_v25 = vadd.f32 %v4312_v22, %v4271_v18  ;;  %v4314_v54 = vpop.f32.mrb[26].mxu1  ;;  %v11262_v18 = vld [vmem:[#allocation7 + $0x1b8] ss:$24 sps:$4 sm:$0xff] (!%p10242_p11)   ;;  %v13652_v22 = vshrl.u32 (!%p10242_p11), %v4429_v13, 7  ;;  %7011 = vmatprep.subr.bf16.mxu1 (!%p10242_p11), %v11259_v15  ;;  %v11265_v24 = vld [vmem:[#allocation7 + $0x1ec] ss:$24 sps:$4 sm:$0xff] (!%p10242_p11)   ;;  %6848 = vmatpush1.bf16.msra.mxu0 (!%p10242_p11), %v11261_v16 }
 0x406   : > { %v4315_v27 = vpop.f32.mrb[27].mxu1  ;;  %v11268_v54 = vld [vmem:[#allocation7 + $0x1e8] ss:$24 sps:$4 sm:$0xff] (!%p10242_p11)   ;;  %7012 = vmatpush1.bf16.msra.mxu1 (!%p10242_p11), %v11262_v18  ;;  %v11269_v26 = vld [vmem:[#allocation7 + $0x214] ss:$24 sps:$4 sm:$0xff] (!%p10242_p11)  }
 0x407   : > { %v13655_v27 = vsub.s32 (!%p10242_p11), 1, %v13652_v22  ;;  %7013 = vmatprep.subr.bf16.mxu1 (!%p10242_p11), %v11265_v24  ;;  %v13675_v8 = vsub.s32 (!%p10242_p11), 3, %v13652_v22  ;;  %v11334_v13 = vld [vmem:[#allocation7 + $0x3fc] ss:$24 sps:$4 sm:$0xff] (!%p10242_p11)   ;;  %v11329_v15 = vld [vmem:[#allocation7 + $0x3f0] ss:$24 sps:$4 sm:$0xff] (!%p10242_p11)  }
 0x408   : > { %v11332_v18 = vld [vmem:[#allocation7 + $0x3f8] ss:$24 sps:$4 sm:$0xff] (!%p10242_p11)   ;;  %v11340_v24 = vld [vmem:[#allocation7 + $0x42c] ss:$24 sps:$4 sm:$0xff] (!%p10242_p11)  }
 0x40a   : > { %7014 = vmatpush1.bf16.msra.mxu1 (!%p10242_p11), %v11268_v54  ;;  %v11335_v54 = vld [vmem:[#allocation7 + $0x420] ss:$24 sps:$4 sm:$0xff] (!%p10242_p11)  }
 0x441   : > { %v4351_v55 = vpop.f32.mrb[28].mxu0 }
 0x442   : > { %v4352_v29 = vadd.f32 %v4351_v55, %v4311_v19  ;;  %v4353_v32 = vpop.f32.mrb[29].mxu0  ;;  %v11263_v19 = vld [vmem:[#allocation7 + $0x1e4] ss:$24 sps:$4 sm:$0xff] (!%p10242_p11)  }
 0x443   : > { %v4392_v31 = vpop.f32.mrb[28].mxu1  ;;  %v4354_v34 = vadd.f32 %v4353_v32, %v4313_v25  ;;  %v4355_v36 = vpop.f32.mrb[30].mxu0  ;;  %4418 = sbr.rel (%p10242_p11) target bundleno = 2851 (0xb23), region = 128  ;;  %v11267_v25 = vld [vmem:[#allocation7 + $0x1e0] ss:$24 sps:$4 sm:$0xff] (!%p10242_p11)   ;;  %6849 = vmatprep.subr.bf16.mxu0 (!%p10242_p11), %v11263_v19 }
 0x444   : > { %v4394_v35 = vpop.f32.mrb[29].mxu1  ;;  %v4393_v38 = vadd.f32 %v4392_v31, %v4352_v29  ;;  %v4356_v42 = vpop.f32.mrb[31].mxu0  ;;  %v11271_v55 = vld [vmem:[#allocation7 + $0x21c] ss:$24 sps:$4 sm:$0xff] (!%p10242_p11)   ;;  %v4420_v29 = vld [vmem:[#allocation2 + $0x8] sm:$0xff] (!%p10242_p11)  ;;  %6850 = vmatpush1.bf16.msra.mxu0 (!%p10242_p11), %v11267_v25 }
 0x445   : > { %v4396_v41 = vpop.f32.mrb[30].mxu1  ;;  %v4395_v43 = vadd.f32 %v4394_v35, %v4354_v34  ;;  %v13657_v31 = vld [vmem:[#allocation5] sm:$0xff] (!%p10242_p11)  ;;  %v11273_v32 = vld [vmem:[#allocation7 + $0x210] ss:$24 sps:$4 sm:$0xff] (!%p10242_p11)   ;;  %6851 = vmatprep.subr.bf16.mxu0 (!%p10242_p11), %v11269_v26  ;;  %7015 = vmatprep.subr.bf16.mxu1 (!%p10242_p11), %v11271_v55  ;;  %v11277_v36 = vld [vmem:[#allocation7 + $0x24c] ss:$24 sps:$4 sm:$0xff] (!%p10242_p11)  }
 0x446   : > { %v4397_v44 = vpop.f32.mrb[31].mxu1  ;;  %v4405_v45 = vadd.f32 %v4393_v38, %v637_v33  ;;  %v11274_v33 = vld [vmem:[#allocation7 + $0x218] ss:$24 sps:$4 sm:$0xff] (!%p10242_p11)   ;;  %v4436_v34 = vrot.slane (!%p10242_p11), %v13657_v31, %v13655_v27  ;;  %v11275_v35 = vld [vmem:[#allocation7 + $0x244] ss:$24 sps:$4 sm:$0xff] (!%p10242_p11)   ;;  %v13662_v41 = vsub.s32 (!%p10242_p11), 0, %v13652_v22  ;;  %v4444_v16 = vrot.slane (!%p10242_p11), %v13657_v31, %v13675_v8 }
 0x447   : > { %v4406_v59 = vadd.f32 %v4395_v43, %v638_v39  ;;  %v11279_v39 = vld [vmem:[#allocation7 + $0x240] ss:$24 sps:$4 sm:$0xff] (!%p10242_p11)   ;;  %7016 = vmatpush1.bf16.msra.mxu1 (!%p10242_p11), %v11274_v33  ;;  %v11281_v43 = vld [vmem:[#allocation7 + $0x274] ss:$24 sps:$4 sm:$0xff] (!%p10242_p11)   ;;  %v11337_v19 = vld [vmem:[#allocation7 + $0x424] ss:$24 sps:$4 sm:$0xff] (!%p10242_p11)  }
 0x448   : > { %4413 = vst [vmem:[#allocation2 + $0x30] sm:$0xff] %v4405_v45  ;;  %v4470_v38 = vadd.f32 (!%p10242_p11), %v4436_v34, %v4420_v29  ;;  %6852 = vmatpush1.bf16.msra.mxu0 (!%p10242_p11), %v11273_v32  ;;  %v11280_v42 = vld [vmem:[#allocation7 + $0x248] ss:$24 sps:$4 sm:$0xff] (!%p10242_p11)   ;;  %7017 = vmatprep.subr.bf16.mxu1 (!%p10242_p11), %v11277_v36  ;;  %v11283_v45 = vld [vmem:[#allocation7 + $0x27c] ss:$24 sps:$4 sm:$0xff] (!%p10242_p11)   ;;  %v4432_v60 = vrot.slane (!%p10242_p11), %v13657_v31, %v13662_v41 }
 0x449   : > { %4414 = vst [vmem:[#allocation2 + $0x38] sm:$0xff] %v4406_v59  ;;  %6853 = vmatprep.subr.bf16.mxu0 (!%p10242_p11), %v11275_v35  ;;  %v4422_v25 = vld [vmem:[#allocation2 + $0x18] sm:$0xff] (!%p10242_p11)  ;;  %v11338_v55 = vld [vmem:[#allocation7 + $0x428] ss:$24 sps:$4 sm:$0xff] (!%p10242_p11)  }
 0x44a   : > { %v4478_v44 = vmax.f32 %v4470_v38, 0.0  ;;  %v4469_v48 = vadd.f32 %v4432_v60, %v4419_v47  ;;  %v4472_v26 = vadd.f32 %v4444_v16, %v4422_v25  ;;  %v11343_v29 = vld [vmem:[#allocation7 + $0x454] ss:$24 sps:$4 sm:$0xff]   ;;  %v11341_v34 = vld [vmem:[#allocation7 + $0x450] ss:$24 sps:$4 sm:$0xff]  }
 0x44b   : > { %7018 = vmatpush1.bf16.msra.mxu1 %v11280_v42  ;;  %v11346_v32 = vld [vmem:[#allocation7 + $0x45c] ss:$24 sps:$4 sm:$0xff]   ;;  %v11344_v36 = vld [vmem:[#allocation7 + $0x458] ss:$24 sps:$4 sm:$0xff]   ;;  %v11398_v16 = vld [vmem:[#allocation7 + $0x608] ss:$24 sps:$4 sm:$0xff]  }
 0x44c   : > { %v13664_v59 = vpack.c.bf16 %v4478_v44, %v4478_v44  ;;  %6854 = vmatpush1.bf16.msra.mxu0 %v11279_v39  ;;  %7019 = vmatprep.subr.bf16.mxu1 %v11283_v45  ;;  %v4477_v52 = vmax.f32 %v4469_v48, 0.0  ;;  %v4480_v33 = vmax.f32 %v4472_v26, 0.0  ;;  %v11349_v38 = vld [vmem:[#allocation7 + $0x484] ss:$24 sps:$4 sm:$0xff]   ;;  %v11347_v42 = vld [vmem:[#allocation7 + $0x480] ss:$24 sps:$4 sm:$0xff]  }
 0x44d   : > { %6855 = vmatprep.subr.bf16.mxu0 %v11281_v43  ;;  %v11352_v39 = vld [vmem:[#allocation7 + $0x48c] ss:$24 sps:$4 sm:$0xff]   ;;  %v11350_v43 = vld [vmem:[#allocation7 + $0x488] ss:$24 sps:$4 sm:$0xff]   ;;  %v11358_v45 = vld [vmem:[#allocation7 + $0x4bc] ss:$24 sps:$4 sm:$0xff]  }
 0x44e   : > { %6861 = vmatprep.mubr.bf16.mxu0 %v13664_v59  ;;  %7025 = vmatprep.mubr.bf16.mxu1 %v13664_v59  ;;  %v13670_v57 = vpack.c.bf16 %v4477_v52, %v4477_v52  ;;  %v13679_v35 = vpack.c.bf16 %v4480_v33, %v4480_v33  ;;  %v11355_v44 = vld [vmem:[#allocation7 + $0x4b4] ss:$24 sps:$4 sm:$0xff]   ;;  %v11361_v60 = vld [vmem:[#allocation7 + $0x4e4] ss:$24 sps:$4 sm:$0xff]   ;;  %v11359_v47 = vld [vmem:[#allocation7 + $0x4e0] ss:$24 sps:$4 sm:$0xff]  }
 0x44f   : > { %7020 = vmatpush1.bf16.msra.mxu1 %v11286_v20  ;;  %v11356_v20 = vld [vmem:[#allocation7 + $0x4b8] ss:$24 sps:$4 sm:$0xff]   ;;  %v11370_v48 = vld [vmem:[#allocation7 + $0x51c] ss:$24 sps:$4 sm:$0xff]  }
 0x450   : > { %6856 = vmatpush1.bf16.msra.mxu0 %v11285_v9  ;;  %7021 = vmatprep.subr.bf16.mxu1 %v11289_v14  ;;  %v11353_v9 = vld [vmem:[#allocation7 + $0x4b0] ss:$24 sps:$4 sm:$0xff]   ;;  %v11371_v52 = vld [vmem:[#allocation7 + $0x540] ss:$24 sps:$4 sm:$0xff]   ;;  %v11409_v26 = vld [vmem:[#allocation7 + $0x664] ss:$24 sps:$4 sm:$0xff]  }
 0x451   : > { %6857 = vmatprep.subr.bf16.mxu0 %v11287_v46  ;;  %v11364_v46 = vld [vmem:[#allocation7 + $0x4ec] ss:$24 sps:$4 sm:$0xff]   ;;  %v11362_v14 = vld [vmem:[#allocation7 + $0x4e8] ss:$24 sps:$4 sm:$0xff]  }
 0x452   : > { %v11407_v33 = vld [vmem:[#allocation7 + $0x660] ss:$24 sps:$4 sm:$0xff]  }
 0x453   : > { %7022 = vmatpush1.bf16.msra.mxu1 %v11292_v6  ;;  %v11365_v6 = vld [vmem:[#allocation7 + $0x510] ss:$24 sps:$4 sm:$0xff]  }
 0x454   : > { %6858 = vmatpush1.bf16.msra.mxu0 %v11291_v23  ;;  %7023 = vmatprep.subr.bf16.mxu1 %v11295_v50  ;;  %v11367_v23 = vld [vmem:[#allocation7 + $0x514] ss:$24 sps:$4 sm:$0xff]   ;;  %v11373_v50 = vld [vmem:[#allocation7 + $0x544] ss:$24 sps:$4 sm:$0xff]  }
 0x455   : > { %6859 = vmatprep.subr.bf16.mxu0 %v11293_v49  ;;  %v11368_v49 = vld [vmem:[#allocation7 + $0x518] ss:$24 sps:$4 sm:$0xff]  }
 0x457   : > { %7024 = vmatpush1.bf16.msra.mxu1 %v11298_v10  ;;  %v13684_v10 = vsub.s32 2, %v13652_v22 }
 0x458   : > { %6860 = vmatpush1.bf16.msra.mxu0 %v11297_v51  ;;  %7034 = vmatprep.subr.bf16.mxu1 %v11304_v56  ;;  %v11376_v51 = vld [vmem:[#allocation7 + $0x54c] ss:$24 sps:$4 sm:$0xff]  }
 0x459   : > { %6870 = vmatprep.subr.bf16.mxu0 %v11301_v53  ;;  %v11374_v53 = vld [vmem:[#allocation7 + $0x548] ss:$24 sps:$4 sm:$0xff]   ;;  %v11379_v56 = vld [vmem:[#allocation7 + $0x574] ss:$24 sps:$4 sm:$0xff]  }
 0x45a   : > { %7026 = vmatmul.mubr.bf16.vlgmr.msra.gmra.mrb[0].mxu1 %v13670_v57 }
 0x45b   : > { %6862 = vmatmul.mubr.bf16.vlgmr.msra.gmra.mrb[0].mxu0 %v13670_v57  ;;  %7035 = vmatpush1.bf16.msra.mxu1 %v11302_v21  ;;  %v11377_v21 = vld [vmem:[#allocation7 + $0x570] ss:$24 sps:$4 sm:$0xff]  }
 0x45c   : > { %6871 = vmatpush1.bf16.msra.mxu0 %v11299_v17  ;;  %7036 = vmatprep.subr.bf16.mxu1 %v11310_v61  ;;  %v11382_v17 = vld [vmem:[#allocation7 + $0x57c] ss:$24 sps:$4 sm:$0xff]   ;;  %v4440_v61 = vrot.slane %v13657_v31, %v13684_v10 }
 0x45d   : > { %6872 = vmatprep.subr.bf16.mxu0 %v11307_v58  ;;  %6902 = vmatprep.mubr.bf16.mxu0 %v13679_v35  ;;  %v11380_v58 = vld [vmem:[#allocation7 + $0x578] ss:$24 sps:$4 sm:$0xff]  }
 0x45e   : > { %7066 = vmatprep.mubr.bf16.mxu1 %v13679_v35 }
 0x45f   : > { %7037 = vmatpush1.bf16.msra.mxu1 %v11308_v63  ;;  %v11385_v63 = vld [vmem:[#allocation7 + $0x5a4] ss:$24 sps:$4 sm:$0xff]  }
 0x460   : > { %6873 = vmatpush1.bf16.msra.mxu0 %v11305_v62  ;;  %7038 = vmatprep.subr.bf16.mxu1 %v11316_v1  ;;  %v4421_v62 = vld [vmem:[#allocation2 + $0x10] sm:$0xff]  ;;  %v11383_v1 = vld [vmem:[#allocation7 + $0x5a0] ss:$24 sps:$4 sm:$0xff]  }
 0x461   : > { %6874 = vmatprep.subr.bf16.mxu0 %v11313_v0  ;;  %v11388_v0 = vld [vmem:[#allocation7 + $0x5ac] ss:$24 sps:$4 sm:$0xff]  }
 0x463   : > { %7039 = vmatpush1.bf16.msra.mxu1 %v11314_v2  ;;  %v11386_v2 = vld [vmem:[#allocation7 + $0x5a8] ss:$24 sps:$4 sm:$0xff]  }
 0x464   : > { %6875 = vmatpush1.bf16.msra.mxu0 %v11311_v28  ;;  %7040 = vmatprep.subr.bf16.mxu1 %v11322_v3  ;;  %v4471_v28 = vadd.f32 %v4440_v61, %v4421_v62  ;;  %v11394_v3 = vld [vmem:[#allocation7 + $0x5dc] ss:$24 sps:$4 sm:$0xff]   ;;  %v11449_v62 = vld [vmem:[#allocation7 + $0x7b0] ss:$24 sps:$4 sm:$0xff]  }
 0x465   : > { %6876 = vmatprep.subr.bf16.mxu0 %v11319_v30  ;;  %v11391_v30 = vld [vmem:[#allocation7 + $0x5d4] ss:$24 sps:$4 sm:$0xff]  }
 0x466   : > { %v11454_v61 = vld [vmem:[#allocation7 + $0x7bc] ss:$24 sps:$4 sm:$0xff]  }
 0x467   : > { %7041 = vmatpush1.bf16.msra.mxu1 %v11320_v4  ;;  %v11389_v4 = vld [vmem:[#allocation7 + $0x5d0] ss:$24 sps:$4 sm:$0xff]  }
 0x468   : > { %6877 = vmatpush1.bf16.msra.mxu0 %v11317_v37  ;;  %7042 = vmatprep.subr.bf16.mxu1 %v11328_v5  ;;  %v4451_v37 = vsub.s32 5, %v13652_v22  ;;  %v11392_v5 = vld [vmem:[#allocation7 + $0x5d8] ss:$24 sps:$4 sm:$0xff]  }
 0x469   : > { %6878 = vmatprep.subr.bf16.mxu0 %v11325_v40  ;;  %v4479_v40 = vmax.f32 %v4471_v28, 0.0  ;;  %v11455_v28 = vld [vmem:[#allocation7 + $0x7e0] ss:$24 sps:$4 sm:$0xff]  }
 0x46b   : > { %7043 = vmatpush1.bf16.msra.mxu1 %v11326_v11  ;;  %v11400_v11 = vld [vmem:[#allocation7 + $0x60c] ss:$24 sps:$4 sm:$0xff]  }
 0x46c   : > { %6879 = vmatpush1.bf16.msra.mxu0 %v11323_v7  ;;  %7044 = vmatprep.subr.bf16.mxu1 %v11334_v13  ;;  %v11397_v7 = vld [vmem:[#allocation7 + $0x604] ss:$24 sps:$4 sm:$0xff]   ;;  %v11395_v13 = vld [vmem:[#allocation7 + $0x600] ss:$24 sps:$4 sm:$0xff]  }
 0x46d   : > { %6880 = vmatprep.subr.bf16.mxu0 %v11331_v12  ;;  %v4452_v12 = vrot.slane %v13657_v31, %v4451_v37  ;;  %v11404_v31 = vld [vmem:[#allocation7 + $0x638] ss:$24 sps:$4 sm:$0xff]  }
 0x46f   : > { %7045 = vmatpush1.bf16.msra.mxu1 %v11332_v18  ;;  %v11403_v18 = vld [vmem:[#allocation7 + $0x634] ss:$24 sps:$4 sm:$0xff]  }
 0x470   : > { %6881 = vmatpush1.bf16.msra.mxu0 %v11329_v15  ;;  %7046 = vmatprep.subr.bf16.mxu1 %v11340_v24  ;;  %v13692_v15 = vpack.c.bf16 %v4479_v40, %v4479_v40  ;;  %v4424_v24 = vld [vmem:[#allocation2 + $0x28] sm:$0xff]  ;;  %v11464_v40 = vld [vmem:[#allocation7 + $0x818] ss:$24 sps:$4 sm:$0xff]  }
 0x471   : > { %6882 = vmatprep.subr.bf16.mxu0 %v11337_v19  ;;  %v11406_v19 = vld [vmem:[#allocation7 + $0x63c] ss:$24 sps:$4 sm:$0xff]   ;;  %v4474_v25 = vadd.f32 %v4452_v12, %v4424_v24  ;;  %v4447_v12 = vsub.s32 4, %v13652_v22  ;;  %v4459_v24 = vsub.s32 7, %v13652_v22 }
 0x473   : > { %7047 = vmatpush1.bf16.msra.mxu1 %v11338_v55  ;;  %v4482_v55 = vmax.f32 %v4474_v25, 0.0  ;;  %v11476_v25 = vld [vmem:[#allocation7 + $0x878] ss:$24 sps:$4 sm:$0xff]  }
 0x474   : > { %6883 = vmatpush1.bf16.msra.mxu0 %v11335_v54  ;;  %7048 = vmatprep.subr.bf16.mxu1 %v11346_v32  ;;  %v11401_v54 = vld [vmem:[#allocation7 + $0x630] ss:$24 sps:$4 sm:$0xff]  }
 0x475   : > { %6884 = vmatprep.subr.bf16.mxu0 %v11343_v29  ;;  %v11412_v29 = vld [vmem:[#allocation7 + $0x66c] ss:$24 sps:$4 sm:$0xff]   ;;  %v13696_v32 = vpack.c.bf16 %v4482_v55, %v4482_v55 }
 0x476   : > { %v11481_v55 = vld [vmem:[#allocation7 + $0x8a4] ss:$24 sps:$4 sm:$0xff]  }
 0x477   : > { %7049 = vmatpush1.bf16.msra.mxu1 %v11344_v36  ;;  %v11415_v36 = vld [vmem:[#allocation7 + $0x694] ss:$24 sps:$4 sm:$0xff]  }
 0x478   : > { %6885 = vmatpush1.bf16.msra.mxu0 %v11341_v34  ;;  %7050 = vmatprep.subr.bf16.mxu1 %v11352_v39  ;;  %v11410_v34 = vld [vmem:[#allocation7 + $0x668] ss:$24 sps:$4 sm:$0xff]  }
 0x479   : > { %6886 = vmatprep.subr.bf16.mxu0 %v11349_v38  ;;  %v11418_v38 = vld [vmem:[#allocation7 + $0x69c] ss:$24 sps:$4 sm:$0xff]   ;;  %v11413_v39 = vld [vmem:[#allocation7 + $0x690] ss:$24 sps:$4 sm:$0xff]  }
 0x47b   : > { %7051 = vmatpush1.bf16.msra.mxu1 %v11350_v43  ;;  %v11421_v43 = vld [vmem:[#allocation7 + $0x6c4] ss:$24 sps:$4 sm:$0xff]  }
 0x47c   : > { %6887 = vmatpush1.bf16.msra.mxu0 %v11347_v42  ;;  %7052 = vmatprep.subr.bf16.mxu1 %v11358_v45  ;;  %v11416_v42 = vld [vmem:[#allocation7 + $0x698] ss:$24 sps:$4 sm:$0xff]  }
 0x47d   : > { %6888 = vmatprep.subr.bf16.mxu0 %v11355_v44  ;;  %v11424_v44 = vld [vmem:[#allocation7 + $0x6cc] ss:$24 sps:$4 sm:$0xff]   ;;  %v11419_v45 = vld [vmem:[#allocation7 + $0x6c0] ss:$24 sps:$4 sm:$0xff]  }
 0x47f   : > { %7053 = vmatpush1.bf16.msra.mxu1 %v11356_v20  ;;  %v11427_v20 = vld [vmem:[#allocation7 + $0x6f4] ss:$24 sps:$4 sm:$0xff]  }
 0x480   : > { %6889 = vmatpush1.bf16.msra.mxu0 %v11353_v9  ;;  %7054 = vmatprep.subr.bf16.mxu1 %v11364_v46  ;;  %v11422_v9 = vld [vmem:[#allocation7 + $0x6c8] ss:$24 sps:$4 sm:$0xff]  }
 0x481   : > { %6890 = vmatprep.subr.bf16.mxu0 %v11361_v60  ;;  %v11430_v60 = vld [vmem:[#allocation7 + $0x6fc] ss:$24 sps:$4 sm:$0xff]   ;;  %v11425_v46 = vld [vmem:[#allocation7 + $0x6f0] ss:$24 sps:$4 sm:$0xff]  }
 0x483   : > { %7055 = vmatpush1.bf16.msra.mxu1 %v11362_v14  ;;  %v11433_v14 = vld [vmem:[#allocation7 + $0x724] ss:$24 sps:$4 sm:$0xff]  }
 0x484   : > { %6891 = vmatpush1.bf16.msra.mxu0 %v11359_v47  ;;  %7056 = vmatprep.subr.bf16.mxu1 %v11370_v48  ;;  %v11428_v47 = vld [vmem:[#allocation7 + $0x6f8] ss:$24 sps:$4 sm:$0xff]  }
 0x485   : > { %6892 = vmatprep.subr.bf16.mxu0 %v11367_v23  ;;  %v11436_v23 = vld [vmem:[#allocation7 + $0x72c] ss:$24 sps:$4 sm:$0xff]   ;;  %v11431_v48 = vld [vmem:[#allocation7 + $0x720] ss:$24 sps:$4 sm:$0xff]  }
 0x487   : > { %7057 = vmatpush1.bf16.msra.mxu1 %v11368_v49  ;;  %v11439_v49 = vld [vmem:[#allocation7 + $0x754] ss:$24 sps:$4 sm:$0xff]  }
 0x488   : > { %6893 = vmatpush1.bf16.msra.mxu0 %v11365_v6  ;;  %7058 = vmatprep.subr.bf16.mxu1 %v11376_v51  ;;  %v11434_v6 = vld [vmem:[#allocation7 + $0x728] ss:$24 sps:$4 sm:$0xff]  }
 0x489   : > { %6894 = vmatprep.subr.bf16.mxu0 %v11373_v50  ;;  %v11442_v50 = vld [vmem:[#allocation7 + $0x75c] ss:$24 sps:$4 sm:$0xff]   ;;  %v11437_v51 = vld [vmem:[#allocation7 + $0x750] ss:$24 sps:$4 sm:$0xff]  }
 0x48b   : > { %7059 = vmatpush1.bf16.msra.mxu1 %v11374_v53  ;;  %v11445_v53 = vld [vmem:[#allocation7 + $0x784] ss:$24 sps:$4 sm:$0xff]  }
 0x48c   : > { %6895 = vmatpush1.bf16.msra.mxu0 %v11371_v52  ;;  %7060 = vmatprep.subr.bf16.mxu1 %v11382_v17  ;;  %v11440_v52 = vld [vmem:[#allocation7 + $0x758] ss:$24 sps:$4 sm:$0xff]  }
 0x48d   : > { %6896 = vmatprep.subr.bf16.mxu0 %v11379_v56  ;;  %v11448_v56 = vld [vmem:[#allocation7 + $0x78c] ss:$24 sps:$4 sm:$0xff]   ;;  %v11443_v17 = vld [vmem:[#allocation7 + $0x780] ss:$24 sps:$4 sm:$0xff]  }
 0x48f   : > { %7061 = vmatpush1.bf16.msra.mxu1 %v11380_v58  ;;  %v11451_v58 = vld [vmem:[#allocation7 + $0x7b4] ss:$24 sps:$4 sm:$0xff]  }
 0x490   : > { %6897 = vmatpush1.bf16.msra.mxu0 %v11377_v21  ;;  %7062 = vmatprep.subr.bf16.mxu1 %v11388_v0  ;;  %v11446_v21 = vld [vmem:[#allocation7 + $0x788] ss:$24 sps:$4 sm:$0xff]   ;;  %v11457_v0 = vld [vmem:[#allocation7 + $0x7e4] ss:$24 sps:$4 sm:$0xff]  }
 0x491   : > { %6898 = vmatprep.subr.bf16.mxu0 %v11385_v63  ;;  %v11452_v63 = vld [vmem:[#allocation7 + $0x7b8] ss:$24 sps:$4 sm:$0xff]  }
 0x493   : > { %7063 = vmatpush1.bf16.msra.mxu1 %v11386_v2  ;;  %v11458_v2 = vld [vmem:[#allocation7 + $0x7e8] ss:$24 sps:$4 sm:$0xff]  }
 0x494   : > { %6899 = vmatpush1.bf16.msra.mxu0 %v11383_v1  ;;  %7064 = vmatprep.subr.bf16.mxu1 %v11394_v3  ;;  %v11460_v1 = vld [vmem:[#allocation7 + $0x7ec] ss:$24 sps:$4 sm:$0xff]   ;;  %v11466_v3 = vld [vmem:[#allocation7 + $0x81c] ss:$24 sps:$4 sm:$0xff]  }
 0x495   : > { %6900 = vmatprep.subr.bf16.mxu0 %v11391_v30  ;;  %v11463_v30 = vld [vmem:[#allocation7 + $0x814] ss:$24 sps:$4 sm:$0xff]  }
 0x497   : > { %7065 = vmatpush1.bf16.msra.mxu1 %v11392_v5  ;;  %v11469_v5 = vld [vmem:[#allocation7 + $0x844] ss:$24 sps:$4 sm:$0xff]  }
 0x498   : > { %6901 = vmatpush1.bf16.msra.mxu0 %v11389_v4  ;;  %7075 = vmatprep.subr.bf16.mxu1 %v11400_v11  ;;  %v11461_v4 = vld [vmem:[#allocation7 + $0x810] ss:$24 sps:$4 sm:$0xff]   ;;  %v11467_v11 = vld [vmem:[#allocation7 + $0x840] ss:$24 sps:$4 sm:$0xff]  }
 0x499   : > { %6911 = vmatprep.subr.bf16.mxu0 %v11397_v7  ;;  %v11472_v7 = vld [vmem:[#allocation7 + $0x84c] ss:$24 sps:$4 sm:$0xff]  }
 0x49a   : > { %7067 = vmatmul.mubr.bf16.vlgmr.msra.gmra.mrb[0].mxu1 %v13692_v15 }
 0x49b   : > { %6903 = vmatmul.mubr.bf16.vlgmr.msra.gmra.mrb[0].mxu0 %v13692_v15  ;;  %7076 = vmatpush1.bf16.msra.mxu1 %v11398_v16  ;;  %v11475_v16 = vld [vmem:[#allocation7 + $0x874] ss:$24 sps:$4 sm:$0xff]  }
 0x49c   : > { %6912 = vmatpush1.bf16.msra.mxu0 %v11395_v13  ;;  %7077 = vmatprep.subr.bf16.mxu1 %v11406_v19  ;;  %v11470_v13 = vld [vmem:[#allocation7 + $0x848] ss:$24 sps:$4 sm:$0xff]  }
 0x49d   : > { %6913 = vmatprep.subr.bf16.mxu0 %v11403_v18  ;;  %6943 = vmatprep.mubr.bf16.mxu0 %v13696_v32  ;;  %v11478_v18 = vld [vmem:[#allocation7 + $0x87c] ss:$24 sps:$4 sm:$0xff]   ;;  %v11473_v19 = vld [vmem:[#allocation7 + $0x870] ss:$24 sps:$4 sm:$0xff]  }
 0x49e   : > { %7107 = vmatprep.mubr.bf16.mxu1 %v13696_v32 }
 0x49f   : > { %7078 = vmatpush1.bf16.msra.mxu1 %v11404_v31 }
 0x4a0   : > { %6914 = vmatpush1.bf16.msra.mxu0 %v11401_v54  ;;  %7079 = vmatprep.subr.bf16.mxu1 %v11412_v29  ;;  %v13702_v54 = vld [vmem:[#allocation5] sm:$0xff]  ;;  %v11484_v29 = vld [vmem:[#allocation7 + $0x8ac] ss:$24 sps:$4 sm:$0xff]  }
 0x4a1   : > { %6915 = vmatprep.subr.bf16.mxu0 %v11409_v26  ;;  %v4448_v31 = vrot.slane %v13702_v54, %v4447_v12  ;;  %v4423_v26 = vld [vmem:[#allocation2 + $0x20] sm:$0xff] }
 0x4a3   : > { %7080 = vmatpush1.bf16.msra.mxu1 %v11410_v34  ;;  %v4460_v34 = vrot.slane %v13702_v54, %v4459_v24  ;;  %v11536_v24 = vld [vmem:[#allocation7 + $0xa58] ss:$24 sps:$4 sm:$0xff]  }
 0x4a4   : > { %6916 = vmatpush1.bf16.msra.mxu0 %v11407_v33  ;;  %7081 = vmatprep.subr.bf16.mxu1 %v11418_v38  ;;  %v11479_v33 = vld [vmem:[#allocation7 + $0x8a0] ss:$24 sps:$4 sm:$0xff]   ;;  %v4426_v38 = vld [vmem:[#allocation2 + $0x38] sm:$0xff] }
 0x4a5   : > { %6917 = vmatprep.subr.bf16.mxu0 %v11415_v36  ;;  %v4473_v36 = vadd.f32 %v4448_v31, %v4423_v26  ;;  %v11544_v31 = vld [vmem:[#allocation7 + $0xa8c] ss:$24 sps:$4 sm:$0xff]   ;;  %v11539_v26 = vld [vmem:[#allocation7 + $0xa80] ss:$24 sps:$4 sm:$0xff]  }
 0x4a7   : > { %7082 = vmatpush1.bf16.msra.mxu1 %v11416_v42  ;;  %v11487_v42 = vld [vmem:[#allocation7 + $0x8d4] ss:$24 sps:$4 sm:$0xff]  }
 0x4a8   : > { %6918 = vmatpush1.bf16.msra.mxu0 %v11413_v39  ;;  %7083 = vmatprep.subr.bf16.mxu1 %v11424_v44  ;;  %v11482_v39 = vld [vmem:[#allocation7 + $0x8a8] ss:$24 sps:$4 sm:$0xff]   ;;  %v4476_v44 = vadd.f32 %v4460_v34, %v4426_v38  ;;  %v11553_v38 = vld [vmem:[#allocation7 + $0xae4] ss:$24 sps:$4 sm:$0xff]  }
 0x4a9   : > { %6919 = vmatprep.subr.bf16.mxu0 %v11421_v43  ;;  %v11490_v43 = vld [vmem:[#allocation7 + $0x8dc] ss:$24 sps:$4 sm:$0xff]   ;;  %v11545_v34 = vld [vmem:[#allocation7 + $0xab0] ss:$24 sps:$4 sm:$0xff]  }
 0x4ab   : > { %7084 = vmatpush1.bf16.msra.mxu1 %v11422_v9  ;;  %v4481_v9 = vmax.f32 %v4473_v36, 0.0  ;;  %v11548_v36 = vld [vmem:[#allocation7 + $0xab8] ss:$24 sps:$4 sm:$0xff]  }
 0x4ac   : > { %6920 = vmatpush1.bf16.msra.mxu0 %v11419_v45  ;;  %7085 = vmatprep.subr.bf16.mxu1 %v11430_v60  ;;  %v11485_v45 = vld [vmem:[#allocation7 + $0x8d0] ss:$24 sps:$4 sm:$0xff]   ;;  %v11493_v60 = vld [vmem:[#allocation7 + $0x904] ss:$24 sps:$4 sm:$0xff]  }
 0x4ad   : > { %6921 = vmatprep.subr.bf16.mxu0 %v11427_v20  ;;  %v11488_v20 = vld [vmem:[#allocation7 + $0x8d8] ss:$24 sps:$4 sm:$0xff]  }
 0x4af   : > { %7086 = vmatpush1.bf16.msra.mxu1 %v11428_v47  ;;  %v4484_v47 = vmax.f32 %v4476_v44, 0.0  ;;  %v11559_v44 = vld [vmem:[#allocation7 + $0xb14] ss:$24 sps:$4 sm:$0xff]  }
 0x4b0   : > { %6922 = vmatpush1.bf16.msra.mxu0 %v11425_v46  ;;  %7087 = vmatprep.subr.bf16.mxu1 %v11436_v23  ;;  %v11496_v46 = vld [vmem:[#allocation7 + $0x90c] ss:$24 sps:$4 sm:$0xff]   ;;  %v13708_v23 = vpack.c.bf16 %v4481_v9, %v4481_v9  ;;  %v11557_v9 = vld [vmem:[#allocation7 + $0xb10] ss:$24 sps:$4 sm:$0xff]  }
 0x4b1   : > { %6923 = vmatprep.subr.bf16.mxu0 %v11433_v14  ;;  %v11491_v14 = vld [vmem:[#allocation7 + $0x900] ss:$24 sps:$4 sm:$0xff]  }
 0x4b3   : > { %7088 = vmatpush1.bf16.msra.mxu1 %v11434_v6  ;;  %v11499_v6 = vld [vmem:[#allocation7 + $0x934] ss:$24 sps:$4 sm:$0xff]  }
 0x4b4   : > { %6924 = vmatpush1.bf16.msra.mxu0 %v11431_v48  ;;  %7089 = vmatprep.subr.bf16.mxu1 %v11442_v50  ;;  %v11494_v48 = vld [vmem:[#allocation7 + $0x908] ss:$24 sps:$4 sm:$0xff]   ;;  %v13710_v50 = vpack.c.bf16 %v4484_v47, %v4484_v47 }
 0x4b5   : > { %6925 = vmatprep.subr.bf16.mxu0 %v11439_v49  ;;  %v11502_v49 = vld [vmem:[#allocation7 + $0x93c] ss:$24 sps:$4 sm:$0xff]   ;;  %v11563_v47 = vld [vmem:[#allocation7 + $0xb40] ss:$24 sps:$4 sm:$0xff]  }
 0x4b7   : > { %7090 = vmatpush1.bf16.msra.mxu1 %v11440_v52  ;;  %v11500_v52 = vld [vmem:[#allocation7 + $0x938] ss:$24 sps:$4 sm:$0xff]  }
 0x4b8   : > { %6926 = vmatpush1.bf16.msra.mxu0 %v11437_v51  ;;  %7091 = vmatprep.subr.bf16.mxu1 %v11448_v56  ;;  %v11497_v51 = vld [vmem:[#allocation7 + $0x930] ss:$24 sps:$4 sm:$0xff]   ;;  %v11508_v56 = vld [vmem:[#allocation7 + $0x96c] ss:$24 sps:$4 sm:$0xff]  }
 0x4b9   : > { %6927 = vmatprep.subr.bf16.mxu0 %v11445_v53  ;;  %v11505_v53 = vld [vmem:[#allocation7 + $0x964] ss:$24 sps:$4 sm:$0xff]  }
 0x4bb   : > { %7092 = vmatpush1.bf16.msra.mxu1 %v11446_v21  ;;  %v11506_v21 = vld [vmem:[#allocation7 + $0x968] ss:$24 sps:$4 sm:$0xff]  }
 0x4bc   : > { %6928 = vmatpush1.bf16.msra.mxu0 %v11443_v17  ;;  %7093 = vmatprep.subr.bf16.mxu1 %v11454_v61  ;;  %v11503_v17 = vld [vmem:[#allocation7 + $0x960] ss:$24 sps:$4 sm:$0xff]   ;;  %v11514_v61 = vld [vmem:[#allocation7 + $0x99c] ss:$24 sps:$4 sm:$0xff]  }
 0x4bd   : > { %6929 = vmatprep.subr.bf16.mxu0 %v11451_v58  ;;  %v11511_v58 = vld [vmem:[#allocation7 + $0x994] ss:$24 sps:$4 sm:$0xff]  }
 0x4bf   : > { %7094 = vmatpush1.bf16.msra.mxu1 %v11452_v63  ;;  %v11512_v63 = vld [vmem:[#allocation7 + $0x998] ss:$24 sps:$4 sm:$0xff]  }
 0x4c0   : > { %6930 = vmatpush1.bf16.msra.mxu0 %v11449_v62  ;;  %7095 = vmatprep.subr.bf16.mxu1 %v11460_v1  ;;  %v11509_v62 = vld [vmem:[#allocation7 + $0x990] ss:$24 sps:$4 sm:$0xff]   ;;  %v11520_v1 = vld [vmem:[#allocation7 + $0x9cc] ss:$24 sps:$4 sm:$0xff]  }
 0x4c1   : > { %6931 = vmatprep.subr.bf16.mxu0 %v11457_v0  ;;  %v11517_v0 = vld [vmem:[#allocation7 + $0x9c4] ss:$24 sps:$4 sm:$0xff]  }
 0x4c3   : > { %7096 = vmatpush1.bf16.msra.mxu1 %v11458_v2  ;;  %v11518_v2 = vld [vmem:[#allocation7 + $0x9c8] ss:$24 sps:$4 sm:$0xff]  }
 0x4c4   : > { %6932 = vmatpush1.bf16.msra.mxu0 %v11455_v28  ;;  %7097 = vmatprep.subr.bf16.mxu1 %v11466_v3  ;;  %v11515_v28 = vld [vmem:[#allocation7 + $0x9c0] ss:$24 sps:$4 sm:$0xff]   ;;  %v11526_v3 = vld [vmem:[#allocation7 + $0x9fc] ss:$24 sps:$4 sm:$0xff]  }
 0x4c5   : > { %6933 = vmatprep.subr.bf16.mxu0 %v11463_v30  ;;  %v11523_v30 = vld [vmem:[#allocation7 + $0x9f4] ss:$24 sps:$4 sm:$0xff]  }
 0x4c7   : > { %7098 = vmatpush1.bf16.msra.mxu1 %v11464_v40  ;;  %v11524_v40 = vld [vmem:[#allocation7 + $0x9f8] ss:$24 sps:$4 sm:$0xff]  }
 0x4c8   : > { %6934 = vmatpush1.bf16.msra.mxu0 %v11461_v4  ;;  %7099 = vmatprep.subr.bf16.mxu1 %v11472_v7  ;;  %v11521_v4 = vld [vmem:[#allocation7 + $0x9f0] ss:$24 sps:$4 sm:$0xff]   ;;  %v11532_v7 = vld [vmem:[#allocation7 + $0xa2c] ss:$24 sps:$4 sm:$0xff]  }
 0x4c9   : > { %6935 = vmatprep.subr.bf16.mxu0 %v11469_v5  ;;  %v11529_v5 = vld [vmem:[#allocation7 + $0xa24] ss:$24 sps:$4 sm:$0xff]  }
 0x4cb   : > { %7100 = vmatpush1.bf16.msra.mxu1 %v11470_v13  ;;  %v11530_v13 = vld [vmem:[#allocation7 + $0xa28] ss:$24 sps:$4 sm:$0xff]  }
 0x4cc   : > { %6936 = vmatpush1.bf16.msra.mxu0 %v11467_v11  ;;  %7101 = vmatprep.subr.bf16.mxu1 %v11478_v18  ;;  %v11527_v11 = vld [vmem:[#allocation7 + $0xa20] ss:$24 sps:$4 sm:$0xff]   ;;  %v11538_v18 = vld [vmem:[#allocation7 + $0xa5c] ss:$24 sps:$4 sm:$0xff]  }
 0x4cd   : > { %6937 = vmatprep.subr.bf16.mxu0 %v11475_v16  ;;  %v11535_v16 = vld [vmem:[#allocation7 + $0xa54] ss:$24 sps:$4 sm:$0xff]  }
 0x4cf   : > { %7102 = vmatpush1.bf16.msra.mxu1 %v11476_v25  ;;  %v11541_v25 = vld [vmem:[#allocation7 + $0xa84] ss:$24 sps:$4 sm:$0xff]  }
 0x4d0   : > { %6938 = vmatpush1.bf16.msra.mxu0 %v11473_v19  ;;  %7103 = vmatprep.subr.bf16.mxu1 %v11484_v29  ;;  %v11533_v19 = vld [vmem:[#allocation7 + $0xa50] ss:$24 sps:$4 sm:$0xff]   ;;  %v11547_v29 = vld [vmem:[#allocation7 + $0xab4] ss:$24 sps:$4 sm:$0xff]  }
 0x4d1   : > { %6939 = vmatprep.subr.bf16.mxu0 %v11481_v55  ;;  %v11542_v55 = vld [vmem:[#allocation7 + $0xa88] ss:$24 sps:$4 sm:$0xff]  }
 0x4d3   : > { %7104 = vmatpush1.bf16.msra.mxu1 %v11482_v39  ;;  %v11556_v39 = vld [vmem:[#allocation7 + $0xaec] ss:$24 sps:$4 sm:$0xff]  }
 0x4d4   : > { %6940 = vmatpush1.bf16.msra.mxu0 %v11479_v33  ;;  %7105 = vmatprep.subr.bf16.mxu1 %v11490_v43  ;;  %v11550_v33 = vld [vmem:[#allocation7 + $0xabc] ss:$24 sps:$4 sm:$0xff]   ;;  %v11554_v43 = vld [vmem:[#allocation7 + $0xae8] ss:$24 sps:$4 sm:$0xff]  }
 0x4d5   : > { %6941 = vmatprep.subr.bf16.mxu0 %v11487_v42  ;;  %v11551_v42 = vld [vmem:[#allocation7 + $0xae0] ss:$24 sps:$4 sm:$0xff]  }
 0x4d7   : > { %7106 = vmatpush1.bf16.msra.mxu1 %v11488_v20  ;;  %v11560_v20 = vld [vmem:[#allocation7 + $0xb18] ss:$24 sps:$4 sm:$0xff]  }
 0x4d8   : > { %6942 = vmatpush1.bf16.msra.mxu0 %v11485_v45  ;;  %7116 = vmatprep.subr.bf16.mxu1 %v11496_v46  ;;  %v11562_v45 = vld [vmem:[#allocation7 + $0xb1c] ss:$24 sps:$4 sm:$0xff]   ;;  %v11568_v46 = vld [vmem:[#allocation7 + $0xb4c] ss:$24 sps:$4 sm:$0xff]  }
 0x4d9   : > { %6952 = vmatprep.subr.bf16.mxu0 %v11493_v60  ;;  %v11565_v60 = vld [vmem:[#allocation7 + $0xb44] ss:$24 sps:$4 sm:$0xff]  }
 0x4da   : > { %7108 = vmatmul.mubr.bf16.vlgmr.msra.gmra.mrb[0].mxu1 %v13708_v23 }
 0x4db   : > { %6944 = vmatmul.mubr.bf16.vlgmr.msra.gmra.mrb[0].mxu0 %v13708_v23  ;;  %7117 = vmatpush1.bf16.msra.mxu1 %v11494_v48  ;;  %v4455_v48 = vsub.s32 6, %v13652_v22  ;;  %v11926_v22 = vld [vmem:[#allocation10 + $0x28] ss:$16 sps:$4 sm:$0xff]  }
 0x4dc   : > { %6953 = vmatpush1.bf16.msra.mxu0 %v11491_v14  ;;  %7118 = vmatprep.subr.bf16.mxu1 %v11502_v49  ;;  %v11566_v14 = vld [vmem:[#allocation7 + $0xb48] ss:$24 sps:$4 sm:$0xff]   ;;  %v11574_v49 = vld [vmem:[#allocation7 + $0xb7c] ss:$24 sps:$4 sm:$0xff]  }
 0x4dd   : > { %6954 = vmatprep.subr.bf16.mxu0 %v11499_v6  ;;  %6984 = vmatprep.mubr.bf16.mxu0 %v13710_v50  ;;  %v11571_v6 = vld [vmem:[#allocation7 + $0xb74] ss:$24 sps:$4 sm:$0xff]  }
 0x4de   : > { %7148 = vmatprep.mubr.bf16.mxu1 %v13710_v50 }
 0x4df   : > { %7119 = vmatpush1.bf16.msra.mxu1 %v11500_v52  ;;  %v11572_v52 = vld [vmem:[#allocation7 + $0xb78] ss:$24 sps:$4 sm:$0xff]  }
 0x4e0   : > { %6955 = vmatpush1.bf16.msra.mxu0 %v11497_v51  ;;  %7120 = vmatprep.subr.bf16.mxu1 %v11508_v56  ;;  %v11569_v51 = vld [vmem:[#allocation7 + $0xb70] ss:$24 sps:$4 sm:$0xff]   ;;  %v4456_v56 = vrot.slane %v13702_v54, %v4455_v48 }
 0x4e1   : > { %6956 = vmatprep.subr.bf16.mxu0 %v11505_v53  ;;  %v11577_v53 = vld [vmem:[#allocation7 + $0xba4] ss:$24 sps:$4 sm:$0xff]   ;;  %v11584_v54 = vld [vmem:[#allocation7 + $0xbd8] ss:$24 sps:$4 sm:$0xff]  }
 0x4e2   : > { %v11730_v48 = vld [vmem:[#allocation10 + $0x84] ss:$16 sps:$4 sm:$0xff]  }
 0x4e3   : > { %7121 = vmatpush1.bf16.msra.mxu1 %v11506_v21  ;;  %v4425_v21 = vld [vmem:[#allocation2 + $0x30] sm:$0xff] }
 0x4e4   : > { %6957 = vmatpush1.bf16.msra.mxu0 %v11503_v17  ;;  %7122 = vmatprep.subr.bf16.mxu1 %v11514_v61  ;;  %v11580_v17 = vld [vmem:[#allocation7 + $0xbac] ss:$24 sps:$4 sm:$0xff]   ;;  %v11578_v61 = vld [vmem:[#allocation7 + $0xba8] ss:$24 sps:$4 sm:$0xff]  }
 0x4e5   : > { %6958 = vmatprep.subr.bf16.mxu0 %v11511_v58  ;;  %v11575_v58 = vld [vmem:[#allocation7 + $0xba0] ss:$24 sps:$4 sm:$0xff]  }
 0x4e7   : > { %7123 = vmatpush1.bf16.msra.mxu1 %v11512_v63  ;;  %v11583_v63 = vld [vmem:[#allocation7 + $0xbd4] ss:$24 sps:$4 sm:$0xff]  }
 0x4e8   : > { %6959 = vmatpush1.bf16.msra.mxu0 %v11509_v62  ;;  %7124 = vmatprep.subr.bf16.mxu1 %v11520_v1  ;;  %v4475_v62 = vadd.f32 %v4456_v56, %v4425_v21  ;;  %v11581_v1 = vld [vmem:[#allocation7 + $0xbd0] ss:$24 sps:$4 sm:$0xff]   ;;  %v11626_v56 = vld [vmem:[#allocation7 + $0x280] ss:$24 sps:$4 sm:$0xff]  }
 0x4e9   : > { %6960 = vmatprep.subr.bf16.mxu0 %v11517_v0  ;;  %v11586_v0 = vld [vmem:[#allocation7 + $0xbdc] ss:$24 sps:$4 sm:$0xff]  }
 0x4ea   : > { %v11742_v21 = vld [vmem:[#allocation10 + $0xc4] ss:$16 sps:$4 sm:$0xff]  }
 0x4eb   : > { %7125 = vmatpush1.bf16.msra.mxu1 %v11518_v2  ;;  %v11589_v2 = vld [vmem:[#allocation7 + $0x14] ss:$24 sps:$4 sm:$0xff]  }
 0x4ec   : > { %6961 = vmatpush1.bf16.msra.mxu0 %v11515_v28  ;;  %7126 = vmatprep.subr.bf16.mxu1 %v11526_v3  ;;  %v4483_v28 = vmax.f32 %v4475_v62, 0.0  ;;  %v11587_v3 = vld [vmem:[#allocation7 + $0x10] ss:$24 sps:$4 sm:$0xff]  }
 0x4ed   : > { %6962 = vmatprep.subr.bf16.mxu0 %v11523_v30  ;;  %v11746_v62 = vld [vmem:[#allocation10 + $0xe0] ss:$16 sps:$4 sm:$0xff]  }
 0x4ee   : > { %v13718_v30 = vpack.c.bf16 %v4483_v28, %v4483_v28  ;;  %v11752_v28 = vld [vmem:[#allocation10 + $0x100] ss:$16 sps:$4 sm:$0xff]  }
 0x4ef   : > { %7127 = vmatpush1.bf16.msra.mxu1 %v11524_v40  ;;  %v11590_v40 = vld [vmem:[#allocation7 + $0x40] ss:$24 sps:$4 sm:$0xff]  }
 0x4f0   : > { %6963 = vmatpush1.bf16.msra.mxu0 %v11521_v4  ;;  %7128 = vmatprep.subr.bf16.mxu1 %v11532_v7  ;;  %v11592_v4 = vld [vmem:[#allocation7 + $0x44] ss:$24 sps:$4 sm:$0xff]   ;;  %v11593_v7 = vld [vmem:[#allocation7 + $0x70] ss:$24 sps:$4 sm:$0xff]  }
 0x4f1   : > { %6964 = vmatprep.subr.bf16.mxu0 %v11529_v5  ;;  %v11595_v5 = vld [vmem:[#allocation7 + $0x74] ss:$24 sps:$4 sm:$0xff]  }
 0x4f3   : > { %7129 = vmatpush1.bf16.msra.mxu1 %v11530_v13  ;;  %v11596_v13 = vld [vmem:[#allocation7 + $0xa0] ss:$24 sps:$4 sm:$0xff]  }
 0x4f4   : > { %6965 = vmatpush1.bf16.msra.mxu0 %v11527_v11  ;;  %7130 = vmatprep.subr.bf16.mxu1 %v11538_v18  ;;  %v11598_v11 = vld [vmem:[#allocation7 + $0xa4] ss:$24 sps:$4 sm:$0xff]   ;;  %v11599_v18 = vld [vmem:[#allocation7 + $0xd0] ss:$24 sps:$4 sm:$0xff]  }
 0x4f5   : > { %6966 = vmatprep.subr.bf16.mxu0 %v11535_v16  ;;  %v11601_v16 = vld [vmem:[#allocation7 + $0xd4] ss:$24 sps:$4 sm:$0xff]  }
 0x4f7   : > { %7131 = vmatpush1.bf16.msra.mxu1 %v11536_v24  ;;  %v11602_v24 = vld [vmem:[#allocation7 + $0x100] ss:$24 sps:$4 sm:$0xff]  }
 0x4f8   : > { %6967 = vmatpush1.bf16.msra.mxu0 %v11533_v19  ;;  %7132 = vmatprep.subr.bf16.mxu1 %v11544_v31  ;;  %v11604_v19 = vld [vmem:[#allocation7 + $0x104] ss:$24 sps:$4 sm:$0xff]   ;;  %v11605_v31 = vld [vmem:[#allocation7 + $0x130] ss:$24 sps:$4 sm:$0xff]  }
 0x4f9   : > { %6968 = vmatprep.subr.bf16.mxu0 %v11541_v25  ;;  %v11607_v25 = vld [vmem:[#allocation7 + $0x134] ss:$24 sps:$4 sm:$0xff]  }
 0x4fb   : > { %7133 = vmatpush1.bf16.msra.mxu1 %v11542_v55  ;;  %v11704_v55 = vld [vmem:[#allocation10] ss:$16 sps:$4 sm:$0xff]  }
 0x4fc   : > { %6969 = vmatpush1.bf16.msra.mxu0 %v11539_v26  ;;  %7134 = vmatprep.subr.bf16.mxu1 %v11550_v33  ;;  %v11608_v26 = vld [vmem:[#allocation7 + $0x160] ss:$24 sps:$4 sm:$0xff]   ;;  %v11613_v33 = vld [vmem:[#allocation7 + $0x194] ss:$24 sps:$4 sm:$0xff]  }
 0x4fd   : > { %6970 = vmatprep.subr.bf16.mxu0 %v11547_v29  ;;  %v11706_v29 = vld [vmem:[#allocation10 + $0x4] ss:$16 sps:$4 sm:$0xff]  }
 0x4ff   : > { %7135 = vmatpush1.bf16.msra.mxu1 %v11548_v36  ;;  %v11710_v36 = vld [vmem:[#allocation10 + $0x20] ss:$16 sps:$4 sm:$0xff]  }
 0x500   : > { %6971 = vmatpush1.bf16.msra.mxu0 %v11545_v34  ;;  %7136 = vmatprep.subr.bf16.mxu1 %v11556_v39  ;;  %v11611_v34 = vld [vmem:[#allocation7 + $0x190] ss:$24 sps:$4 sm:$0xff]   ;;  %v11616_v39 = vld [vmem:[#allocation7 + $0x1c4] ss:$24 sps:$4 sm:$0xff]  }
 0x501   : > { %6972 = vmatprep.subr.bf16.mxu0 %v11553_v38  ;;  %v11712_v38 = vld [vmem:[#allocation10 + $0x24] ss:$16 sps:$4 sm:$0xff]  }
 0x503   : > { %7137 = vmatpush1.bf16.msra.mxu1 %v11554_v43  ;;  %v11716_v43 = vld [vmem:[#allocation10 + $0x40] ss:$16 sps:$4 sm:$0xff]  }
 0x504   : > { %6973 = vmatpush1.bf16.msra.mxu0 %v11551_v42  ;;  %7138 = vmatprep.subr.bf16.mxu1 %v11562_v45  ;;  %v11614_v42 = vld [vmem:[#allocation7 + $0x1c0] ss:$24 sps:$4 sm:$0xff]   ;;  %v11619_v45 = vld [vmem:[#allocation7 + $0x1f4] ss:$24 sps:$4 sm:$0xff]  }
 0x505   : > { %6974 = vmatprep.subr.bf16.mxu0 %v11559_v44  ;;  %v11718_v44 = vld [vmem:[#allocation10 + $0x44] ss:$16 sps:$4 sm:$0xff]  }
 0x507   : > { %7139 = vmatpush1.bf16.msra.mxu1 %v11560_v20  ;;  %v11722_v20 = vld [vmem:[#allocation10 + $0x60] ss:$16 sps:$4 sm:$0xff]  }
 0x508   : > { %6975 = vmatpush1.bf16.msra.mxu0 %v11557_v9  ;;  %7140 = vmatprep.subr.bf16.mxu1 %v11568_v46  ;;  %v11617_v9 = vld [vmem:[#allocation7 + $0x1f0] ss:$24 sps:$4 sm:$0xff]   ;;  %v11622_v46 = vld [vmem:[#allocation7 + $0x224] ss:$24 sps:$4 sm:$0xff]  }
 0x509   : > { %6976 = vmatprep.subr.bf16.mxu0 %v11565_v60  ;;  %v11724_v60 = vld [vmem:[#allocation10 + $0x64] ss:$16 sps:$4 sm:$0xff]  }
 0x50b   : > { %7141 = vmatpush1.bf16.msra.mxu1 %v11566_v14  ;;  %v11728_v14 = vld [vmem:[#allocation10 + $0x80] ss:$16 sps:$4 sm:$0xff]  }
 0x50c   : > { %6977 = vmatpush1.bf16.msra.mxu0 %v11563_v47  ;;  %7142 = vmatprep.subr.bf16.mxu1 %v11574_v49  ;;  %v11620_v47 = vld [vmem:[#allocation7 + $0x220] ss:$24 sps:$4 sm:$0xff]   ;;  %v11623_v49 = vld [vmem:[#allocation7 + $0x250] ss:$24 sps:$4 sm:$0xff]  }
 0x50d   : > { %6978 = vmatprep.subr.bf16.mxu0 %v11571_v6  ;;  %v11625_v6 = vld [vmem:[#allocation7 + $0x254] ss:$24 sps:$4 sm:$0xff]  }
 0x50f   : > { %7143 = vmatpush1.bf16.msra.mxu1 %v11572_v52  ;;  %v11736_v52 = vld [vmem:[#allocation10 + $0xa4] ss:$16 sps:$4 sm:$0xff]  }
 0x510   : > { %6979 = vmatpush1.bf16.msra.mxu0 %v11569_v51  ;;  %7144 = vmatprep.subr.bf16.mxu1 %v11580_v17  ;;  %v11734_v51 = vld [vmem:[#allocation10 + $0xa0] ss:$16 sps:$4 sm:$0xff]  }
 0x511   : > { %6980 = vmatprep.subr.bf16.mxu0 %v11577_v53  ;;  %v11628_v53 = vld [vmem:[#allocation7 + $0x284] ss:$24 sps:$4 sm:$0xff]  }
 0x512   : > { %v11740_v17 = vld [vmem:[#allocation10 + $0xc0] ss:$16 sps:$4 sm:$0xff]  }
 0x513   : > { %7145 = vmatpush1.bf16.msra.mxu1 %v11578_v61  ;;  %v11629_v61 = vld [vmem:[#allocation7 + $0x2b0] ss:$24 sps:$4 sm:$0xff]  }
 0x514   : > { %6981 = vmatpush1.bf16.msra.mxu0 %v11575_v58  ;;  %7146 = vmatprep.subr.bf16.mxu1 %v11586_v0  ;;  %v11631_v58 = vld [vmem:[#allocation7 + $0x2b4] ss:$24 sps:$4 sm:$0xff]   ;;  %v11634_v0 = vld [vmem:[#allocation7 + $0x2e4] ss:$24 sps:$4 sm:$0xff]  }
 0x515   : > { %6982 = vmatprep.subr.bf16.mxu0 %v11583_v63  ;;  %v11748_v63 = vld [vmem:[#allocation10 + $0xe4] ss:$16 sps:$4 sm:$0xff]  }
 0x517   : > { %7147 = vmatpush1.bf16.msra.mxu1 %v11584_v54  ;;  %v11754_v54 = vld [vmem:[#allocation10 + $0x104] ss:$16 sps:$4 sm:$0xff]  }
 0x518   : > { %6983 = vmatpush1.bf16.msra.mxu0 %v11581_v1  ;;  %8507 = vmatprep.subr.bf16.mxu1 %v11706_v29  ;;  %v11632_v1 = vld [vmem:[#allocation7 + $0x2e0] ss:$24 sps:$4 sm:$0xff]  }
 0x519   : > { %7157 = vmatprep.subr.bf16.mxu0 %v11589_v2  ;;  %v11637_v2 = vld [vmem:[#allocation7 + $0x314] ss:$24 sps:$4 sm:$0xff]  }
 0x51a   : > { %7149 = vmatmul.mubr.bf16.vlgmr.msra.gmra.mrb[0].mxu1 %v13718_v30  ;;  %v11784_v29 = vld [vmem:[#allocation10 + $0x1a4] ss:$16 sps:$4 sm:$0xff]  }
 0x51b   : > { %6985 = vmatmul.mubr.bf16.vlgmr.msra.gmra.mrb[0].mxu0 %v13718_v30  ;;  %8508 = vmatpush1.bf16.msra.mxu1 %v11704_v55  ;;  %v11782_v55 = vld [vmem:[#allocation10 + $0x1a0] ss:$16 sps:$4 sm:$0xff]  }
 0x51c   : > { %7158 = vmatpush1.bf16.msra.mxu0 %v11587_v3  ;;  %7189 = vmatprep.mubr.bf16.mxu0 %v13664_v59  ;;  %v11610_v59 = vld [vmem:[#allocation7 + $0x164] ss:$24 sps:$4 sm:$0xff]   ;;  %v11635_v3 = vld [vmem:[#allocation7 + $0x310] ss:$24 sps:$4 sm:$0xff]  }
 0x51d   : > { %7159 = vmatprep.subr.bf16.mxu0 %v11592_v4  ;;  %8509 = vmatprep.subr.bf16.mxu1 %v11712_v38  ;;  %v11758_v4 = vld [vmem:[#allocation10 + $0x120] ss:$16 sps:$4 sm:$0xff]  }
 0x51e   : > { %v11655_v38 = vld [vmem:[#allocation7 + $0x434] ss:$24 sps:$4 sm:$0xff]  }
 0x51f   : > { %8510 = vmatpush1.bf16.msra.mxu1 %v11710_v36  ;;  %v11790_v36 = vld [vmem:[#allocation10 + $0x1c4] ss:$16 sps:$4 sm:$0xff]  }
 0x520   : > { %7160 = vmatpush1.bf16.msra.mxu0 %v11590_v40  ;;  %8511 = vmatprep.subr.bf16.mxu1 %v11718_v44  ;;  %v11760_v40 = vld [vmem:[#allocation10 + $0x124] ss:$16 sps:$4 sm:$0xff]  }
 0x521   : > { %7161 = vmatprep.subr.bf16.mxu0 %v11595_v5  ;;  %v11640_v5 = vld [vmem:[#allocation7 + $0x344] ss:$24 sps:$4 sm:$0xff]  }
 0x522   : > { %v11658_v44 = vld [vmem:[#allocation7 + $0x464] ss:$24 sps:$4 sm:$0xff]  }
 0x523   : > { %8512 = vmatpush1.bf16.msra.mxu1 %v11716_v43  ;;  %v11796_v43 = vld [vmem:[#allocation10 + $0x1e4] ss:$16 sps:$4 sm:$0xff]  }
 0x524   : > { %7162 = vmatpush1.bf16.msra.mxu0 %v11593_v7  ;;  %8513 = vmatprep.subr.bf16.mxu1 %v11724_v60  ;;  %v11638_v7 = vld [vmem:[#allocation7 + $0x340] ss:$24 sps:$4 sm:$0xff]   ;;  %v11661_v60 = vld [vmem:[#allocation7 + $0x494] ss:$24 sps:$4 sm:$0xff]  }
 0x525   : > { %7163 = vmatprep.subr.bf16.mxu0 %v11598_v11  ;;  %v11764_v11 = vld [vmem:[#allocation10 + $0x140] ss:$16 sps:$4 sm:$0xff]  }
 0x527   : > { %8514 = vmatpush1.bf16.msra.mxu1 %v11722_v20  ;;  %v11802_v20 = vld [vmem:[#allocation10 + $0x204] ss:$16 sps:$4 sm:$0xff]  }
 0x528   : > { %7164 = vmatpush1.bf16.msra.mxu0 %v11596_v13  ;;  %8515 = vmatprep.subr.bf16.mxu1 %v11730_v48  ;;  %v11766_v13 = vld [vmem:[#allocation10 + $0x144] ss:$16 sps:$4 sm:$0xff]  }
 0x529   : > { %7165 = vmatprep.subr.bf16.mxu0 %v11601_v16  ;;  %v11643_v16 = vld [vmem:[#allocation7 + $0x374] ss:$24 sps:$4 sm:$0xff]  }
 0x52a   : > { %v11667_v48 = vld [vmem:[#allocation7 + $0x4f4] ss:$24 sps:$4 sm:$0xff]  }
 0x52b   : > { %8516 = vmatpush1.bf16.msra.mxu1 %v11728_v14  ;;  %v11662_v14 = vld [vmem:[#allocation7 + $0x4c0] ss:$24 sps:$4 sm:$0xff]  }
 0x52c   : > { %7166 = vmatpush1.bf16.msra.mxu0 %v11599_v18  ;;  %8517 = vmatprep.subr.bf16.mxu1 %v11736_v52  ;;  %v11641_v18 = vld [vmem:[#allocation7 + $0x370] ss:$24 sps:$4 sm:$0xff]   ;;  %v11673_v52 = vld [vmem:[#allocation7 + $0x554] ss:$24 sps:$4 sm:$0xff]  }
 0x52d   : > { %7167 = vmatprep.subr.bf16.mxu0 %v11604_v19  ;;  %v11770_v19 = vld [vmem:[#allocation10 + $0x160] ss:$16 sps:$4 sm:$0xff]  }
 0x52f   : > { %8518 = vmatpush1.bf16.msra.mxu1 %v11734_v51  ;;  %v11668_v51 = vld [vmem:[#allocation7 + $0x520] ss:$24 sps:$4 sm:$0xff]  }
 0x530   : > { %7168 = vmatpush1.bf16.msra.mxu0 %v11602_v24  ;;  %8519 = vmatprep.subr.bf16.mxu1 %v11742_v21  ;;  %v11772_v24 = vld [vmem:[#allocation10 + $0x164] ss:$16 sps:$4 sm:$0xff]  }
 0x531   : > { %7169 = vmatprep.subr.bf16.mxu0 %v11607_v25  ;;  %v11646_v25 = vld [vmem:[#allocation7 + $0x3a4] ss:$24 sps:$4 sm:$0xff]   ;;  %v11679_v21 = vld [vmem:[#allocation7 + $0x5b4] ss:$24 sps:$4 sm:$0xff]  }
 0x533   : > { %8520 = vmatpush1.bf16.msra.mxu1 %v11740_v17  ;;  %v11674_v17 = vld [vmem:[#allocation7 + $0x580] ss:$24 sps:$4 sm:$0xff]  }
 0x534   : > { %7170 = vmatpush1.bf16.msra.mxu0 %v11605_v31  ;;  %8521 = vmatprep.subr.bf16.mxu1 %v11748_v63  ;;  %v11776_v31 = vld [vmem:[#allocation10 + $0x180] ss:$16 sps:$4 sm:$0xff]  }
 0x535   : > { %7171 = vmatprep.subr.bf16.mxu0 %v11610_v59  ;;  %v11778_v59 = vld [vmem:[#allocation10 + $0x184] ss:$16 sps:$4 sm:$0xff]  }
 0x536   : > { %v11685_v63 = vld [vmem:[#allocation7 + $0x614] ss:$24 sps:$4 sm:$0xff]  }
 0x537   : > { %8522 = vmatpush1.bf16.msra.mxu1 %v11746_v62  ;;  %v11680_v62 = vld [vmem:[#allocation7 + $0x5e0] ss:$24 sps:$4 sm:$0xff]  }
 0x538   : > { %7172 = vmatpush1.bf16.msra.mxu0 %v11608_v26  ;;  %8523 = vmatprep.subr.bf16.mxu1 %v11754_v54  ;;  %v11647_v26 = vld [vmem:[#allocation7 + $0x3d0] ss:$24 sps:$4 sm:$0xff]   ;;  %v11691_v54 = vld [vmem:[#allocation7 + $0x674] ss:$24 sps:$4 sm:$0xff]  }
 0x539   : > { %7173 = vmatprep.subr.bf16.mxu0 %v11613_v33  ;;  %v11652_v33 = vld [vmem:[#allocation7 + $0x404] ss:$24 sps:$4 sm:$0xff]  }
 0x53b   : > { %8524 = vmatpush1.bf16.msra.mxu1 %v11752_v28  ;;  %v11686_v28 = vld [vmem:[#allocation7 + $0x640] ss:$24 sps:$4 sm:$0xff]  }
 0x53c   : > { %7174 = vmatpush1.bf16.msra.mxu0 %v11611_v34  ;;  %8525 = vmatprep.subr.bf16.mxu1 %v11760_v40  ;;  %v11650_v34 = vld [vmem:[#allocation7 + $0x400] ss:$24 sps:$4 sm:$0xff]   ;;  %v11697_v40 = vld [vmem:[#allocation7 + $0x6d4] ss:$24 sps:$4 sm:$0xff]  }
 0x53d   : > { %7175 = vmatprep.subr.bf16.mxu0 %v11616_v39  ;;  %v11788_v39 = vld [vmem:[#allocation10 + $0x1c0] ss:$16 sps:$4 sm:$0xff]  }
 0x53f   : > { %8526 = vmatpush1.bf16.msra.mxu1 %v11758_v4  ;;  %v11692_v4 = vld [vmem:[#allocation7 + $0x6a0] ss:$24 sps:$4 sm:$0xff]  }
 0x540   : > { %7176 = vmatpush1.bf16.msra.mxu0 %v11614_v42  ;;  %8527 = vmatprep.subr.bf16.mxu1 %v11766_v13  ;;  %v11653_v42 = vld [vmem:[#allocation7 + $0x430] ss:$24 sps:$4 sm:$0xff]   ;;  %v11709_v13 = vld [vmem:[#allocation7 + $0x764] ss:$24 sps:$4 sm:$0xff]  }
 0x541   : > { %7177 = vmatprep.subr.bf16.mxu0 %v11619_v45  ;;  %v11794_v45 = vld [vmem:[#allocation10 + $0x1e0] ss:$16 sps:$4 sm:$0xff]  }
 0x543   : > { %8528 = vmatpush1.bf16.msra.mxu1 %v11764_v11  ;;  %v11703_v11 = vld [vmem:[#allocation7 + $0x734] ss:$24 sps:$4 sm:$0xff]  }
 0x544   : > { %7178 = vmatpush1.bf16.msra.mxu0 %v11617_v9  ;;  %8529 = vmatprep.subr.bf16.mxu1 %v11772_v24  ;;  %v11656_v9 = vld [vmem:[#allocation7 + $0x460] ss:$24 sps:$4 sm:$0xff]   ;;  %v11721_v24 = vld [vmem:[#allocation7 + $0x7c4] ss:$24 sps:$4 sm:$0xff]  }
 0x545   : > { %7179 = vmatprep.subr.bf16.mxu0 %v11622_v46  ;;  %v11659_v46 = vld [vmem:[#allocation7 + $0x490] ss:$24 sps:$4 sm:$0xff]  }
 0x547   : > { %8530 = vmatpush1.bf16.msra.mxu1 %v11770_v19  ;;  %v11713_v19 = vld [vmem:[#allocation7 + $0x790] ss:$24 sps:$4 sm:$0xff]  }
 0x548   : > { %7180 = vmatpush1.bf16.msra.mxu0 %v11620_v47  ;;  %8531 = vmatprep.subr.bf16.mxu1 %v11778_v59  ;;  %v11664_v47 = vld [vmem:[#allocation7 + $0x4c4] ss:$24 sps:$4 sm:$0xff]  }
 0x549   : > { %7181 = vmatprep.subr.bf16.mxu0 %v11625_v6  ;;  %v11665_v6 = vld [vmem:[#allocation7 + $0x4f0] ss:$24 sps:$4 sm:$0xff]   ;;  %v11733_v59 = vld [vmem:[#allocation7 + $0x824] ss:$24 sps:$4 sm:$0xff]  }
 0x54b   : > { %8532 = vmatpush1.bf16.msra.mxu1 %v11776_v31  ;;  %v11725_v31 = vld [vmem:[#allocation7 + $0x7f0] ss:$24 sps:$4 sm:$0xff]  }
 0x54c   : > { %7182 = vmatpush1.bf16.msra.mxu0 %v11623_v49  ;;  %8533 = vmatprep.subr.bf16.mxu1 %v11784_v29  ;;  %v11670_v49 = vld [vmem:[#allocation7 + $0x524] ss:$24 sps:$4 sm:$0xff]  }
 0x54d   : > { %7183 = vmatprep.subr.bf16.mxu0 %v11628_v53  ;;  %v11671_v53 = vld [vmem:[#allocation7 + $0x550] ss:$24 sps:$4 sm:$0xff]   ;;  %v11745_v29 = vld [vmem:[#allocation7 + $0x884] ss:$24 sps:$4 sm:$0xff]  }
 0x54f   : > { %8534 = vmatpush1.bf16.msra.mxu1 %v11782_v55  ;;  %v11737_v55 = vld [vmem:[#allocation7 + $0x850] ss:$24 sps:$4 sm:$0xff]  }
 0x550   : > { %7184 = vmatpush1.bf16.msra.mxu0 %v11626_v56  ;;  %8535 = vmatprep.subr.bf16.mxu1 %v11790_v36  ;;  %v11676_v56 = vld [vmem:[#allocation7 + $0x584] ss:$24 sps:$4 sm:$0xff]   ;;  %v11749_v36 = vld [vmem:[#allocation7 + $0x8b0] ss:$24 sps:$4 sm:$0xff]  }
 0x551   : > { %7185 = vmatprep.subr.bf16.mxu0 %v11631_v58  ;;  %v11677_v58 = vld [vmem:[#allocation7 + $0x5b0] ss:$24 sps:$4 sm:$0xff]  }
 0x553   : > { %8536 = vmatpush1.bf16.msra.mxu1 %v11788_v39  ;;  %v11755_v39 = vld [vmem:[#allocation7 + $0x8e0] ss:$24 sps:$4 sm:$0xff]  }
 0x554   : > { %7186 = vmatpush1.bf16.msra.mxu0 %v11629_v61  ;;  %8537 = vmatprep.subr.bf16.mxu1 %v11796_v43  ;;  %v11682_v61 = vld [vmem:[#allocation7 + $0x5e4] ss:$24 sps:$4 sm:$0xff]   ;;  %v11761_v43 = vld [vmem:[#allocation7 + $0x910] ss:$24 sps:$4 sm:$0xff]  }
 0x555   : > { %7187 = vmatprep.subr.bf16.mxu0 %v11634_v0  ;;  %v11683_v0 = vld [vmem:[#allocation7 + $0x610] ss:$24 sps:$4 sm:$0xff]  }
 0x557   : > { %8538 = vmatpush1.bf16.msra.mxu1 %v11794_v45  ;;  %v11767_v45 = vld [vmem:[#allocation7 + $0x940] ss:$24 sps:$4 sm:$0xff]  }
 0x558   : > { %7188 = vmatpush1.bf16.msra.mxu0 %v11632_v1  ;;  %8548 = vmatprep.subr.bf16.mxu1 %v11802_v20  ;;  %v11688_v1 = vld [vmem:[#allocation7 + $0x644] ss:$24 sps:$4 sm:$0xff]   ;;  %v11773_v20 = vld [vmem:[#allocation7 + $0x970] ss:$24 sps:$4 sm:$0xff]  }
 0x559   : > { %7198 = vmatprep.subr.bf16.mxu0 %v11637_v2  ;;  %v11689_v2 = vld [vmem:[#allocation7 + $0x670] ss:$24 sps:$4 sm:$0xff]  }
 0x55b   : > { %7190 = vmatmul.mubr.bf16.vlgmr.msra.gmra.mrb[4].mxu0 %v13670_v57  ;;  %v11644_v57 = vld [vmem:[#allocation7 + $0x3a0] ss:$24 sps:$4 sm:$0xff]  }
 0x55c   : > { %7199 = vmatpush1.bf16.msra.mxu0 %v11635_v3  ;;  %7230 = vmatprep.mubr.bf16.mxu0 %v13679_v35  ;;  %v11649_v35 = vld [vmem:[#allocation7 + $0x3d4] ss:$24 sps:$4 sm:$0xff]   ;;  %v11694_v3 = vld [vmem:[#allocation7 + $0x6a4] ss:$24 sps:$4 sm:$0xff]  }
 0x55d   : > { %7200 = vmatprep.subr.bf16.mxu0 %v11640_v5  ;;  %v11695_v5 = vld [vmem:[#allocation7 + $0x6d0] ss:$24 sps:$4 sm:$0xff]  }
 0x560   : > { %7201 = vmatpush1.bf16.msra.mxu0 %v11638_v7  ;;  %v11700_v7 = vld [vmem:[#allocation7 + $0x704] ss:$24 sps:$4 sm:$0xff]  }
 0x561   : > { %7202 = vmatprep.subr.bf16.mxu0 %v11643_v16  ;;  %v11707_v16 = vld [vmem:[#allocation7 + $0x760] ss:$24 sps:$4 sm:$0xff]  }
 0x564   : > { %7203 = vmatpush1.bf16.msra.mxu0 %v11641_v18  ;;  %v11715_v18 = vld [vmem:[#allocation7 + $0x794] ss:$24 sps:$4 sm:$0xff]  }
 0x565   : > { %7204 = vmatprep.subr.bf16.mxu0 %v11646_v25  ;;  %v11719_v25 = vld [vmem:[#allocation7 + $0x7c0] ss:$24 sps:$4 sm:$0xff]  }
 0x568   : > { %7205 = vmatpush1.bf16.msra.mxu0 %v11644_v57  ;;  %v11727_v57 = vld [vmem:[#allocation7 + $0x7f4] ss:$24 sps:$4 sm:$0xff]  }
 0x569   : > { %7206 = vmatprep.subr.bf16.mxu0 %v11649_v35  ;;  %v11731_v35 = vld [vmem:[#allocation7 + $0x820] ss:$24 sps:$4 sm:$0xff]  }
 0x56c   : > { %7207 = vmatpush1.bf16.msra.mxu0 %v11647_v26  ;;  %v11739_v26 = vld [vmem:[#allocation7 + $0x854] ss:$24 sps:$4 sm:$0xff]  }
 0x56d   : > { %7208 = vmatprep.subr.bf16.mxu0 %v11652_v33  ;;  %v11743_v33 = vld [vmem:[#allocation7 + $0x880] ss:$24 sps:$4 sm:$0xff]  }
 0x570   : > { %7209 = vmatpush1.bf16.msra.mxu0 %v11650_v34  ;;  %v11751_v34 = vld [vmem:[#allocation7 + $0x8b4] ss:$24 sps:$4 sm:$0xff]  }
 0x571   : > { %7210 = vmatprep.subr.bf16.mxu0 %v11655_v38  ;;  %v11757_v38 = vld [vmem:[#allocation7 + $0x8e4] ss:$24 sps:$4 sm:$0xff]  }
 0x574   : > { %7211 = vmatpush1.bf16.msra.mxu0 %v11653_v42  ;;  %v11763_v42 = vld [vmem:[#allocation7 + $0x914] ss:$24 sps:$4 sm:$0xff]  }
 0x575   : > { %7212 = vmatprep.subr.bf16.mxu0 %v11658_v44  ;;  %v11769_v44 = vld [vmem:[#allocation7 + $0x944] ss:$24 sps:$4 sm:$0xff]  }
 0x578   : > { %7213 = vmatpush1.bf16.msra.mxu0 %v11656_v9  ;;  %v11775_v9 = vld [vmem:[#allocation7 + $0x974] ss:$24 sps:$4 sm:$0xff]  }
 0x579   : > { %7214 = vmatprep.subr.bf16.mxu0 %v11661_v60  ;;  %v11781_v60 = vld [vmem:[#allocation7 + $0x9a4] ss:$24 sps:$4 sm:$0xff]  }
 0x57c   : > { %7215 = vmatpush1.bf16.msra.mxu0 %v11659_v46  ;;  %v11779_v46 = vld [vmem:[#allocation7 + $0x9a0] ss:$24 sps:$4 sm:$0xff]  }
 0x57d   : > { %7216 = vmatprep.subr.bf16.mxu0 %v11664_v47  ;;  %v11787_v47 = vld [vmem:[#allocation7 + $0x9d4] ss:$24 sps:$4 sm:$0xff]  }
 0x580   : > { %7217 = vmatpush1.bf16.msra.mxu0 %v11662_v14  ;;  %v11785_v14 = vld [vmem:[#allocation7 + $0x9d0] ss:$24 sps:$4 sm:$0xff]  }
 0x581   : > { %7218 = vmatprep.subr.bf16.mxu0 %v11667_v48  ;;  %v13729_v48 = vld [vmem:[#allocation8] sm:$0x3f] }
 0x584   : > { %7219 = vmatpush1.bf16.msra.mxu0 %v11665_v6  ;;  %v4882_v6 = vrot.slane %v13729_v48, %v13662_v41 }
 0x585   : > { %7220 = vmatprep.subr.bf16.mxu0 %v11670_v49  ;;  %v4894_v49 = vrot.slane %v13729_v48, %v13675_v8 }
 0x588   : > { %7221 = vmatpush1.bf16.msra.mxu0 %v11668_v51  ;;  %v11791_v51 = vld [vmem:[#allocation7 + $0xa00] ss:$24 sps:$4 sm:$0xff]  }
 0x589   : > { %7222 = vmatprep.subr.bf16.mxu0 %v11673_v52  ;;  %v11799_v52 = vld [vmem:[#allocation7 + $0xa34] ss:$24 sps:$4 sm:$0xff]  }
 0x58c   : > { %7223 = vmatpush1.bf16.msra.mxu0 %v11671_v53 }
 0x58d   : > { %7224 = vmatprep.subr.bf16.mxu0 %v11676_v56 }
 0x590   : > { %7225 = vmatpush1.bf16.msra.mxu0 %v11674_v17 }
 0x591   : > { %7226 = vmatprep.subr.bf16.mxu0 %v11679_v21 }
 0x594   : > { %7227 = vmatpush1.bf16.msra.mxu0 %v11677_v58 }
 0x595   : > { %7228 = vmatprep.subr.bf16.mxu0 %v11682_v61 }
 0x598   : > { %7229 = vmatpush1.bf16.msra.mxu0 %v11680_v62 }
 0x599   : > { %7239 = vmatprep.subr.bf16.mxu0 %v11685_v63 }
 0x59b   : > { %7231 = vmatmul.mubr.bf16.vlgmr.msra.gmra.mrb[4].mxu0 %v13692_v15  ;;  %v11698_v15 = vld [vmem:[#allocation7 + $0x700] ss:$24 sps:$4 sm:$0xff]  }
 0x59c   : > { %7240 = vmatpush1.bf16.msra.mxu0 %v11683_v0  ;;  %7271 = vmatprep.mubr.bf16.mxu0 %v13696_v32  ;;  %v11701_v32 = vld [vmem:[#allocation7 + $0x730] ss:$24 sps:$4 sm:$0xff]  }
 0x59d   : > { %7241 = vmatprep.subr.bf16.mxu0 %v11688_v1  ;;  %v11797_v1 = vld [vmem:[#allocation7 + $0xa30] ss:$24 sps:$4 sm:$0xff]  }
 0x5a0   : > { %7242 = vmatpush1.bf16.msra.mxu0 %v11686_v28 }
 0x5a1   : > { %7243 = vmatprep.subr.bf16.mxu0 %v11691_v54 }
 0x5a4   : > { %7244 = vmatpush1.bf16.msra.mxu0 %v11689_v2 }
 0x5a5   : > { %7245 = vmatprep.subr.bf16.mxu0 %v11694_v3  ;;  %v11805_v3 = vld [vmem:[#allocation7 + $0xa64] ss:$24 sps:$4 sm:$0xff]  }
 0x5a8   : > { %7246 = vmatpush1.bf16.msra.mxu0 %v11692_v4 }
 0x5a9   : > { %7247 = vmatprep.subr.bf16.mxu0 %v11697_v40 }
 0x5ac   : > { %7248 = vmatpush1.bf16.msra.mxu0 %v11695_v5 }
 0x5ad   : > { %7249 = vmatprep.subr.bf16.mxu0 %v11700_v7  ;;  %v11800_v7 = vld [vmem:[#allocation10 + $0x200] ss:$16 sps:$4 sm:$0xff]  }
 0x5b0   : > { %7250 = vmatpush1.bf16.msra.mxu0 %v11698_v15  ;;  %v11803_v15 = vld [vmem:[#allocation7 + $0xa60] ss:$24 sps:$4 sm:$0xff]  }
 0x5b1   : > { %7251 = vmatprep.subr.bf16.mxu0 %v11703_v11 }
 0x5b4   : > { %7252 = vmatpush1.bf16.msra.mxu0 %v11701_v32  ;;  %v11808_v32 = vld [vmem:[#allocation10 + $0x224] ss:$16 sps:$4 sm:$0xff]  }
 0x5b5   : > { %7253 = vmatprep.subr.bf16.mxu0 %v11709_v13  ;;  %v11811_v13 = vld [vmem:[#allocation7 + $0xa94] ss:$24 sps:$4 sm:$0xff]  }
 0x5b8   : > { %7254 = vmatpush1.bf16.msra.mxu0 %v11707_v16 }
 0x5b9   : > { %7255 = vmatprep.subr.bf16.mxu0 %v11715_v18  ;;  %v11806_v18 = vld [vmem:[#allocation10 + $0x220] ss:$16 sps:$4 sm:$0xff]  }
 0x5bc   : > { %7256 = vmatpush1.bf16.msra.mxu0 %v11713_v19  ;;  %v11809_v19 = vld [vmem:[#allocation7 + $0xa90] ss:$24 sps:$4 sm:$0xff]  }
 0x5bd   : > { %7257 = vmatprep.subr.bf16.mxu0 %v11721_v24  ;;  %v11814_v24 = vld [vmem:[#allocation10 + $0x244] ss:$16 sps:$4 sm:$0xff]  }
 0x5c0   : > { %7258 = vmatpush1.bf16.msra.mxu0 %v11719_v25  ;;  %v11817_v25 = vld [vmem:[#allocation7 + $0xac4] ss:$24 sps:$4 sm:$0xff]  }
 0x5c1   : > { %7259 = vmatprep.subr.bf16.mxu0 %v11727_v57  ;;  %v11812_v57 = vld [vmem:[#allocation10 + $0x240] ss:$16 sps:$4 sm:$0xff]  }
 0x5c4   : > { %7260 = vmatpush1.bf16.msra.mxu0 %v11725_v31  ;;  %v11815_v31 = vld [vmem:[#allocation7 + $0xac0] ss:$24 sps:$4 sm:$0xff]  }
 0x5c5   : > { %7261 = vmatprep.subr.bf16.mxu0 %v11733_v59  ;;  %v11820_v59 = vld [vmem:[#allocation10 + $0x264] ss:$16 sps:$4 sm:$0xff]  }
 0x5c8   : > { %7262 = vmatpush1.bf16.msra.mxu0 %v11731_v35  ;;  %v11823_v35 = vld [vmem:[#allocation7 + $0xaf4] ss:$24 sps:$4 sm:$0xff]  }
 0x5c9   : > { %7263 = vmatprep.subr.bf16.mxu0 %v11739_v26  ;;  %v11818_v26 = vld [vmem:[#allocation10 + $0x260] ss:$16 sps:$4 sm:$0xff]  }
 0x5cc   : > { %7264 = vmatpush1.bf16.msra.mxu0 %v11737_v55  ;;  %v11821_v55 = vld [vmem:[#allocation7 + $0xaf0] ss:$24 sps:$4 sm:$0xff]  }
 0x5cd   : > { %7265 = vmatprep.subr.bf16.mxu0 %v11745_v29  ;;  %v11826_v29 = vld [vmem:[#allocation10 + $0x284] ss:$16 sps:$4 sm:$0xff]  }
 0x5d0   : > { %7266 = vmatpush1.bf16.msra.mxu0 %v11743_v33  ;;  %v11829_v33 = vld [vmem:[#allocation7 + $0xb24] ss:$24 sps:$4 sm:$0xff]  }
 0x5d1   : > { %7267 = vmatprep.subr.bf16.mxu0 %v11751_v34  ;;  %v11824_v34 = vld [vmem:[#allocation10 + $0x280] ss:$16 sps:$4 sm:$0xff]  }
 0x5d4   : > { %7268 = vmatpush1.bf16.msra.mxu0 %v11749_v36  ;;  %v11827_v36 = vld [vmem:[#allocation7 + $0xb20] ss:$24 sps:$4 sm:$0xff]  }
 0x5d5   : > { %7269 = vmatprep.subr.bf16.mxu0 %v11757_v38  ;;  %v11832_v38 = vld [vmem:[#allocation10 + $0x2a4] ss:$16 sps:$4 sm:$0xff]  }
 0x5d8   : > { %7270 = vmatpush1.bf16.msra.mxu0 %v11755_v39  ;;  %v11835_v39 = vld [vmem:[#allocation7 + $0xb54] ss:$24 sps:$4 sm:$0xff]  }
 0x5d9   : > { %7280 = vmatprep.subr.bf16.mxu0 %v11763_v42  ;;  %v11830_v42 = vld [vmem:[#allocation10 + $0x2a0] ss:$16 sps:$4 sm:$0xff]  }
 0x5db   : > { %7272 = vmatmul.mubr.bf16.vlgmr.msra.gmra.mrb[4].mxu0 %v13708_v23  ;;  %v11793_v23 = vld [vmem:[#allocation7 + $0xa04] ss:$24 sps:$4 sm:$0xff]  }
 0x5dc   : > { %7281 = vmatpush1.bf16.msra.mxu0 %v11761_v43  ;;  %7312 = vmatprep.mubr.bf16.mxu0 %v13710_v50  ;;  %v4886_v50 = vrot.slane %v13729_v48, %v13655_v27  ;;  %v11833_v43 = vld [vmem:[#allocation7 + $0xb50] ss:$24 sps:$4 sm:$0xff]  }
 0x5dd   : > { %7282 = vmatprep.subr.bf16.mxu0 %v11769_v44  ;;  %v11838_v44 = vld [vmem:[#allocation10 + $0x2c4] ss:$16 sps:$4 sm:$0xff]  }
 0x5e0   : > { %7283 = vmatpush1.bf16.msra.mxu0 %v11767_v45  ;;  %v11841_v45 = vld [vmem:[#allocation7 + $0xb84] ss:$24 sps:$4 sm:$0xff]  }
 0x5e1   : > { %7284 = vmatprep.subr.bf16.mxu0 %v11775_v9  ;;  %v11836_v9 = vld [vmem:[#allocation10 + $0x2c0] ss:$16 sps:$4 sm:$0xff]  }
 0x5e4   : > { %7285 = vmatpush1.bf16.msra.mxu0 %v11773_v20  ;;  %v11839_v20 = vld [vmem:[#allocation7 + $0xb80] ss:$24 sps:$4 sm:$0xff]  }
 0x5e5   : > { %7286 = vmatprep.subr.bf16.mxu0 %v11781_v60  ;;  %v11844_v60 = vld [vmem:[#allocation10 + $0x2e4] ss:$16 sps:$4 sm:$0xff]  }
 0x5e8   : > { %7287 = vmatpush1.bf16.msra.mxu0 %v11779_v46  ;;  %v11847_v46 = vld [vmem:[#allocation7 + $0xbb4] ss:$24 sps:$4 sm:$0xff]  }
 0x5e9   : > { %7288 = vmatprep.subr.bf16.mxu0 %v11787_v47  ;;  %v11842_v47 = vld [vmem:[#allocation10 + $0x2e0] ss:$16 sps:$4 sm:$0xff]  }
 0x5ec   : > { %7289 = vmatpush1.bf16.msra.mxu0 %v11785_v14  ;;  %v11845_v14 = vld [vmem:[#allocation7 + $0xbb0] ss:$24 sps:$4 sm:$0xff]  }
 0x5ed   : > { %7290 = vmatprep.subr.bf16.mxu0 %v11793_v23  ;;  %v13737_v56 = vpop.f32.mrb[0].mxu1  ;;  %v11850_v23 = vld [vmem:[#allocation10 + $0x304] ss:$16 sps:$4 sm:$0xff]  }
 0x5ee   : > { %v6986_v53 = vpop.f32.mrb[0].mxu0  ;;  %v7152_v58 = vpop.f32.mrb[1].mxu1 }
 0x5ef   : > { %v10964_v17 = vadd.f32 %v6986_v53, %v4882_v6  ;;  %v6988_v21 = vpop.f32.mrb[1].mxu0  ;;  %v10967_v62 = vadd.f32 %v7152_v58, %v4894_v49  ;;  %v7154_v0 = vpop.f32.mrb[2].mxu1  ;;  %v11853_v6 = vld [vmem:[#allocation7 + $0xbe4] ss:$24 sps:$4 sm:$0xff]   ;;  %v11851_v49 = vld [vmem:[#allocation7 + $0xbe0] ss:$24 sps:$4 sm:$0xff]  }
 0x5f0   : > { %v10965_v61 = vadd.f32 %v6988_v21, %v4886_v50  ;;  %v6990_v63 = vpop.f32.mrb[2].mxu0  ;;  %7291 = vmatpush1.bf16.msra.mxu0 %v11791_v51  ;;  %v7155_v2 = vpop.f32.mrb[3].mxu1  ;;  %v11848_v50 = vld [vmem:[#allocation10 + $0x300] ss:$16 sps:$4 sm:$0xff]   ;;  %v11856_v51 = vld [vmem:[#allocation10 + $0x324] ss:$16 sps:$4 sm:$0xff]  }
 0x5f1   : > { %v7321_v28 = vmax.f32 %v10964_v17, 0.0  ;;  %v6991_v54 = vpop.f32.mrb[3].mxu0  ;;  %7292 = vmatprep.subr.bf16.mxu0 %v11799_v52  ;;  %v7324_v40 = vmax.f32 %v10967_v62, 0.0  ;;  %v11854_v52 = vld [vmem:[#allocation10 + $0x320] ss:$16 sps:$4 sm:$0xff]  }
 0x5f2   : > { %v7322_v4 = vmax.f32 %v10965_v61, 0.0  ;;  %v11859_v53 = vld [vmem:[#allocation10 + $0x344] ss:$16 sps:$4 sm:$0xff]   ;;  %v11857_v17 = vld [vmem:[#allocation10 + $0x340] ss:$16 sps:$4 sm:$0xff]  }
 0x5f3   : > { %v13741_v11 = vpack.c.bf16 %v7321_v28, %v7321_v28  ;;  %v13744_v16 = vpack.c.bf16 %v7324_v40, %v7324_v40  ;;  %v11862_v21 = vld [vmem:[#allocation10 + $0x364] ss:$16 sps:$4 sm:$0xff]   ;;  %v11860_v58 = vld [vmem:[#allocation10 + $0x360] ss:$16 sps:$4 sm:$0xff]  }
 0x5f4   : > { %v13739_v5 = vpack.c.bf16 %v7322_v4, %v7322_v4  ;;  %7293 = vmatpush1.bf16.msra.mxu0 %v11797_v1  ;;  %v11865_v61 = vld [vmem:[#allocation10 + $0x384] ss:$16 sps:$4 sm:$0xff]   ;;  %v11863_v62 = vld [vmem:[#allocation10 + $0x380] ss:$16 sps:$4 sm:$0xff]   ;;  %v4890_v1 = vrot.slane %v13729_v48, %v13684_v10 }
 0x5f5   : > { %7294 = vmatprep.subr.bf16.mxu0 %v11805_v3  ;;  %v11868_v63 = vld [vmem:[#allocation10 + $0x3a4] ss:$16 sps:$4 sm:$0xff]   ;;  %v11866_v0 = vld [vmem:[#allocation10 + $0x3a0] ss:$16 sps:$4 sm:$0xff]  }
 0x5f6   : > { %8539 = vmatprep.mubr.bf16.mxu1 %v13739_v5  ;;  %v11871_v28 = vld [vmem:[#allocation10 + $0x3c4] ss:$16 sps:$4 sm:$0xff]   ;;  %v10966_v54 = vadd.f32 %v13737_v56, %v4890_v1  ;;  %v11872_v3 = vld [vmem:[#allocation10 + $0x3e0] ss:$16 sps:$4 sm:$0xff]  }
 0x5f7   : > { %8540 = vmatmul.mubr.bf16.vlgmr.msra.gmra.mrb[4].mxu1 %v13741_v11  ;;  %v11874_v2 = vld [vmem:[#allocation10 + $0x3e4] ss:$16 sps:$4 sm:$0xff]   ;;  %v11881_v56 = vld [vmem:[#allocation10 + $0x440] ss:$16 sps:$4 sm:$0xff]  }
 0x5f8   : > { %8549 = vmatpush1.bf16.msra.mxu1 %v11800_v7  ;;  %7295 = vmatpush1.bf16.msra.mxu0 %v11803_v15  ;;  %v7323_v4 = vmax.f32 %v10966_v54, 0.0  ;;  %v11877_v40 = vld [vmem:[#allocation10 + $0x404] ss:$16 sps:$4 sm:$0xff]   ;;  %v11875_v7 = vld [vmem:[#allocation10 + $0x400] ss:$16 sps:$4 sm:$0xff]  }
 0x5f9   : > { %8580 = vmatprep.mubr.bf16.mxu1 %v13744_v16  ;;  %8550 = vmatprep.subr.bf16.mxu1 %v11808_v32  ;;  %v11880_v32 = vld [vmem:[#allocation10 + $0x424] ss:$16 sps:$4 sm:$0xff]   ;;  %v11937_v54 = vld [vmem:[#allocation10 + $0x8c] ss:$16 sps:$4 sm:$0xff]  }
 0x5fa   : > { %7296 = vmatprep.subr.bf16.mxu0 %v11811_v13  ;;  %v13752_v15 = vpack.c.bf16 %v7323_v4, %v7323_v4  ;;  %v11878_v13 = vld [vmem:[#allocation10 + $0x420] ss:$16 sps:$4 sm:$0xff]   ;;  %v11938_v4 = vld [vmem:[#allocation10 + $0xa8] ss:$16 sps:$4 sm:$0xff]  }
 0x5fc   : > { %8551 = vmatpush1.bf16.msra.mxu1 %v11806_v18  ;;  %7297 = vmatpush1.bf16.msra.mxu0 %v11809_v19  ;;  %v11883_v18 = vld [vmem:[#allocation10 + $0x444] ss:$16 sps:$4 sm:$0xff]  }
 0x5fd   : > { %8552 = vmatprep.subr.bf16.mxu1 %v11814_v24  ;;  %7298 = vmatprep.subr.bf16.mxu0 %v11817_v25  ;;  %v11886_v19 = vld [vmem:[#allocation10 + $0x464] ss:$16 sps:$4 sm:$0xff]   ;;  %v11884_v24 = vld [vmem:[#allocation10 + $0x460] ss:$16 sps:$4 sm:$0xff]  }
 0x5fe   : > { %v11889_v25 = vld [vmem:[#allocation10 + $0x484] ss:$16 sps:$4 sm:$0xff]  }
 0x600   : > { %8553 = vmatpush1.bf16.msra.mxu1 %v11812_v57  ;;  %7299 = vmatpush1.bf16.msra.mxu0 %v11815_v31  ;;  %v11887_v57 = vld [vmem:[#allocation10 + $0x480] ss:$16 sps:$4 sm:$0xff]   ;;  %v11892_v31 = vld [vmem:[#allocation10 + $0x4a4] ss:$16 sps:$4 sm:$0xff]  }
 0x601   : > { %8554 = vmatprep.subr.bf16.mxu1 %v11820_v59  ;;  %7300 = vmatprep.subr.bf16.mxu0 %v11823_v35  ;;  %v11890_v59 = vld [vmem:[#allocation10 + $0x4a0] ss:$16 sps:$4 sm:$0xff]   ;;  %v11895_v35 = vld [vmem:[#allocation10 + $0x4c4] ss:$16 sps:$4 sm:$0xff]  }
 0x604   : > { %8555 = vmatpush1.bf16.msra.mxu1 %v11818_v26  ;;  %7301 = vmatpush1.bf16.msra.mxu0 %v11821_v55  ;;  %v11893_v26 = vld [vmem:[#allocation10 + $0x4c0] ss:$16 sps:$4 sm:$0xff]   ;;  %v11898_v55 = vld [vmem:[#allocation10 + $0x4e4] ss:$16 sps:$4 sm:$0xff]  }
 0x605   : > { %8556 = vmatprep.subr.bf16.mxu1 %v11826_v29  ;;  %7302 = vmatprep.subr.bf16.mxu0 %v11829_v33  ;;  %v11896_v29 = vld [vmem:[#allocation10 + $0x4e0] ss:$16 sps:$4 sm:$0xff]   ;;  %v11901_v33 = vld [vmem:[#allocation10 + $0x504] ss:$16 sps:$4 sm:$0xff]  }
 0x608   : > { %8557 = vmatpush1.bf16.msra.mxu1 %v11824_v34  ;;  %7303 = vmatpush1.bf16.msra.mxu0 %v11827_v36  ;;  %v11899_v34 = vld [vmem:[#allocation10 + $0x500] ss:$16 sps:$4 sm:$0xff]   ;;  %v11904_v36 = vld [vmem:[#allocation10 + $0x524] ss:$16 sps:$4 sm:$0xff]  }
 0x609   : > { %8558 = vmatprep.subr.bf16.mxu1 %v11832_v38  ;;  %7304 = vmatprep.subr.bf16.mxu0 %v11835_v39  ;;  %v11902_v38 = vld [vmem:[#allocation10 + $0x520] ss:$16 sps:$4 sm:$0xff]   ;;  %v11907_v39 = vld [vmem:[#allocation10 + $0x544] ss:$16 sps:$4 sm:$0xff]  }
 0x60c   : > { %8559 = vmatpush1.bf16.msra.mxu1 %v11830_v42  ;;  %7305 = vmatpush1.bf16.msra.mxu0 %v11833_v43  ;;  %v11905_v42 = vld [vmem:[#allocation10 + $0x540] ss:$16 sps:$4 sm:$0xff]   ;;  %v11910_v43 = vld [vmem:[#allocation10 + $0x564] ss:$16 sps:$4 sm:$0xff]  }
 0x60d   : > { %8560 = vmatprep.subr.bf16.mxu1 %v11838_v44  ;;  %7306 = vmatprep.subr.bf16.mxu0 %v11841_v45  ;;  %v11908_v44 = vld [vmem:[#allocation10 + $0x560] ss:$16 sps:$4 sm:$0xff]   ;;  %v11913_v45 = vld [vmem:[#allocation10 + $0x584] ss:$16 sps:$4 sm:$0xff]  }
 0x610   : > { %8561 = vmatpush1.bf16.msra.mxu1 %v11836_v9  ;;  %7307 = vmatpush1.bf16.msra.mxu0 %v11839_v20  ;;  %v11911_v9 = vld [vmem:[#allocation10 + $0x580] ss:$16 sps:$4 sm:$0xff]   ;;  %v11916_v20 = vld [vmem:[#allocation10 + $0x5a4] ss:$16 sps:$4 sm:$0xff]  }
 0x611   : > { %8562 = vmatprep.subr.bf16.mxu1 %v11844_v60  ;;  %7308 = vmatprep.subr.bf16.mxu0 %v11847_v46  ;;  %v11914_v60 = vld [vmem:[#allocation10 + $0x5a0] ss:$16 sps:$4 sm:$0xff]   ;;  %v11919_v46 = vld [vmem:[#allocation10 + $0x5c4] ss:$16 sps:$4 sm:$0xff]  }
 0x614   : > { %8563 = vmatpush1.bf16.msra.mxu1 %v11842_v47  ;;  %7309 = vmatpush1.bf16.msra.mxu0 %v11845_v14  ;;  %v11917_v47 = vld [vmem:[#allocation10 + $0x5c0] ss:$16 sps:$4 sm:$0xff]   ;;  %v11922_v14 = vld [vmem:[#allocation10 + $0x5e4] ss:$16 sps:$4 sm:$0xff]  }
 0x615   : > { %8564 = vmatprep.subr.bf16.mxu1 %v11850_v23  ;;  %7310 = vmatprep.subr.bf16.mxu0 %v11853_v6  ;;  %v11920_v23 = vld [vmem:[#allocation10 + $0x5e0] ss:$16 sps:$4 sm:$0xff]   ;;  %v11925_v6 = vld [vmem:[#allocation10 + $0xc] ss:$16 sps:$4 sm:$0xff]  }
 0x618   : > { %8565 = vmatpush1.bf16.msra.mxu1 %v11848_v50  ;;  %7311 = vmatpush1.bf16.msra.mxu0 %v11851_v49  ;;  %v4898_v50 = vrot.slane %v13729_v48, %v4447_v12  ;;  %v4902_v49 = vrot.slane %v13729_v48, %v4451_v37  ;;  %v11931_v37 = vld [vmem:[#allocation10 + $0x4c] ss:$16 sps:$4 sm:$0xff]   ;;  %v11929_v12 = vld [vmem:[#allocation10 + $0x48] ss:$16 sps:$4 sm:$0xff]  }
 0x619   : > { %8566 = vmatprep.subr.bf16.mxu1 %v11856_v51  ;;  %v11934_v48 = vld [vmem:[#allocation10 + $0x6c] ss:$16 sps:$4 sm:$0xff]  }
 0x61b   : > { %7313 = vmatmul.mubr.bf16.vlgmr.msra.gmra.mrb[4].mxu0 %v13718_v30  ;;  %v11869_v30 = vld [vmem:[#allocation10 + $0x3c0] ss:$16 sps:$4 sm:$0xff]  }
 0x61c   : > { %8567 = vmatpush1.bf16.msra.mxu1 %v11854_v52 }
 0x61d   : > { %8568 = vmatprep.subr.bf16.mxu1 %v11859_v53 }
 0x620   : > { %8569 = vmatpush1.bf16.msra.mxu1 %v11857_v17 }
 0x621   : > { %8570 = vmatprep.subr.bf16.mxu1 %v11862_v21 }
 0x624   : > { %8571 = vmatpush1.bf16.msra.mxu1 %v11860_v58 }
 0x625   : > { %8572 = vmatprep.subr.bf16.mxu1 %v11865_v61 }
 0x628   : > { %8573 = vmatpush1.bf16.msra.mxu1 %v11863_v62 }
 0x629   : > { %8574 = vmatprep.subr.bf16.mxu1 %v11868_v63 }
 0x62c   : > { %8575 = vmatpush1.bf16.msra.mxu1 %v11866_v0  ;;  %v11923_v0 = vld [vmem:[#allocation10 + $0x8] ss:$16 sps:$4 sm:$0xff]  }
 0x62d   : > { %8576 = vmatprep.subr.bf16.mxu1 %v11871_v28  ;;  %v11928_v28 = vld [vmem:[#allocation10 + $0x2c] ss:$16 sps:$4 sm:$0xff]  }
 0x630   : > { %8577 = vmatpush1.bf16.msra.mxu1 %v11869_v30  ;;  %v11932_v30 = vld [vmem:[#allocation10 + $0x68] ss:$16 sps:$4 sm:$0xff]  }
 0x631   : > { %8578 = vmatprep.subr.bf16.mxu1 %v11874_v2  ;;  %v11935_v2 = vld [vmem:[#allocation10 + $0x88] ss:$16 sps:$4 sm:$0xff]  }
 0x634   : > { %8579 = vmatpush1.bf16.msra.mxu1 %v11872_v3  ;;  %v11940_v3 = vld [vmem:[#allocation10 + $0xac] ss:$16 sps:$4 sm:$0xff]  }
 0x635   : > { %8589 = vmatprep.subr.bf16.mxu1 %v11877_v40  ;;  %v11943_v40 = vld [vmem:[#allocation10 + $0xcc] ss:$16 sps:$4 sm:$0xff]  }
 0x637   : > { %8581 = vmatmul.mubr.bf16.vlgmr.msra.gmra.mrb[4].mxu1 %v13752_v15 }
 0x638   : > { %8590 = vmatpush1.bf16.msra.mxu1 %v11875_v7  ;;  %v11946_v7 = vld [vmem:[#allocation10 + $0xec] ss:$16 sps:$4 sm:$0xff]  }
 0x639   : > { %8591 = vmatprep.subr.bf16.mxu1 %v11880_v32  ;;  %v11944_v32 = vld [vmem:[#allocation10 + $0xe8] ss:$16 sps:$4 sm:$0xff]  }
 0x63c   : > { %8592 = vmatpush1.bf16.msra.mxu1 %v11878_v13  ;;  %v11949_v13 = vld [vmem:[#allocation10 + $0x10c] ss:$16 sps:$4 sm:$0xff]  }
 0x63d   : > { %8593 = vmatprep.subr.bf16.mxu1 %v11883_v18  ;;  %v12045_v18 = vld [vmem:[#allocation13 + $0x4] ss:$8 sps:$4 sm:$0xff]  }
 0x63e   : > { %9157 = vmatprep.subr.bf16.mxu0 %v12045_v18  ;;  %v12109_v18 = vld [vmem:[#allocation13 + $0xe0] ss:$8 sps:$4 sm:$0xff]  }
 0x640   : > { %8594 = vmatpush1.bf16.msra.mxu1 %v11881_v56  ;;  %v12043_v56 = vld [vmem:[#allocation13] ss:$8 sps:$4 sm:$0xff]  }
 0x641   : > { %8595 = vmatprep.subr.bf16.mxu1 %v11886_v19  ;;  %v11947_v19 = vld [vmem:[#allocation10 + $0x108] ss:$16 sps:$4 sm:$0xff]   ;;  %9158 = vmatpush1.bf16.msra.mxu0 %v12043_v56 }
 0x642   : > { %v11989_v56 = vld [vmem:[#allocation10 + $0x2c8] ss:$16 sps:$4 sm:$0xff]  }
 0x644   : > { %8596 = vmatpush1.bf16.msra.mxu1 %v11884_v24  ;;  %v11952_v24 = vld [vmem:[#allocation10 + $0x12c] ss:$16 sps:$4 sm:$0xff]  }
 0x645   : > { %8597 = vmatprep.subr.bf16.mxu1 %v11889_v25  ;;  %v12051_v25 = vld [vmem:[#allocation13 + $0x14] ss:$8 sps:$4 sm:$0xff]  }
 0x646   : > { %9159 = vmatprep.subr.bf16.mxu0 %v12051_v25  ;;  %v12112_v25 = vld [vmem:[#allocation13 + $0xf0] ss:$8 sps:$4 sm:$0xff]  }
 0x648   : > { %8598 = vmatpush1.bf16.msra.mxu1 %v11887_v57  ;;  %v12049_v57 = vld [vmem:[#allocation13 + $0x10] ss:$8 sps:$4 sm:$0xff]  }
 0x649   : > { %8599 = vmatprep.subr.bf16.mxu1 %v11892_v31  ;;  %v11950_v31 = vld [vmem:[#allocation10 + $0x128] ss:$16 sps:$4 sm:$0xff]   ;;  %9160 = vmatpush1.bf16.msra.mxu0 %v12049_v57 }
 0x64a   : > { %v11992_v57 = vld [vmem:[#allocation10 + $0x2e8] ss:$16 sps:$4 sm:$0xff]  }
 0x64c   : > { %8600 = vmatpush1.bf16.msra.mxu1 %v11890_v59  ;;  %v11955_v59 = vld [vmem:[#allocation10 + $0x14c] ss:$16 sps:$4 sm:$0xff]  }
 0x64d   : > { %8601 = vmatprep.subr.bf16.mxu1 %v11895_v35  ;;  %v12057_v35 = vld [vmem:[#allocation13 + $0x24] ss:$8 sps:$4 sm:$0xff]  }
 0x64e   : > { %9161 = vmatprep.subr.bf16.mxu0 %v12057_v35  ;;  %v11995_v35 = vld [vmem:[#allocation10 + $0x308] ss:$16 sps:$4 sm:$0xff]  }
 0x650   : > { %8602 = vmatpush1.bf16.msra.mxu1 %v11893_v26  ;;  %v12055_v26 = vld [vmem:[#allocation13 + $0x20] ss:$8 sps:$4 sm:$0xff]  }
 0x651   : > { %8603 = vmatprep.subr.bf16.mxu1 %v11898_v55  ;;  %v11953_v55 = vld [vmem:[#allocation10 + $0x148] ss:$16 sps:$4 sm:$0xff]   ;;  %9162 = vmatpush1.bf16.msra.mxu0 %v12055_v26  ;;  %v12000_v26 = vld [vmem:[#allocation10 + $0x32c] ss:$16 sps:$4 sm:$0xff]  }
 0x654   : > { %8604 = vmatpush1.bf16.msra.mxu1 %v11896_v29  ;;  %v11958_v29 = vld [vmem:[#allocation10 + $0x16c] ss:$16 sps:$4 sm:$0xff]  }
 0x655   : > { %8605 = vmatprep.subr.bf16.mxu1 %v11901_v33  ;;  %v12063_v33 = vld [vmem:[#allocation13 + $0x34] ss:$8 sps:$4 sm:$0xff]  }
 0x656   : > { %9163 = vmatprep.subr.bf16.mxu0 %v12063_v33  ;;  %v12001_v33 = vld [vmem:[#allocation10 + $0x348] ss:$16 sps:$4 sm:$0xff]  }
 0x658   : > { %8606 = vmatpush1.bf16.msra.mxu1 %v11899_v34  ;;  %v12061_v34 = vld [vmem:[#allocation13 + $0x30] ss:$8 sps:$4 sm:$0xff]  }
 0x659   : > { %8607 = vmatprep.subr.bf16.mxu1 %v11904_v36  ;;  %v11956_v36 = vld [vmem:[#allocation10 + $0x168] ss:$16 sps:$4 sm:$0xff]   ;;  %9164 = vmatpush1.bf16.msra.mxu0 %v12061_v34  ;;  %v12006_v34 = vld [vmem:[#allocation10 + $0x36c] ss:$16 sps:$4 sm:$0xff]  }
 0x65c   : > { %8608 = vmatpush1.bf16.msra.mxu1 %v11902_v38  ;;  %v11961_v38 = vld [vmem:[#allocation10 + $0x18c] ss:$16 sps:$4 sm:$0xff]  }
 0x65d   : > { %8609 = vmatprep.subr.bf16.mxu1 %v11907_v39  ;;  %v12069_v39 = vld [vmem:[#allocation13 + $0x44] ss:$8 sps:$4 sm:$0xff]  }
 0x65e   : > { %9165 = vmatprep.subr.bf16.mxu0 %v12069_v39  ;;  %v12007_v39 = vld [vmem:[#allocation10 + $0x388] ss:$16 sps:$4 sm:$0xff]  }
 0x660   : > { %8610 = vmatpush1.bf16.msra.mxu1 %v11905_v42  ;;  %v12067_v42 = vld [vmem:[#allocation13 + $0x40] ss:$8 sps:$4 sm:$0xff]  }
 0x661   : > { %8611 = vmatprep.subr.bf16.mxu1 %v11910_v43  ;;  %v11959_v43 = vld [vmem:[#allocation10 + $0x188] ss:$16 sps:$4 sm:$0xff]   ;;  %9166 = vmatpush1.bf16.msra.mxu0 %v12067_v42  ;;  %v12012_v42 = vld [vmem:[#allocation10 + $0x3ac] ss:$16 sps:$4 sm:$0xff]  }
 0x664   : > { %8612 = vmatpush1.bf16.msra.mxu1 %v11908_v44  ;;  %v11964_v44 = vld [vmem:[#allocation10 + $0x1ac] ss:$16 sps:$4 sm:$0xff]  }
 0x665   : > { %8613 = vmatprep.subr.bf16.mxu1 %v11913_v45  ;;  %v12075_v45 = vld [vmem:[#allocation13 + $0x54] ss:$8 sps:$4 sm:$0xff]  }
 0x666   : > { %9167 = vmatprep.subr.bf16.mxu0 %v12075_v45  ;;  %v12013_v45 = vld [vmem:[#allocation10 + $0x3c8] ss:$16 sps:$4 sm:$0xff]  }
 0x668   : > { %8614 = vmatpush1.bf16.msra.mxu1 %v11911_v9  ;;  %v12073_v9 = vld [vmem:[#allocation13 + $0x50] ss:$8 sps:$4 sm:$0xff]  }
 0x669   : > { %8615 = vmatprep.subr.bf16.mxu1 %v11916_v20  ;;  %v11962_v20 = vld [vmem:[#allocation10 + $0x1a8] ss:$16 sps:$4 sm:$0xff]   ;;  %9168 = vmatpush1.bf16.msra.mxu0 %v12073_v9  ;;  %v12018_v9 = vld [vmem:[#allocation10 + $0x3ec] ss:$16 sps:$4 sm:$0xff]  }
 0x66c   : > { %8616 = vmatpush1.bf16.msra.mxu1 %v11914_v60  ;;  %v11967_v60 = vld [vmem:[#allocation10 + $0x1cc] ss:$16 sps:$4 sm:$0xff]  }
 0x66d   : > { %8617 = vmatprep.subr.bf16.mxu1 %v11919_v46  ;;  %v12081_v46 = vld [vmem:[#allocation13 + $0x64] ss:$8 sps:$4 sm:$0xff]  }
 0x66e   : > { %9169 = vmatprep.subr.bf16.mxu0 %v12081_v46  ;;  %v12019_v46 = vld [vmem:[#allocation10 + $0x408] ss:$16 sps:$4 sm:$0xff]  }
 0x670   : > { %8618 = vmatpush1.bf16.msra.mxu1 %v11917_v47  ;;  %v12079_v47 = vld [vmem:[#allocation13 + $0x60] ss:$8 sps:$4 sm:$0xff]  }
 0x671   : > { %8619 = vmatprep.subr.bf16.mxu1 %v11922_v14  ;;  %v11965_v14 = vld [vmem:[#allocation10 + $0x1c8] ss:$16 sps:$4 sm:$0xff]   ;;  %9170 = vmatpush1.bf16.msra.mxu0 %v12079_v47  ;;  %v12024_v47 = vld [vmem:[#allocation10 + $0x42c] ss:$16 sps:$4 sm:$0xff]  }
 0x674   : > { %8620 = vmatpush1.bf16.msra.mxu1 %v11920_v23  ;;  %v11970_v23 = vld [vmem:[#allocation10 + $0x1ec] ss:$16 sps:$4 sm:$0xff]  }
 0x675   : > { %8630 = vmatprep.subr.bf16.mxu1 %v11925_v6  ;;  %v12087_v6 = vld [vmem:[#allocation13 + $0x74] ss:$8 sps:$4 sm:$0xff]  }
 0x676   : > { %9171 = vmatprep.subr.bf16.mxu0 %v12087_v6  ;;  %v12025_v6 = vld [vmem:[#allocation10 + $0x448] ss:$16 sps:$4 sm:$0xff]  }
 0x6ee   : > { %v7314_v51 = vpop.f32.mrb[4].mxu0 }
 0x6ef   : > { %v10968_v52 = vadd.f32 %v7314_v51, %v4898_v50  ;;  %v7316_v53 = vpop.f32.mrb[5].mxu0  ;;  %v12085_v50 = vld [vmem:[#allocation13 + $0x70] ss:$8 sps:$4 sm:$0xff]  }
 0x6f0   : > { %v10969_v17 = vadd.f32 %v7316_v53, %v4902_v49  ;;  %v7318_v21 = vpop.f32.mrb[6].mxu0  ;;  %v11968_v49 = vld [vmem:[#allocation10 + $0x1e8] ss:$16 sps:$4 sm:$0xff]   ;;  %v11973_v51 = vld [vmem:[#allocation10 + $0x20c] ss:$16 sps:$4 sm:$0xff]   ;;  %9172 = vmatpush1.bf16.msra.mxu0 %v12085_v50 }
 0x6f1   : > { %v7325_v58 = vmax.f32 %v10968_v52, 0.0  ;;  %v7319_v61 = vpop.f32.mrb[7].mxu0  ;;  %v12093_v52 = vld [vmem:[#allocation13 + $0x84] ss:$8 sps:$4 sm:$0xff]   ;;  %v12091_v53 = vld [vmem:[#allocation13 + $0x80] ss:$8 sps:$4 sm:$0xff]  }
 0x6f2   : > { %v7326_v62 = vmax.f32 %v10969_v17, 0.0  ;;  %v11971_v17 = vld [vmem:[#allocation10 + $0x208] ss:$16 sps:$4 sm:$0xff]   ;;  %9173 = vmatprep.subr.bf16.mxu0 %v12093_v52  ;;  %v11976_v21 = vld [vmem:[#allocation10 + $0x22c] ss:$16 sps:$4 sm:$0xff]  }
 0x6f3   : > { %v13763_v1 = vpack.c.bf16 %v7325_v58, %v7325_v58  ;;  %v12096_v58 = vld [vmem:[#allocation13 + $0x94] ss:$8 sps:$4 sm:$0xff]   ;;  %v12094_v61 = vld [vmem:[#allocation13 + $0x90] ss:$8 sps:$4 sm:$0xff]  }
 0x6f4   : > { %v13761_v63 = vpack.c.bf16 %v7326_v62, %v7326_v62  ;;  %9174 = vmatpush1.bf16.msra.mxu0 %v12091_v53  ;;  %v12099_v62 = vld [vmem:[#allocation13 + $0xa4] ss:$8 sps:$4 sm:$0xff]   ;;  %v12030_v50 = vld [vmem:[#allocation10 + $0x46c] ss:$16 sps:$4 sm:$0xff]  }
 0x6f5   : > { %9175 = vmatprep.subr.bf16.mxu0 %v12096_v58  ;;  %v12031_v52 = vld [vmem:[#allocation10 + $0x488] ss:$16 sps:$4 sm:$0xff]   ;;  %v12036_v53 = vld [vmem:[#allocation10 + $0x4ac] ss:$16 sps:$4 sm:$0xff]  }
 0x6f6   : > { %8621 = vmatprep.mubr.bf16.mxu1 %v13761_v63  ;;  %v12040_v58 = vld [vmem:[#allocation10 + $0x4e8] ss:$16 sps:$4 sm:$0xff]  }
 0x6f7   : > { %8622 = vmatmul.mubr.bf16.vlgmr.msra.gmra.mrb[4].mxu1 %v13763_v1 }
 0x6f8   : > { %8631 = vmatpush1.bf16.msra.mxu1 %v11923_v0  ;;  %8662 = vmatprep.mubr.bf16.mxu1 %v13739_v5  ;;  %v11941_v5 = vld [vmem:[#allocation10 + $0xc8] ss:$16 sps:$4 sm:$0xff]  }
 0x6f9   : > { %8632 = vmatprep.subr.bf16.mxu1 %v11928_v28  ;;  %v11974_v0 = vld [vmem:[#allocation10 + $0x228] ss:$16 sps:$4 sm:$0xff]   ;;  %v11979_v28 = vld [vmem:[#allocation10 + $0x24c] ss:$16 sps:$4 sm:$0xff]   ;;  %9176 = vmatpush1.bf16.msra.mxu0 %v12094_v61 }
 0x6fa   : > { %9177 = vmatprep.subr.bf16.mxu0 %v12099_v62  ;;  %v12048_v61 = vld [vmem:[#allocation10 + $0x50c] ss:$16 sps:$4 sm:$0xff]   ;;  %v12046_v62 = vld [vmem:[#allocation10 + $0x508] ss:$16 sps:$4 sm:$0xff]  }
 0x6fc   : > { %8633 = vmatpush1.bf16.msra.mxu1 %v11926_v22  ;;  %v12097_v22 = vld [vmem:[#allocation13 + $0xa0] ss:$8 sps:$4 sm:$0xff]  }
 0x6fd   : > { %8634 = vmatprep.subr.bf16.mxu1 %v11931_v37  ;;  %v12102_v37 = vld [vmem:[#allocation13 + $0xb4] ss:$8 sps:$4 sm:$0xff]   ;;  %9178 = vmatpush1.bf16.msra.mxu0 %v12097_v22  ;;  %v12060_v22 = vld [vmem:[#allocation10 + $0x54c] ss:$16 sps:$4 sm:$0xff]  }
 0x6fe   : > { %9179 = vmatprep.subr.bf16.mxu0 %v12102_v37  ;;  %v12058_v37 = vld [vmem:[#allocation10 + $0x548] ss:$16 sps:$4 sm:$0xff]  }
 0x700   : > { %8635 = vmatpush1.bf16.msra.mxu1 %v11929_v12  ;;  %v11977_v12 = vld [vmem:[#allocation10 + $0x248] ss:$16 sps:$4 sm:$0xff]  }
 0x701   : > { %8636 = vmatprep.subr.bf16.mxu1 %v11934_v48  ;;  %v11982_v48 = vld [vmem:[#allocation10 + $0x26c] ss:$16 sps:$4 sm:$0xff]  }
 0x704   : > { %8637 = vmatpush1.bf16.msra.mxu1 %v11932_v30  ;;  %v12100_v30 = vld [vmem:[#allocation13 + $0xb0] ss:$8 sps:$4 sm:$0xff]  }
 0x705   : > { %8638 = vmatprep.subr.bf16.mxu1 %v11937_v54  ;;  %v11980_v54 = vld [vmem:[#allocation10 + $0x268] ss:$16 sps:$4 sm:$0xff]   ;;  %9180 = vmatpush1.bf16.msra.mxu0 %v12100_v30  ;;  %v12072_v30 = vld [vmem:[#allocation10 + $0x58c] ss:$16 sps:$4 sm:$0xff]  }
 0x708   : > { %8639 = vmatpush1.bf16.msra.mxu1 %v11935_v2  ;;  %v12103_v2 = vld [vmem:[#allocation13 + $0xc0] ss:$8 sps:$4 sm:$0xff]  }
 0x709   : > { %8640 = vmatprep.subr.bf16.mxu1 %v11940_v3  ;;  %v12108_v3 = vld [vmem:[#allocation13 + $0xd4] ss:$8 sps:$4 sm:$0xff]  }
 0x70c   : > { %8641 = vmatpush1.bf16.msra.mxu1 %v11938_v4  ;;  %v11983_v4 = vld [vmem:[#allocation10 + $0x288] ss:$16 sps:$4 sm:$0xff]  }
 0x70d   : > { %8642 = vmatprep.subr.bf16.mxu1 %v11943_v40  ;;  %v11988_v40 = vld [vmem:[#allocation10 + $0x2ac] ss:$16 sps:$4 sm:$0xff]  }
 0x710   : > { %8643 = vmatpush1.bf16.msra.mxu1 %v11941_v5  ;;  %v12106_v5 = vld [vmem:[#allocation13 + $0xd0] ss:$8 sps:$4 sm:$0xff]  }
 0x711   : > { %8644 = vmatprep.subr.bf16.mxu1 %v11946_v7  ;;  %v11986_v7 = vld [vmem:[#allocation10 + $0x2a8] ss:$16 sps:$4 sm:$0xff]  }
 0x714   : > { %8645 = vmatpush1.bf16.msra.mxu1 %v11944_v32  ;;  %v11991_v32 = vld [vmem:[#allocation10 + $0x2cc] ss:$16 sps:$4 sm:$0xff]  }
 0x715   : > { %8646 = vmatprep.subr.bf16.mxu1 %v11949_v13  ;;  %v12111_v13 = vld [vmem:[#allocation13 + $0xe4] ss:$8 sps:$4 sm:$0xff]  }
 0x718   : > { %8647 = vmatpush1.bf16.msra.mxu1 %v11947_v19  ;;  %v11994_v19 = vld [vmem:[#allocation10 + $0x2ec] ss:$16 sps:$4 sm:$0xff]  }
 0x719   : > { %8648 = vmatprep.subr.bf16.mxu1 %v11952_v24  ;;  %v12114_v24 = vld [vmem:[#allocation13 + $0xf4] ss:$8 sps:$4 sm:$0xff]  }
 0x71c   : > { %8649 = vmatpush1.bf16.msra.mxu1 %v11950_v31  ;;  %v11997_v31 = vld [vmem:[#allocation10 + $0x30c] ss:$16 sps:$4 sm:$0xff]  }
 0x71d   : > { %8650 = vmatprep.subr.bf16.mxu1 %v11955_v59  ;;  %v12117_v59 = vld [vmem:[#allocation13 + $0x104] ss:$8 sps:$4 sm:$0xff]  }
 0x720   : > { %8651 = vmatpush1.bf16.msra.mxu1 %v11953_v55  ;;  %v11998_v55 = vld [vmem:[#allocation10 + $0x328] ss:$16 sps:$4 sm:$0xff]  }
 0x721   : > { %8652 = vmatprep.subr.bf16.mxu1 %v11958_v29  ;;  %v12003_v29 = vld [vmem:[#allocation10 + $0x34c] ss:$16 sps:$4 sm:$0xff]  }
 0x724   : > { %8653 = vmatpush1.bf16.msra.mxu1 %v11956_v36  ;;  %v12004_v36 = vld [vmem:[#allocation10 + $0x368] ss:$16 sps:$4 sm:$0xff]  }
 0x725   : > { %8654 = vmatprep.subr.bf16.mxu1 %v11961_v38  ;;  %v12009_v38 = vld [vmem:[#allocation10 + $0x38c] ss:$16 sps:$4 sm:$0xff]  }
 0x728   : > { %8655 = vmatpush1.bf16.msra.mxu1 %v11959_v43  ;;  %v12010_v43 = vld [vmem:[#allocation10 + $0x3a8] ss:$16 sps:$4 sm:$0xff]  }
 0x729   : > { %8656 = vmatprep.subr.bf16.mxu1 %v11964_v44  ;;  %v12015_v44 = vld [vmem:[#allocation10 + $0x3cc] ss:$16 sps:$4 sm:$0xff]  }
 0x72c   : > { %8657 = vmatpush1.bf16.msra.mxu1 %v11962_v20  ;;  %v12016_v20 = vld [vmem:[#allocation10 + $0x3e8] ss:$16 sps:$4 sm:$0xff]  }
 0x72d   : > { %8658 = vmatprep.subr.bf16.mxu1 %v11967_v60  ;;  %v12021_v60 = vld [vmem:[#allocation10 + $0x40c] ss:$16 sps:$4 sm:$0xff]  }
 0x730   : > { %8659 = vmatpush1.bf16.msra.mxu1 %v11965_v14  ;;  %v12022_v14 = vld [vmem:[#allocation10 + $0x428] ss:$16 sps:$4 sm:$0xff]  }
 0x731   : > { %8660 = vmatprep.subr.bf16.mxu1 %v11970_v23  ;;  %v12027_v23 = vld [vmem:[#allocation10 + $0x44c] ss:$16 sps:$4 sm:$0xff]  }
 0x734   : > { %8661 = vmatpush1.bf16.msra.mxu1 %v11968_v49  ;;  %v12028_v49 = vld [vmem:[#allocation10 + $0x468] ss:$16 sps:$4 sm:$0xff]  }
 0x735   : > { %8671 = vmatprep.subr.bf16.mxu1 %v11973_v51  ;;  %v12033_v51 = vld [vmem:[#allocation10 + $0x48c] ss:$16 sps:$4 sm:$0xff]  }
 0x737   : > { %8663 = vmatmul.mubr.bf16.vlgmr.msra.gmra.mrb[8].mxu1 %v13741_v11  ;;  %v12105_v11 = vld [vmem:[#allocation13 + $0xc4] ss:$8 sps:$4 sm:$0xff]  }
 0x738   : > { %8672 = vmatpush1.bf16.msra.mxu1 %v11971_v17  ;;  %8703 = vmatprep.mubr.bf16.mxu1 %v13744_v16  ;;  %v11985_v16 = vld [vmem:[#allocation10 + $0x28c] ss:$16 sps:$4 sm:$0xff]  }
 0x739   : > { %8673 = vmatprep.subr.bf16.mxu1 %v11976_v21  ;;  %9181 = vmatprep.subr.bf16.mxu0 %v12105_v11  ;;  %v12039_v17 = vld [vmem:[#allocation10 + $0x4cc] ss:$16 sps:$4 sm:$0xff]   ;;  %v12070_v11 = vld [vmem:[#allocation10 + $0x588] ss:$16 sps:$4 sm:$0xff]  }
 0x73a   : > { %9182 = vmatpush1.bf16.msra.mxu0 %v12103_v2  ;;  %v12042_v21 = vld [vmem:[#allocation10 + $0x4ec] ss:$16 sps:$4 sm:$0xff]  }
 0x73b   : > { %9183 = vmatprep.subr.bf16.mxu0 %v12108_v3  ;;  %v12084_v2 = vld [vmem:[#allocation10 + $0x5cc] ss:$16 sps:$4 sm:$0xff]   ;;  %v12082_v3 = vld [vmem:[#allocation10 + $0x5c8] ss:$16 sps:$4 sm:$0xff]  }
 0x73c   : > { %8674 = vmatpush1.bf16.msra.mxu1 %v11974_v0  ;;  %v12054_v0 = vld [vmem:[#allocation10 + $0x52c] ss:$16 sps:$4 sm:$0xff]  }
 0x73d   : > { %8675 = vmatprep.subr.bf16.mxu1 %v11979_v28  ;;  %v12052_v28 = vld [vmem:[#allocation10 + $0x528] ss:$16 sps:$4 sm:$0xff]  }
 0x73e   : > { %9184 = vmatpush1.bf16.msra.mxu0 %v12106_v5  ;;  %v13773_v5 = vld [vmem:[#allocation11] sm:$0xf] }
 0x73f   : > { %9185 = vmatprep.subr.bf16.mxu0 %v12111_v13 }
 0x740   : > { %8676 = vmatpush1.bf16.msra.mxu1 %v11977_v12  ;;  %v12066_v12 = vld [vmem:[#allocation10 + $0x56c] ss:$16 sps:$4 sm:$0xff]  }
 0x741   : > { %8677 = vmatprep.subr.bf16.mxu1 %v11982_v48  ;;  %v12064_v48 = vld [vmem:[#allocation10 + $0x568] ss:$16 sps:$4 sm:$0xff]  }
 0x742   : > { %9186 = vmatpush1.bf16.msra.mxu0 %v12109_v18 }
 0x743   : > { %9187 = vmatprep.subr.bf16.mxu0 %v12114_v24 }
 0x744   : > { %8678 = vmatpush1.bf16.msra.mxu1 %v11980_v54  ;;  %v12078_v54 = vld [vmem:[#allocation10 + $0x5ac] ss:$16 sps:$4 sm:$0xff]  }
 0x745   : > { %8679 = vmatprep.subr.bf16.mxu1 %v11985_v16  ;;  %v12076_v16 = vld [vmem:[#allocation10 + $0x5a8] ss:$16 sps:$4 sm:$0xff]  }
 0x746   : > { %9188 = vmatpush1.bf16.msra.mxu0 %v12112_v25 }
 0x747   : > { %9198 = vmatprep.subr.bf16.mxu0 %v12117_v59 }
 0x748   : > { %8680 = vmatpush1.bf16.msra.mxu1 %v11983_v4  ;;  %v12090_v4 = vld [vmem:[#allocation10 + $0x5ec] ss:$16 sps:$4 sm:$0xff]  }
 0x749   : > { %8681 = vmatprep.subr.bf16.mxu1 %v11988_v40  ;;  %v12088_v40 = vld [vmem:[#allocation10 + $0x5e8] ss:$16 sps:$4 sm:$0xff]  }
 0x74c   : > { %8682 = vmatpush1.bf16.msra.mxu1 %v11986_v7  ;;  %v7530_v7 = vrot.slane %v13773_v5, %v13662_v41 }
 0x74d   : > { %8683 = vmatprep.subr.bf16.mxu1 %v11991_v32  ;;  %v7534_v32 = vrot.slane %v13773_v5, %v13655_v27 }
 0x750   : > { %8684 = vmatpush1.bf16.msra.mxu1 %v11989_v56 }
 0x751   : > { %8685 = vmatprep.subr.bf16.mxu1 %v11994_v19 }
 0x754   : > { %8686 = vmatpush1.bf16.msra.mxu1 %v11992_v57 }
 0x755   : > { %8687 = vmatprep.subr.bf16.mxu1 %v11997_v31 }
 0x758   : > { %8688 = vmatpush1.bf16.msra.mxu1 %v11995_v35  ;;  %v12115_v35 = vld [vmem:[#allocation13 + $0x100] ss:$8 sps:$4 sm:$0xff]  }
 0x759   : > { %8689 = vmatprep.subr.bf16.mxu1 %v12000_v26 }
 0x75c   : > { %8690 = vmatpush1.bf16.msra.mxu1 %v11998_v55  ;;  %v12118_v55 = vld [vmem:[#allocation13 + $0x110] ss:$8 sps:$4 sm:$0xff]  }
 0x75d   : > { %8691 = vmatprep.subr.bf16.mxu1 %v12003_v29  ;;  %v12123_v29 = vld [vmem:[#allocation13 + $0x124] ss:$8 sps:$4 sm:$0xff]  }
 0x760   : > { %8692 = vmatpush1.bf16.msra.mxu1 %v12001_v33  ;;  %v12121_v33 = vld [vmem:[#allocation13 + $0x120] ss:$8 sps:$4 sm:$0xff]  }
 0x761   : > { %8693 = vmatprep.subr.bf16.mxu1 %v12006_v34  ;;  %v12126_v34 = vld [vmem:[#allocation13 + $0x134] ss:$8 sps:$4 sm:$0xff]  }
 0x764   : > { %8694 = vmatpush1.bf16.msra.mxu1 %v12004_v36  ;;  %v12124_v36 = vld [vmem:[#allocation13 + $0x130] ss:$8 sps:$4 sm:$0xff]  }
 0x765   : > { %8695 = vmatprep.subr.bf16.mxu1 %v12009_v38  ;;  %v12129_v38 = vld [vmem:[#allocation13 + $0x144] ss:$8 sps:$4 sm:$0xff]  }
 0x768   : > { %8696 = vmatpush1.bf16.msra.mxu1 %v12007_v39  ;;  %v12127_v39 = vld [vmem:[#allocation13 + $0x140] ss:$8 sps:$4 sm:$0xff]  }
 0x769   : > { %8697 = vmatprep.subr.bf16.mxu1 %v12012_v42  ;;  %v12132_v42 = vld [vmem:[#allocation13 + $0x154] ss:$8 sps:$4 sm:$0xff]  }
 0x76c   : > { %8698 = vmatpush1.bf16.msra.mxu1 %v12010_v43  ;;  %v12130_v43 = vld [vmem:[#allocation13 + $0x150] ss:$8 sps:$4 sm:$0xff]  }
 0x76d   : > { %8699 = vmatprep.subr.bf16.mxu1 %v12015_v44  ;;  %v12135_v44 = vld [vmem:[#allocation13 + $0x164] ss:$8 sps:$4 sm:$0xff]  }
 0x770   : > { %8700 = vmatpush1.bf16.msra.mxu1 %v12013_v45  ;;  %v12133_v45 = vld [vmem:[#allocation13 + $0x160] ss:$8 sps:$4 sm:$0xff]  }
 0x771   : > { %8701 = vmatprep.subr.bf16.mxu1 %v12018_v9  ;;  %v12138_v9 = vld [vmem:[#allocation13 + $0x174] ss:$8 sps:$4 sm:$0xff]  }
 0x774   : > { %8702 = vmatpush1.bf16.msra.mxu1 %v12016_v20  ;;  %v12136_v20 = vld [vmem:[#allocation13 + $0x170] ss:$8 sps:$4 sm:$0xff]  }
 0x775   : > { %8712 = vmatprep.subr.bf16.mxu1 %v12021_v60  ;;  %v12141_v60 = vld [vmem:[#allocation13 + $0x184] ss:$8 sps:$4 sm:$0xff]  }
 0x777   : > { %8704 = vmatmul.mubr.bf16.vlgmr.msra.gmra.mrb[8].mxu1 %v13752_v15  ;;  %v12034_v15 = vld [vmem:[#allocation10 + $0x4a8] ss:$16 sps:$4 sm:$0xff]  }
 0x778   : > { %8713 = vmatpush1.bf16.msra.mxu1 %v12019_v46  ;;  %8744 = vmatprep.mubr.bf16.mxu1 %v13761_v63  ;;  %v12037_v63 = vld [vmem:[#allocation10 + $0x4c8] ss:$16 sps:$4 sm:$0xff]   ;;  %v12139_v46 = vld [vmem:[#allocation13 + $0x180] ss:$8 sps:$4 sm:$0xff]  }
 0x779   : > { %8714 = vmatprep.subr.bf16.mxu1 %v12024_v47  ;;  %v12144_v47 = vld [vmem:[#allocation13 + $0x194] ss:$8 sps:$4 sm:$0xff]  }
 0x77c   : > { %8715 = vmatpush1.bf16.msra.mxu1 %v12022_v14  ;;  %v12142_v14 = vld [vmem:[#allocation13 + $0x190] ss:$8 sps:$4 sm:$0xff]  }
 0x77d   : > { %8716 = vmatprep.subr.bf16.mxu1 %v12027_v23  ;;  %v12147_v23 = vld [vmem:[#allocation13 + $0x1a4] ss:$8 sps:$4 sm:$0xff]  }
 0x780   : > { %8717 = vmatpush1.bf16.msra.mxu1 %v12025_v6  ;;  %v12145_v6 = vld [vmem:[#allocation13 + $0x1a0] ss:$8 sps:$4 sm:$0xff]  }
 0x781   : > { %8718 = vmatprep.subr.bf16.mxu1 %v12030_v50  ;;  %v12150_v50 = vld [vmem:[#allocation13 + $0x1b4] ss:$8 sps:$4 sm:$0xff]  }
 0x784   : > { %8719 = vmatpush1.bf16.msra.mxu1 %v12028_v49  ;;  %v12148_v49 = vld [vmem:[#allocation13 + $0x1b0] ss:$8 sps:$4 sm:$0xff]  }
 0x785   : > { %8720 = vmatprep.subr.bf16.mxu1 %v12033_v51  ;;  %v12153_v51 = vld [vmem:[#allocation13 + $0x1c4] ss:$8 sps:$4 sm:$0xff]  }
 0x788   : > { %8721 = vmatpush1.bf16.msra.mxu1 %v12031_v52  ;;  %v12151_v52 = vld [vmem:[#allocation13 + $0x1c0] ss:$8 sps:$4 sm:$0xff]  }
 0x789   : > { %8722 = vmatprep.subr.bf16.mxu1 %v12036_v53  ;;  %v12156_v53 = vld [vmem:[#allocation13 + $0x1d4] ss:$8 sps:$4 sm:$0xff]  }
 0x78c   : > { %8723 = vmatpush1.bf16.msra.mxu1 %v12034_v15  ;;  %v12154_v15 = vld [vmem:[#allocation13 + $0x1d0] ss:$8 sps:$4 sm:$0xff]  }
 0x78d   : > { %8724 = vmatprep.subr.bf16.mxu1 %v12039_v17  ;;  %v12159_v17 = vld [vmem:[#allocation13 + $0x1e4] ss:$8 sps:$4 sm:$0xff]  }
 0x790   : > { %8725 = vmatpush1.bf16.msra.mxu1 %v12037_v63  ;;  %v12157_v63 = vld [vmem:[#allocation13 + $0x1e0] ss:$8 sps:$4 sm:$0xff]  }
 0x791   : > { %8726 = vmatprep.subr.bf16.mxu1 %v12042_v21  ;;  %v12162_v21 = vld [vmem:[#allocation13 + $0x1f4] ss:$8 sps:$4 sm:$0xff]  }
 0x794   : > { %8727 = vmatpush1.bf16.msra.mxu1 %v12040_v58  ;;  %v12160_v58 = vld [vmem:[#allocation13 + $0x1f0] ss:$8 sps:$4 sm:$0xff]  }
 0x795   : > { %8728 = vmatprep.subr.bf16.mxu1 %v12048_v61  ;;  %v12163_v61 = vld [vmem:[#allocation16 + $0x40] sm:$0xff]  }
 0x798   : > { %8729 = vmatpush1.bf16.msra.mxu1 %v12046_v62  ;;  %v7538_v62 = vrot.slane %v13773_v5, %v13684_v10  ;;  %v12167_v10 = vld [vmem:[#allocation16 + $0x50] sm:$0xff]  }
 0x799   : > { %8730 = vmatprep.subr.bf16.mxu1 %v12054_v0  ;;  %v7542_v0 = vrot.slane %v13773_v5, %v13675_v8  ;;  %v12168_v8 = vld [vmem:[#allocation16 + $0x10] sm:$0xff]   ;;  %v12169_v5 = vld [vmem:[#allocation16 + $0x58] sm:$0xff]  }
 0x79c   : > { %8731 = vmatpush1.bf16.msra.mxu1 %v12052_v28 }
 0x79d   : > { %8732 = vmatprep.subr.bf16.mxu1 %v12060_v22 }
 0x7a0   : > { %8733 = vmatpush1.bf16.msra.mxu1 %v12058_v37 }
 0x7a1   : > { %8734 = vmatprep.subr.bf16.mxu1 %v12066_v12 }
 0x7a4   : > { %8735 = vmatpush1.bf16.msra.mxu1 %v12064_v48 }
 0x7a5   : > { %8736 = vmatprep.subr.bf16.mxu1 %v12072_v30 }
 0x7a8   : > { %8737 = vmatpush1.bf16.msra.mxu1 %v12070_v11 }
 0x7a9   : > { %8738 = vmatprep.subr.bf16.mxu1 %v12078_v54 }
 0x7ac   : > { %8739 = vmatpush1.bf16.msra.mxu1 %v12076_v16 }
 0x7ad   : > { %8740 = vmatprep.subr.bf16.mxu1 %v12084_v2  ;;  %v12164_v2 = vld [vmem:[#allocation16] sm:$0xff]  }
 0x7b0   : > { %8741 = vmatpush1.bf16.msra.mxu1 %v12082_v3 }
 0x7b1   : > { %8742 = vmatprep.subr.bf16.mxu1 %v12090_v4  ;;  %v12165_v4 = vld [vmem:[#allocation16 + $0x48] sm:$0xff]  }
 0x7b4   : > { %8743 = vmatpush1.bf16.msra.mxu1 %v12088_v40  ;;  %v12166_v40 = vld [vmem:[#allocation16 + $0x8] sm:$0xff]  }
 0x7b7   : > { %8745 = vmatmul.mubr.bf16.vlgmr.msra.gmra.mrb[8].mxu1 %v13763_v1  ;;  %v12120_v1 = vld [vmem:[#allocation13 + $0x114] ss:$8 sps:$4 sm:$0xff]  }
 0x7ca   : > { %v8623_v13 = vpop.f32.mrb[4].mxu1 }
 0x7cb   : > { %v10970_v18 = vadd.f32 %v8623_v13, %v7530_v7  ;;  %v8625_v56 = vpop.f32.mrb[5].mxu1  ;;  %v12170_v7 = vld [vmem:[#allocation16 + $0x18] sm:$0xff]   ;;  %v12172_v13 = vld [vmem:[#allocation16 + $0x20] sm:$0xff]  }
 0x7cc   : > { %v10971_v19 = vadd.f32 %v8625_v56, %v7534_v32  ;;  %v8627_v24 = vpop.f32.mrb[6].mxu1  ;;  %v12171_v32 = vld [vmem:[#allocation16 + $0x60] sm:$0xff]   ;;  %v12174_v56 = vld [vmem:[#allocation16 + $0x28] sm:$0xff]  }
 0x7cd   : > { %v8753_v25 = vmax.f32 %v10970_v18, 0.0  ;;  %v8628_v57 = vpop.f32.mrb[7].mxu1  ;;  %v12173_v18 = vld [vmem:[#allocation16 + $0x68] sm:$0xff]   ;;  %v12176_v24 = vld [vmem:[#allocation16 + $0x30] sm:$0xff]  }
 0x7ce   : > { %v8754_v31 = vmax.f32 %v10971_v19, 0.0  ;;  %v12175_v19 = vld [vmem:[#allocation16 + $0x70] sm:$0xff]   ;;  %v12178_v57 = vld [vmem:[#allocation16 + $0x38] sm:$0xff]  }
 0x7cf   : > { %v8757_v26 = vpack.c.bf16 %v8753_v25, %v8753_v25  ;;  %v12177_v25 = vld [vmem:[#allocation16 + $0x78] sm:$0xff]  }
 0x7d0   : > { %v8758_v59 = vpack.c.bf16 %v8754_v31, %v8754_v31  ;;  %v12179_v31 = vld [vmem:[#allocation19] sm:$0xff]  }
 0x7d2   : > { %9189 = vmatprep.mubr.bf16.mxu0 %v8758_v59  ;;  %v12609_v59 = vmov 0.0  }
 0x7d3   : > { %9190 = vmatmul.mubr.bf16.vlgmr.msra.gmra.mrb[8].mxu0 %v8757_v26  ;;  %10944 = vmatprep.subr.bf16.mxu1 %v12609_v59  ;;  %v12181_v26 = vld [vmem:[#allocation19 + $0x10] sm:$0xff]  }
 0x7d4   : > { %9199 = vmatpush1.bf16.msra.mxu0 %v12115_v35  ;;  %10945 = vmatpush3.bf16.msra.mxu1 %v12179_v31  ;;  %v12180_v35 = vld [vmem:[#allocation19 + $0x8] sm:$0xff]  }
 0x7d5   : > { %9200 = vmatprep.subr.bf16.mxu0 %v12120_v1  ;;  %10946 = vmatprep.subr.bf16.mxu1 %v12609_v59  ;;  %v12182_v1 = vld [vmem:[#allocation19 + $0x18] sm:$0xff]  }
 0x7d6   : > { %10960 = vmatprep.mubr.msk.bf16.mxu1 %vm12610_vm0, %v12609_v59 }
 0x7d8   : > { %9201 = vmatpush1.bf16.msra.mxu0 %v12118_v55  ;;  %10947 = vmatpush3.bf16.msra.mxu1 %v12180_v35  ;;  %v12183_v55 = vld [vmem:[#allocation19 + $0x20] sm:$0xff]  }
 0x7d9   : > { %9202 = vmatprep.subr.bf16.mxu0 %v12123_v29  ;;  %10948 = vmatprep.subr.bf16.mxu1 %v12609_v59  ;;  %v12184_v29 = vld [vmem:[#allocation19 + $0x28] sm:$0xff]  }
 0x7dc   : > { %9203 = vmatpush1.bf16.msra.mxu0 %v12121_v33  ;;  %10949 = vmatpush3.bf16.msra.mxu1 %v12181_v26  ;;  %v8825_v33 = vld [vmem:[#allocation14] sm:$0x3] }
 0x7dd   : > { %9204 = vmatprep.subr.bf16.mxu0 %v12126_v34  ;;  %10950 = vmatprep.subr.bf16.mxu1 %v12609_v59  ;;  %v8830_v34 = vrot.slane %v8825_v33, %v13662_v41  ;;  %v10883_v41 = vld [vmem:[#allocation17] ss:$0 sm:$0xff] }
 0x7e0   : > { %9205 = vmatpush1.bf16.msra.mxu0 %v12124_v36  ;;  %10951 = vmatpush3.bf16.msra.mxu1 %v12182_v1  ;;  %v8834_v36 = vrot.slane %v8825_v33, %v13655_v27 }
 0x7e1   : > { %9206 = vmatprep.subr.bf16.mxu0 %v12129_v38  ;;  %10952 = vmatprep.subr.bf16.mxu1 %v12609_v59 }
 0x7e4   : > { %9207 = vmatpush1.bf16.msra.mxu0 %v12127_v39  ;;  %10953 = vmatpush3.bf16.msra.mxu1 %v12183_v55 }
 0x7e5   : > { %9208 = vmatprep.subr.bf16.mxu0 %v12132_v42  ;;  %10954 = vmatprep.subr.bf16.mxu1 %v12609_v59 }
 0x7e8   : > { %9209 = vmatpush1.bf16.msra.mxu0 %v12130_v43  ;;  %10955 = vmatpush3.bf16.msra.mxu1 %v12184_v29 }
 0x7e9   : > { %9210 = vmatprep.subr.bf16.mxu0 %v12135_v44  ;;  %10956 = vmatprep.subr.bf16.mxu1 %v12609_v59 }
 0x7ec   : > { %9211 = vmatpush1.bf16.msra.mxu0 %v12133_v45 }
 0x7ed   : > { %9212 = vmatprep.subr.bf16.mxu0 %v12138_v9 }
 0x7f0   : > { %9213 = vmatpush1.bf16.msra.mxu0 %v12136_v20 }
 0x7f1   : > { %9214 = vmatprep.subr.bf16.mxu0 %v12141_v60 }
 0x7f4   : > { %9215 = vmatpush1.bf16.msra.mxu0 %v12139_v46 }
 0x7f5   : > { %9216 = vmatprep.subr.bf16.mxu0 %v12144_v47  ;;  %v12185_v47 = vld [vmem:[#allocation19 + $0x30] sm:$0xff]  }
 0x7f6   : > { %10957 = vmatpush3.bf16.msra.mxu1 %v12185_v47 }
 0x7f7   : > { %10958 = vmatprep.subr.bf16.mxu1 %v12609_v59 }
 0x7f8   : > { %9217 = vmatpush1.bf16.msra.mxu0 %v12142_v14  ;;  %v12186_v14 = vld [vmem:[#allocation19 + $0x38] sm:$0xff]  }
 0x7f9   : > { %9218 = vmatprep.subr.bf16.mxu0 %v12147_v23 }
 0x7fa   : > { %10959 = vmatpush3.bf16.msra.mxu1 %v12186_v14 }
 0x7fc   : > { %9219 = vmatpush1.bf16.msra.mxu0 %v12145_v6 }
 0x7fd   : > { %9220 = vmatprep.subr.bf16.mxu0 %v12150_v50 }
 0x800   : > { %9221 = vmatpush1.bf16.msra.mxu0 %v12148_v49 }
 0x801   : > { %9222 = vmatprep.subr.bf16.mxu0 %v12153_v51 }
 0x804   : > { %9223 = vmatpush1.bf16.msra.mxu0 %v12151_v52 }
 0x805   : > { %9224 = vmatprep.subr.bf16.mxu0 %v12156_v53 }
 0x808   : > { %9225 = vmatpush1.bf16.msra.mxu0 %v12154_v15  ;;  %v10900_v15 = vld [vmem:[#allocation20] ss:$0 sm:$0xff] }
 0x809   : > { %9226 = vmatprep.subr.bf16.mxu0 %v12159_v17 }
 0x80c   : > { %9227 = vmatpush1.bf16.msra.mxu0 %v12157_v63 }
 0x80d   : > { %9228 = vmatprep.subr.bf16.mxu0 %v12162_v21 }
 0x810   : > { %9229 = vmatpush1.bf16.msra.mxu0 %v12160_v58 }
 0x811   : > { %10913 = vmatprep.subr.bf16.mxu0 %v12163_v61 }
 0x88a   : > { %v8746_v28 = vpop.f32.mrb[8].mxu1 }
 0x88b   : > { %v10972_v22 = vadd.f32 %v8746_v28, %v7538_v62  ;;  %v8748_v37 = vpop.f32.mrb[9].mxu1 }
 0x88c   : > { %v10973_v12 = vadd.f32 %v8748_v37, %v7542_v0  ;;  %v8750_v48 = vpop.f32.mrb[10].mxu1 }
 0x88d   : > { %v8755_v30 = vmax.f32 %v10972_v22, 0.0  ;;  %v8751_v11 = vpop.f32.mrb[11].mxu1 }
 0x88e   : > { %v8756_v54 = vmax.f32 %v10973_v12, 0.0 }
 0x88f   : > { %v8759_v3 = vpack.c.bf16 %v8755_v30, %v8755_v30 }
 0x890   : > { %v8760_v16 = vpack.c.bf16 %v8756_v54, %v8756_v54 }
 0x892   : > { %9230 = vmatprep.mubr.bf16.mxu0 %v8760_v16 }
 0x893   : > { %9231 = vmatmul.mubr.bf16.vlgmr.msra.gmra.mrb[8].mxu0 %v8759_v3 }
 0x894   : > { %10914 = vmatpush3.bf16.msra.mxu0 %v12164_v2 }
 0x895   : > { %10915 = vmatprep.subr.bf16.mxu0 %v12165_v4 }
 0x898   : > { %10916 = vmatpush3.bf16.msra.mxu0 %v12166_v40 }
 0x899   : > { %10917 = vmatprep.subr.bf16.mxu0 %v12167_v10 }
 0x89c   : > { %10918 = vmatpush3.bf16.msra.mxu0 %v12168_v8 }
 0x89d   : > { %10919 = vmatprep.subr.bf16.mxu0 %v12169_v5 }
 0x8a0   : > { %10920 = vmatpush3.bf16.msra.mxu0 %v12170_v7 }
 0x8a1   : > { %10921 = vmatprep.subr.bf16.mxu0 %v12171_v32 }
 0x8a4   : > { %10922 = vmatpush3.bf16.msra.mxu0 %v12172_v13 }
 0x8a5   : > { %10923 = vmatprep.subr.bf16.mxu0 %v12173_v18 }
 0x8a8   : > { %10924 = vmatpush3.bf16.msra.mxu0 %v12174_v56 }
 0x8a9   : > { %10925 = vmatprep.subr.bf16.mxu0 %v12175_v19 }
 0x8ac   : > { %10926 = vmatpush3.bf16.msra.mxu0 %v12176_v24 }
 0x8ad   : > { %10927 = vmatprep.subr.bf16.mxu0 %v12177_v25 }
 0x8b0   : > { %10928 = vmatpush3.bf16.msra.mxu0 %v12178_v57 }
 0x966   : > { %v9232_v38 = vpop.f32.mrb[8].mxu0 }
 0x967   : > { %v10974_v39 = vadd.f32 %v9232_v38, %v8830_v34  ;;  %v9234_v42 = vpop.f32.mrb[9].mxu0 }
 0x968   : > { %v10975_v43 = vadd.f32 %v9234_v42, %v8834_v36  ;;  %v9236_v44 = vpop.f32.mrb[10].mxu0 }
 0x969   : > { %v9239_v45 = vmax.f32 %v10974_v39, 0.0  ;;  %v9237_v9 = vpop.f32.mrb[11].mxu0 }
 0x96a   : > { %v9240_v20 = vmax.f32 %v10975_v43, 0.0 }
 0x96b   : > { %v9241_v46 = vpack.c.bf16 %v9239_v45, %v9239_v45 }
 0x96c   : > { %v9242_v60 = vpack.c.bf16 %v9240_v20, %v9240_v20 }
 0x96e   : > { %9410 = vmatprep.mubr.bf16.mxu0 %v9242_v60 }
 0x96f   : > { %9411 = vmatmul.mubr.bf16.vlgmr.msra.gmra.mrb[12].mxu0 %v9241_v46 }
 0xa42   : > { %v10929_v27 = vpop.f32.mrb[12].mxu0 }
 0xa43   : > { %v10930_v23 = vpop.f32.mrb[13].mxu0 }
 0xa44   : > { %v10931_v6 = vadd.f32 %v10930_v23, %v10929_v27  ;;  %v10932_v50 = vpop.f32.mrb[14].mxu0 }
 0xa45   : > { %v10933_v49 = vpop.f32.mrb[15].mxu0 }
 0xa46   : > { %v9413_v51 = vadd.f32 %v10931_v6, %v10883_v41 }
 0xa48   : > { %v9418_v52 = vmax.f32 %v9413_v51, 0.0 }
 0xa4a   : > { %v9419_v53 = vpack.c.bf16 %v9418_v52, %v9418_v52 }
 0xa4c   : > { %10961 = vmatmul.mubr.bf16.vlgmr.msra.gmra.mrb[12].mxu1 %v9419_v53 }
 0xb1f   : > { %v9525_v17 = vpop.f32.mrb[12].mxu1 }
 0xb20   : > { %v9526_v63 = vadd.f32 %v10900_v15, %v9525_v17  ;;  %v10962_v21 = vpop.f32.mrb[13].mxu1 }
 0xb21   : > { %v9528_v58 = vpop.f32.mrb[14].mxu1 }
 0xb22   : > { %9531 = vst [vmem:[%s13852_s13] sm:$0xff] %v9526_v63  ;;  %v10963_v61 = vpop.f32.mrb[15].mxu1 }
 0xb23 PF: > { %p29_p6 = scmp.ge.s32.totalorder %s12949_s18, 6   ;;  %s13853_s25 = smov %s12576_s26 }
 0xb24   : > { %s13854_s26 = smov %s12580_s27  ;;  %s13855_s27 = smov %s12960_s29 }
 0xb25   : > { %s13856_s28 = smov %s12949_s18  ;;  %31 = sbr.rel (!%p29_p6) target bundleno = 16 (0x10), region = 163 }
 0xb2c   :  { %9543 = vsyncpa [#allocation4], 1 }
 0xb2d   :  { %9545 = vsyncpa [#allocation4 + $0x1], 1 }
 0xb2e   :  { %9546 = vsyncpa [#allocation6], 1 }
 0xb2f   :  { %9547 = vsyncpa [#allocation9], 1 }
 0xb30   :  { %9548 = vsyncpa [#allocation12], 1 }
 0xb31   :  { %9549 = vsyncpa [#allocation15], 1 }
 0xb32   :  { %9550 = vsyncpa [#allocation18], 1 }
 0xb33   :  { %9551 = vsyncpa [#allocation21], 1 }

</bundles_post_ra>
